<compile_context>
chip_gen: v7x
topology: tpu7x:2x2x1
jax: 0.10.0
libtpu: 0.0.40
codegen_flags: <defaults>
</compile_context>

<pallas_src>
import functools

import jax
import jax.numpy as jnp
from jax import lax
from jax.experimental import pallas as pl
from jax.experimental.pallas import tpu as pltpu


_BN_EPS = 1e-5
_VMEM_LIMIT = 32 * 1024 * 1024  # explicit scoped-VMEM budget (safe on v5e/v6e/v7x)


# ----------------------------- Pallas kernels ------------------------------ #

def _conv1_shortcut_kernel(x_ref, w1_ref, s1_ref, b1_ref,
                           ws_ref, ss_ref, bs_ref, h1_ref, sc_ref):
    """Fused: h1 = relu(bn1(x @ w1)),  sc = bn_s(x @ ws).  x read once."""
    x = x_ref[...].astype(jnp.bfloat16)
    y1 = jnp.dot(x, w1_ref[...], preferred_element_type=jnp.float32)
    y1 = jnp.maximum(y1 * s1_ref[...] + b1_ref[...], 0.0)
    h1_ref[...] = y1.astype(h1_ref.dtype)
    ys = jnp.dot(x, ws_ref[...], preferred_element_type=jnp.float32)
    sc_ref[...] = (ys * ss_ref[...] + bs_ref[...]).astype(sc_ref.dtype)


def _conv1_kernel(x_ref, w1_ref, s1_ref, b1_ref, h1_ref):
    """h1 = relu(bn1(x @ w1)) -- used when the shortcut is identity."""
    x = x_ref[...].astype(jnp.bfloat16)
    y1 = jnp.dot(x, w1_ref[...], preferred_element_type=jnp.float32)
    y1 = jnp.maximum(y1 * s1_ref[...] + b1_ref[...], 0.0)
    h1_ref[...] = y1.astype(h1_ref.dtype)


def _conv3x3_kernel(hp_ref, w2_ref, s2_ref, b2_ref, o_ref, *, H, W):
    """3x3 conv for one image: 9 shifted-slice matmuls accumulated in VMEM.

    hp_ref: ((H+4)*(W+2), C) bf16  -- h1 zero-padded by (2,2)/(1,1), flattened
    o_ref : (H*(W+2), C)          -- W-extended output (2 junk cols / row)
    """
    Wp = W + 2
    L = H * Wp
    hp = hp_ref[...]
    acc = None
    for di in range(3):
        for dj in range(3):
            s = (di + 1) * Wp + dj - 1          # static slice start
            xt = hp[s:s + L, :]
            c = jnp.dot(xt, w2_ref[di * 3 + dj],
                        preferred_element_type=jnp.float32)
            acc = c if acc is None else acc + c
    y = jnp.maximum(acc * s2_ref[...] + b2_ref[...], 0.0)
    o_ref[...] = y.astype(o_ref.dtype)


def _conv3_residual_kernel(x_ref, w_ref, s_ref, b_ref, res_ref, o_ref):
    """o = relu(bn3(x @ w3) + residual) -- fully fused final conv."""
    y = jnp.dot(x_ref[...], w_ref[...], preferred_element_type=jnp.float32)
    y = y * s_ref[...] + b_ref[...] + res_ref[...]
    o_ref[...] = jnp.maximum(y, 0.0).astype(o_ref.dtype)


# ------------------------------ call wrappers ------------------------------ #

def _round_up(x, m):
    return (x + m - 1) // m * m


def _tile_rows(m):
    """Padded row count (multiple of 128) and a large MXU-friendly row tile."""
    mp = _round_up(m, 128)
    for tm in (512, 256, 128):
        if mp % tm == 0:
            return mp, tm
    return mp, 128


def _pad_rows(a, mp):
    return a if a.shape[0] == mp else jnp.pad(a, ((0, mp - a.shape[0]), (0, 0)))


def _crop_rows(a, m):
    return a if a.shape[0] == m else a[:m]


def _compiler_params():
    return pltpu.CompilerParams(dimension_semantics=("parallel",),
                                vmem_limit_bytes=_VMEM_LIMIT)


def conv1_and_shortcut(x2, w1, s1, b1, wsc=None, ssc=None, bsc=None):
    """Fused conv1(+bn+relu) and optional 1x1 shortcut conv(+bn)."""
    m, cin = x2.shape
    cmid = w1.shape[1]
    mp, tm = _tile_rows(m)
    xp = _pad_rows(x2, mp)
    grid = (mp // tm,)

    if wsc is None:
        h1 = pl.pallas_call(
            _conv1_kernel,
            out_shape=jax.ShapeDtypeStruct((mp, cmid), jnp.bfloat16),
            grid=grid,
            in_specs=[
                pl.BlockSpec((tm, cin), lambda i: (i, 0)),
                pl.BlockSpec((cin, cmid), lambda i: (0, 0)),
                pl.BlockSpec((1, cmid), lambda i: (0, 0)),
                pl.BlockSpec((1, cmid), lambda i: (0, 0)),
            ],
            out_specs=pl.BlockSpec((tm, cmid), lambda i: (i, 0)),
            compiler_params=_compiler_params(),
        )(xp, w1, s1, b1)
        return _crop_rows(h1, m), None

    cout = wsc.shape[1]
    h1, sc = pl.pallas_call(
        _conv1_shortcut_kernel,
        out_shape=(jax.ShapeDtypeStruct((mp, cmid), jnp.bfloat16),
                   jax.ShapeDtypeStruct((mp, cout), jnp.float32)),
        grid=grid,
        in_specs=[
            pl.BlockSpec((tm, cin), lambda i: (i, 0)),
            pl.BlockSpec((cin, cmid), lambda i: (0, 0)),
            pl.BlockSpec((1, cmid), lambda i: (0, 0)),
            pl.BlockSpec((1, cmid), lambda i: (0, 0)),
            pl.BlockSpec((cin, cout), lambda i: (0, 0)),
            pl.BlockSpec((1, cout), lambda i: (0, 0)),
            pl.BlockSpec((1, cout), lambda i: (0, 0)),
        ],
        out_specs=[pl.BlockSpec((tm, cmid), lambda i: (i, 0)),
                   pl.BlockSpec((tm, cout), lambda i: (i, 0))],
        compiler_params=_compiler_params(),
    )(xp, w1, s1, b1, wsc, ssc, bsc)
    return _crop_rows(h1, m), _crop_rows(sc, m)


def conv3x3_bn_relu(h1_nhwc, w2_taps, s2, b2):
    """3x3 conv (pad=1) + bn + relu without materialized im2col."""
    n, h, w, c = h1_nhwc.shape
    # Pad H by 2 on each side (gives the in-kernel slices guard rows) and W by 1.
    hp = jnp.pad(h1_nhwc, ((0, 0), (2, 2), (1, 1), (0, 0)))
    p4 = (h + 4) * (w + 2)
    l = h * (w + 2)
    hp2 = hp.reshape(n, p4, c)

    kern = functools.partial(_conv3x3_kernel, H=h, W=w)
    out = pl.pallas_call(
        kern,
        out_shape=jax.ShapeDtypeStruct((n, l, c), jnp.bfloat16),
        grid=(n,),
        in_specs=[
            pl.BlockSpec((None, p4, c), lambda i: (i, 0, 0)),
            pl.BlockSpec((9, c, c), lambda i: (0, 0, 0)),
            pl.BlockSpec((1, c), lambda i: (0, 0)),
            pl.BlockSpec((1, c), lambda i: (0, 0)),
        ],
        out_specs=pl.BlockSpec((None, l, c), lambda i: (i, 0, 0)),
        compiler_params=_compiler_params(),
    )(hp2, w2_taps, s2, b2)
    # Drop the two junk columns produced by the W-extended layout.
    return out.reshape(n, h, w + 2, c)[:, :, 1:w + 1, :]


def conv3_bn_add_relu(h2_flat, w3, s3, b3, residual):
    m, cmid = h2_flat.shape
    cout = w3.shape[1]
    mp, tm = _tile_rows(m)
    xp = _pad_rows(h2_flat, mp)
    rp = _pad_rows(residual, mp)
    out = pl.pallas_call(
        _conv3_residual_kernel,
        out_shape=jax.ShapeDtypeStruct((mp, cout), jnp.float32),
        grid=(mp // tm,),
        in_specs=[
            pl.BlockSpec((tm, cmid), lambda i: (i, 0)),
            pl.BlockSpec((cmid, cout), lambda i: (0, 0)),
            pl.BlockSpec((1, cout), lambda i: (0, 0)),
            pl.BlockSpec((1, cout), lambda i: (0, 0)),
            pl.BlockSpec((tm, cout), lambda i: (i, 0)),
        ],
        out_specs=pl.BlockSpec((tm, cout), lambda i: (i, 0)),
        compiler_params=_compiler_params(),
    )(xp, w3, s3, b3, rp)
    return _crop_rows(out, m)


# ------------------------------ Block forward ------------------------------ #

def _bn_fold(gamma, beta, mean, var, eps=_BN_EPS):
    scale = gamma / jnp.sqrt(var + eps)
    bias = beta - mean * scale
    return (scale.reshape(1, -1).astype(jnp.float32),
            bias.reshape(1, -1).astype(jnp.float32))


def block_forward(x_nchw, params, stride=1):
    """Pallas implementation of Block.forward.  x_nchw: (N, Cin, H, W) f32."""
    x = jnp.transpose(x_nchw, (0, 2, 3, 1)).astype(jnp.float32)   # -> NHWC
    n, h, w, cin = x.shape
    xs = x[:, ::stride, ::stride, :] if stride != 1 else x
    _, hs, ws_, _ = xs.shape
    xs2 = xs.reshape(n * hs * ws_, cin)

    cmid = params["w1"].shape[0]
    cout = params["w3"].shape[0]

    # conv1 (1x1, stride) + bn1 + relu, fused with the 1x1 shortcut conv + bn.
    w1 = params["w1"][:, :, 0, 0].T.astype(jnp.bfloat16)           # (Cin, Cmid)
    s1, b1 = _bn_fold(*params["bn1"])
    if stride != 1 or cin != cout:
        wsc = params["ws"][:, :, 0, 0].T.astype(jnp.bfloat16)      # (Cin, Cout)
        ss, bs = _bn_fold(*params["bns"])
        h1, sc = conv1_and_shortcut(xs2, w1, s1, b1, wsc, ss, bs)
    else:
        h1, _ = conv1_and_shortcut(xs2, w1, s1, b1)
        sc = xs2                                                   # identity shortcut
    h1 = h1.reshape(n, hs, ws_, cmid)

    # conv2 (3x3, pad=1) + bn2 + relu -- tap-accumulated in VMEM, no im2col.
    w2_taps = jnp.transpose(params["w2"], (2, 3, 1, 0)).reshape(9, cmid, cmid)
    w2_taps = w2_taps.astype(jnp.bfloat16)
    s2, b2 = _bn_fold(*params["bn2"])
    h2 = conv3x3_bn_relu(h1, w2_taps, s2, b2)                      # (N,H,W,Cmid) bf16
    h2_flat = h2.reshape(n * hs * ws_, cmid)

    # conv3 (1x1) + bn3 + residual add + relu (fully fused).
    w3 = params["w3"][:, :, 0, 0].T.astype(jnp.bfloat16)           # (Cmid, Cout)
    s3, b3 = _bn_fold(*params["bn3"])
    out = conv3_bn_add_relu(h2_flat, w3, s3, b3, sc)
    out = out.reshape(n, hs, ws_, cout)
    return jnp.transpose(out, (0, 3, 1, 2))                        # back to NCHW


# --------------------------- pure-JAX reference ----------------------------- #

def _ref_conv(x, w, stride=1, pad=0):
    return lax.conv_general_dilated(
        x, w, (stride, stride), [(pad, pad), (pad, pad)],
        dimension_numbers=("NCHW", "OIHW", "NCHW"))


def _ref_bn(x, gamma, beta, mean, var, eps=_BN_EPS):
    rs = lambda v: v.reshape(1, -1, 1, 1)
    return (x - rs(mean)) / jnp.sqrt(rs(var) + eps) * rs(gamma) + rs(beta)


def block_reference(x, params, stride=1):
    f = _ref_conv(x, params["w1"], stride=stride)
    f = jnp.maximum(_ref_bn(f, *params["bn1"]), 0.0)
    f = _ref_conv(f, params["w2"], pad=1)
    f = jnp.maximum(_ref_bn(f, *params["bn2"]), 0.0)
    f = _ref_conv(f, params["w3"])
    f = _ref_bn(f, *params["bn3"])
    cin, cout = x.shape[1], params["w3"].shape[0]
    if stride != 1 or cin != cout:
        s = _ref_bn(_ref_conv(x, params["ws"], stride=stride), *params["bns"])
    else:
        s = x
    return jnp.maximum(f + s, 0.0)


# --------------------------------- setup ----------------------------------- #

def init_params(key, in_dim, out_dim):
    cmid, cout = out_dim, out_dim * 4

    def bn_init(k, c):
        k1, k2, k3, k4 = jax.random.split(k, 4)
        gamma = 1.0 + 0.1 * jax.random.normal(k1, (c,), jnp.float32)
        beta = 0.1 * jax.random.normal(k2, (c,), jnp.float32)
        mean = 0.1 * jax.random.normal(k3, (c,), jnp.float32)
        var = 0.5 + 0.1 * jax.random.uniform(k4, (c,), jnp.float32)
        return gamma, beta, mean, var

    ks = jax.random.split(key, 8)
    return {
        # weights in PyTorch OIHW layout
        "w1": 0.2 * jax.random.normal(ks[0], (cmid, in_dim, 1, 1), jnp.float32),
        "w2": 0.2 * jax.random.normal(ks[1], (cmid, cmid, 3, 3), jnp.float32),
        "w3": 0.2 * jax.random.normal(ks[2], (cout, cmid, 1, 1), jnp.float32),
        "ws": 0.2 * jax.random.normal(ks[3], (cout, in_dim, 1, 1), jnp.float32),
        "bn1": bn_init(ks[4], cmid),
        "bn2": bn_init(ks[5], cmid),
        "bn3": bn_init(ks[6], cout),
        "bns": bn_init(ks[7], cout),
    }


if __name__ == "__main__":
    key = jax.random.PRNGKey(0)
    kx, kp = jax.random.split(key)

    in_dim, out_dim, stride = 16, 8, 1
    batch, spatial = 2, 16
    x = jax.random.normal(kx, (batch, in_dim, spatial, spatial), jnp.float32)
    params = init_params(kp, in_dim, out_dim)

    fwd = jax.jit(functools.partial(block_forward, stride=stride))
    out = jax.block_until_ready(fwd(x, params))
    ref = jax.block_until_ready(block_reference(x, params, stride=stride))

    assert out.shape == (batch, out_dim * 4, spatial, spatial)
    # bf16 MXU matmuls (f32 accumulation) -> loosened tolerance vs f32 reference.
    rel_l2 = jnp.linalg.norm(out - ref) / jnp.linalg.norm(ref)
    assert rel_l2 < 3e-2, f"relative L2 error too large: {rel_l2}"
    assert jnp.allclose(out, ref, rtol=1e-1, atol=1e-1), "mismatch vs reference"

    print("KERNEL_OK")
</pallas_src>

<mosaic_0001>
module attributes {stable_mosaic.version = 11 : i64} {
  func.func @_conv1_shortcut_kernel(%arg0: i32, %arg1: memref<512x16xf32, #tpu.memory_space<vmem>>, %arg2: memref<16x8xbf16, #tpu.memory_space<vmem>>, %arg3: memref<1x8xf32, #tpu.memory_space<vmem>>, %arg4: memref<1x8xf32, #tpu.memory_space<vmem>>, %arg5: memref<16x32xbf16, #tpu.memory_space<vmem>>, %arg6: memref<1x32xf32, #tpu.memory_space<vmem>>, %arg7: memref<1x32xf32, #tpu.memory_space<vmem>>, %arg8: memref<512x8xbf16, #tpu.memory_space<vmem>>, %arg9: memref<512x32xf32, #tpu.memory_space<vmem>>) attributes {dimension_semantics = [#tpu.dimension_semantics<parallel>], iteration_bounds = array<i64: 1>, scalar_prefetch = 0 : i64, scratch_operands = 0 : i64, tpu.core_type = #tpu.core_type<tc>, window_params = [{transform_indices = @transform_0, window_bounds = array<i64: 512, 16>}, {pipeline_mode = #tpu.pipeline_mode<synchronous>, transform_indices = @transform_1, window_bounds = array<i64: 16, 8>}, {pipeline_mode = #tpu.pipeline_mode<synchronous>, transform_indices = @transform_2, window_bounds = array<i64: 1, 8>}, {pipeline_mode = #tpu.pipeline_mode<synchronous>, transform_indices = @transform_3, window_bounds = array<i64: 1, 8>}, {pipeline_mode = #tpu.pipeline_mode<synchronous>, transform_indices = @transform_4, window_bounds = array<i64: 16, 32>}, {pipeline_mode = #tpu.pipeline_mode<synchronous>, transform_indices = @transform_5, window_bounds = array<i64: 1, 32>}, {pipeline_mode = #tpu.pipeline_mode<synchronous>, transform_indices = @transform_6, window_bounds = array<i64: 1, 32>}, {transform_indices = @transform_7, window_bounds = array<i64: 512, 8>}, {transform_indices = @transform_8, window_bounds = array<i64: 512, 32>}]} {
    %c0 = arith.constant 0 : index
    %c0_0 = arith.constant 0 : index
    %0 = vector.load %arg1[%c0, %c0_0] : memref<512x16xf32, #tpu.memory_space<vmem>>, vector<512x16xf32>
    %1 = arith.truncf %0 : vector<512x16xf32> to vector<512x16xbf16>
    %c0_1 = arith.constant 0 : index
    %c0_2 = arith.constant 0 : index
    %2 = vector.load %arg2[%c0_1, %c0_2] : memref<16x8xbf16, #tpu.memory_space<vmem>>, vector<16x8xbf16>
    %cst = arith.constant dense<0.000000e+00> : vector<512x8xf32>
    %3 = tpu.matmul %1, %2, %cst {dimension_numbers = #tpu.dot_dimension_numbers<[1], [0], [0], [1], [0, 0, 1, 1], [], []>} : vector<512x16xbf16>, vector<16x8xbf16>, vector<512x8xf32> -> vector<512x8xf32>
    %c0_3 = arith.constant 0 : index
    %c0_4 = arith.constant 0 : index
    %4 = vector.load %arg3[%c0_3, %c0_4] : memref<1x8xf32, #tpu.memory_space<vmem>>, vector<1x8xf32>
    %5 = vector.broadcast %4 : vector<1x8xf32> to vector<512x8xf32>
    %6 = arith.mulf %3, %5 : vector<512x8xf32>
    %c0_5 = arith.constant 0 : index
    %c0_6 = arith.constant 0 : index
    %7 = vector.load %arg4[%c0_5, %c0_6] : memref<1x8xf32, #tpu.memory_space<vmem>>, vector<1x8xf32>
    %8 = vector.broadcast %7 : vector<1x8xf32> to vector<512x8xf32>
    %9 = arith.addf %6, %8 : vector<512x8xf32>
    %cst_7 = arith.constant 0.000000e+00 : f32
    %10 = vector.broadcast %cst_7 : f32 to vector<512x8xf32>
    %11 = arith.maximumf %9, %10 : vector<512x8xf32>
    %12 = arith.truncf %11 : vector<512x8xf32> to vector<512x8xbf16>
    %c0_8 = arith.constant 0 : index
    %c0_9 = arith.constant 0 : index
    %13 = vector.load %arg8[%c0_8, %c0_9] : memref<512x8xbf16, #tpu.memory_space<vmem>>, vector<512x8xbf16>
    tpu.vector_store %arg8[%c0_8, %c0_9], %12 {strides = array<i32>} : memref<512x8xbf16, #tpu.memory_space<vmem>>, vector<512x8xbf16>,
    %c0_10 = arith.constant 0 : index
    %c0_11 = arith.constant 0 : index
    %14 = vector.load %arg5[%c0_10, %c0_11] : memref<16x32xbf16, #tpu.memory_space<vmem>>, vector<16x32xbf16>
    %cst_12 = arith.constant dense<0.000000e+00> : vector<512x32xf32>
    %15 = tpu.matmul %1, %14, %cst_12 {dimension_numbers = #tpu.dot_dimension_numbers<[1], [0], [0], [1], [0, 0, 1, 1], [], []>} : vector<512x16xbf16>, vector<16x32xbf16>, vector<512x32xf32> -> vector<512x32xf32>
    %c0_13 = arith.constant 0 : index
    %c0_14 = arith.constant 0 : index
    %16 = vector.load %arg6[%c0_13, %c0_14] : memref<1x32xf32, #tpu.memory_space<vmem>>, vector<1x32xf32>
    %17 = vector.broadcast %16 : vector<1x32xf32> to vector<512x32xf32>
    %18 = arith.mulf %15, %17 : vector<512x32xf32>
    %c0_15 = arith.constant 0 : index
    %c0_16 = arith.constant 0 : index
    %19 = vector.load %arg7[%c0_15, %c0_16] : memref<1x32xf32, #tpu.memory_space<vmem>>, vector<1x32xf32>
    %20 = vector.broadcast %19 : vector<1x32xf32> to vector<512x32xf32>
    %21 = arith.addf %18, %20 : vector<512x32xf32>
    %c0_17 = arith.constant 0 : index
    %c0_18 = arith.constant 0 : index
    %22 = vector.load %arg9[%c0_17, %c0_18] : memref<512x32xf32, #tpu.memory_space<vmem>>, vector<512x32xf32>
    tpu.vector_store %arg9[%c0_17, %c0_18], %21 {strides = array<i32>} : memref<512x32xf32, #tpu.memory_space<vmem>>, vector<512x32xf32>,
    return
  }
  func.func @transform_0(%arg0: i32) -> (i32, i32) {
    %c0_i32 = arith.constant 0 : i32
    %c0_i32_0 = arith.constant 0 : i32
    return %arg0, %c0_i32 : i32, i32
  }
  func.func @transform_1(%arg0: i32) -> (i32, i32) {
    %c0_i32 = arith.constant 0 : i32
    %c0_i32_0 = arith.constant 0 : i32
    %c0_i32_1 = arith.constant 0 : i32
    return %c0_i32, %c0_i32_0 : i32, i32
  }
  func.func @transform_2(%arg0: i32) -> (i32, i32) {
    %c0_i32 = arith.constant 0 : i32
    %c0_i32_0 = arith.constant 0 : i32
    %c0_i32_1 = arith.constant 0 : i32
    return %c0_i32, %c0_i32_0 : i32, i32
  }
  func.func @transform_3(%arg0: i32) -> (i32, i32) {
    %c0_i32 = arith.constant 0 : i32
    %c0_i32_0 = arith.constant 0 : i32
    %c0_i32_1 = arith.constant 0 : i32
    return %c0_i32, %c0_i32_0 : i32, i32
  }
  func.func @transform_4(%arg0: i32) -> (i32, i32) {
    %c0_i32 = arith.constant 0 : i32
    %c0_i32_0 = arith.constant 0 : i32
    %c0_i32_1 = arith.constant 0 : i32
    return %c0_i32, %c0_i32_0 : i32, i32
  }
  func.func @transform_5(%arg0: i32) -> (i32, i32) {
    %c0_i32 = arith.constant 0 : i32
    %c0_i32_0 = arith.constant 0 : i32
    %c0_i32_1 = arith.constant 0 : i32
    return %c0_i32, %c0_i32_0 : i32, i32
  }
  func.func @transform_6(%arg0: i32) -> (i32, i32) {
    %c0_i32 = arith.constant 0 : i32
    %c0_i32_0 = arith.constant 0 : i32
    %c0_i32_1 = arith.constant 0 : i32
    return %c0_i32, %c0_i32_0 : i32, i32
  }
  func.func @transform_7(%arg0: i32) -> (i32, i32) {
    %c0_i32 = arith.constant 0 : i32
    %c0_i32_0 = arith.constant 0 : i32
    return %arg0, %c0_i32 : i32, i32
  }
  func.func @transform_8(%arg0: i32) -> (i32, i32) {
    %c0_i32 = arith.constant 0 : i32
    %c0_i32_0 = arith.constant 0 : i32
    return %arg0, %c0_i32 : i32, i32
  }
}

module attributes {stable_mosaic.version = 11 : i64} {
  func.func @_conv3x3_kernel(%arg0: i32, %arg1: memref<1x360x8xbf16, #tpu.memory_space<vmem>>, %arg2: memref<9x8x8xbf16, #tpu.memory_space<vmem>>, %arg3: memref<1x8xf32, #tpu.memory_space<vmem>>, %arg4: memref<1x8xf32, #tpu.memory_space<vmem>>, %arg5: memref<1x288x8xbf16, #tpu.memory_space<vmem>>) attributes {dimension_semantics = [#tpu.dimension_semantics<parallel>], iteration_bounds = array<i64: 2>, scalar_prefetch = 0 : i64, scratch_operands = 0 : i64, tpu.core_type = #tpu.core_type<tc>, window_params = [{transform_indices = @transform_0, window_bounds = array<i64: 1, 360, 8>}, {pipeline_mode = #tpu.pipeline_mode<synchronous>, transform_indices = @transform_1, window_bounds = array<i64: 9, 8, 8>}, {pipeline_mode = #tpu.pipeline_mode<synchronous>, transform_indices = @transform_2, window_bounds = array<i64: 1, 8>}, {pipeline_mode = #tpu.pipeline_mode<synchronous>, transform_indices = @transform_3, window_bounds = array<i64: 1, 8>}, {transform_indices = @transform_4, window_bounds = array<i64: 1, 288, 8>}]} {
    %c0 = arith.constant 0 : index
    %c0_0 = arith.constant 0 : index
    %c0_1 = arith.constant 0 : index
    %0 = vector.load %arg1[%c0, %c0_0, %c0_1] : memref<1x360x8xbf16, #tpu.memory_space<vmem>>, vector<1x360x8xbf16>
    %1 = vector.shape_cast %0 : vector<1x360x8xbf16> to vector<360x8xbf16>
    %2 = vector.extract_strided_slice %1 {offsets = [17, 0], sizes = [288, 8], strides = [1, 1]} : vector<360x8xbf16> to vector<288x8xbf16>
    %c0_2 = arith.constant 0 : index
    %c0_3 = arith.constant 0 : index
    %c0_4 = arith.constant 0 : index
    %3 = vector.load %arg2[%c0_2, %c0_3, %c0_4] : memref<9x8x8xbf16, #tpu.memory_space<vmem>>, vector<1x8x8xbf16>
    %4 = vector.shape_cast %3 : vector<1x8x8xbf16> to vector<8x8xbf16>
    %cst = arith.constant dense<0.000000e+00> : vector<288x8xf32>
    %5 = tpu.matmul %2, %4, %cst {dimension_numbers = #tpu.dot_dimension_numbers<[1], [0], [0], [1], [0, 0, 1, 1], [], []>} : vector<288x8xbf16>, vector<8x8xbf16>, vector<288x8xf32> -> vector<288x8xf32>
    %6 = vector.extract_strided_slice %1 {offsets = [18, 0], sizes = [288, 8], strides = [1, 1]} : vector<360x8xbf16> to vector<288x8xbf16>
    %c1 = arith.constant 1 : index
    %c0_5 = arith.constant 0 : index
    %c0_6 = arith.constant 0 : index
    %7 = vector.load %arg2[%c1, %c0_5, %c0_6] : memref<9x8x8xbf16, #tpu.memory_space<vmem>>, vector<1x8x8xbf16>
    %8 = vector.shape_cast %7 : vector<1x8x8xbf16> to vector<8x8xbf16>
    %cst_7 = arith.constant dense<0.000000e+00> : vector<288x8xf32>
    %9 = tpu.matmul %6, %8, %cst_7 {dimension_numbers = #tpu.dot_dimension_numbers<[1], [0], [0], [1], [0, 0, 1, 1], [], []>} : vector<288x8xbf16>, vector<8x8xbf16>, vector<288x8xf32> -> vector<288x8xf32>
    %10 = arith.addf %5, %9 : vector<288x8xf32>
    %11 = vector.extract_strided_slice %1 {offsets = [19, 0], sizes = [288, 8], strides = [1, 1]} : vector<360x8xbf16> to vector<288x8xbf16>
    %c2 = arith.constant 2 : index
    %c0_8 = arith.constant 0 : index
    %c0_9 = arith.constant 0 : index
    %12 = vector.load %arg2[%c2, %c0_8, %c0_9] : memref<9x8x8xbf16, #tpu.memory_space<vmem>>, vector<1x8x8xbf16>
    %13 = vector.shape_cast %12 : vector<1x8x8xbf16> to vector<8x8xbf16>
    %cst_10 = arith.constant dense<0.000000e+00> : vector<288x8xf32>
    %14 = tpu.matmul %11, %13, %cst_10 {dimension_numbers = #tpu.dot_dimension_numbers<[1], [0], [0], [1], [0, 0, 1, 1], [], []>} : vector<288x8xbf16>, vector<8x8xbf16>, vector<288x8xf32> -> vector<288x8xf32>
    %15 = arith.addf %10, %14 : vector<288x8xf32>
    %16 = vector.extract_strided_slice %1 {offsets = [35, 0], sizes = [288, 8], strides = [1, 1]} : vector<360x8xbf16> to vector<288x8xbf16>
    %c3 = arith.constant 3 : index
    %c0_11 = arith.constant 0 : index
    %c0_12 = arith.constant 0 : index
    %17 = vector.load %arg2[%c3, %c0_11, %c0_12] : memref<9x8x8xbf16, #tpu.memory_space<vmem>>, vector<1x8x8xbf16>
    %18 = vector.shape_cast %17 : vector<1x8x8xbf16> to vector<8x8xbf16>
    %cst_13 = arith.constant dense<0.000000e+00> : vector<288x8xf32>
    %19 = tpu.matmul %16, %18, %cst_13 {dimension_numbers = #tpu.dot_dimension_numbers<[1], [0], [0], [1], [0, 0, 1, 1], [], []>} : vector<288x8xbf16>, vector<8x8xbf16>, vector<288x8xf32> -> vector<288x8xf32>
    %20 = arith.addf %15, %19 : vector<288x8xf32>
    %21 = vector.extract_strided_slice %1 {offsets = [36, 0], sizes = [288, 8], strides = [1, 1]} : vector<360x8xbf16> to vector<288x8xbf16>
    %c4 = arith.constant 4 : index
    %c0_14 = arith.constant 0 : index
    %c0_15 = arith.constant 0 : index
    %22 = vector.load %arg2[%c4, %c0_14, %c0_15] : memref<9x8x8xbf16, #tpu.memory_space<vmem>>, vector<1x8x8xbf16>
    %23 = vector.shape_cast %22 : vector<1x8x8xbf16> to vector<8x8xbf16>
    %cst_16 = arith.constant dense<0.000000e+00> : vector<288x8xf32>
    %24 = tpu.matmul %21, %23, %cst_16 {dimension_numbers = #tpu.dot_dimension_numbers<[1], [0], [0], [1], [0, 0, 1, 1], [], []>} : vector<288x8xbf16>, vector<8x8xbf16>, vector<288x8xf32> -> vector<288x8xf32>
    %25 = arith.addf %20, %24 : vector<288x8xf32>
    %26 = vector.extract_strided_slice %1 {offsets = [37, 0], sizes = [288, 8], strides = [1, 1]} : vector<360x8xbf16> to vector<288x8xbf16>
    %c5 = arith.constant 5 : index
    %c0_17 = arith.constant 0 : index
    %c0_18 = arith.constant 0 : index
    %27 = vector.load %arg2[%c5, %c0_17, %c0_18] : memref<9x8x8xbf16, #tpu.memory_space<vmem>>, vector<1x8x8xbf16>
    %28 = vector.shape_cast %27 : vector<1x8x8xbf16> to vector<8x8xbf16>
    %cst_19 = arith.constant dense<0.000000e+00> : vector<288x8xf32>
    %29 = tpu.matmul %26, %28, %cst_19 {dimension_numbers = #tpu.dot_dimension_numbers<[1], [0], [0], [1], [0, 0, 1, 1], [], []>} : vector<288x8xbf16>, vector<8x8xbf16>, vector<288x8xf32> -> vector<288x8xf32>
    %30 = arith.addf %25, %29 : vector<288x8xf32>
    %31 = vector.extract_strided_slice %1 {offsets = [53, 0], sizes = [288, 8], strides = [1, 1]} : vector<360x8xbf16> to vector<288x8xbf16>
    %c6 = arith.constant 6 : index
    %c0_20 = arith.constant 0 : index
    %c0_21 = arith.constant 0 : index
    %32 = vector.load %arg2[%c6, %c0_20, %c0_21] : memref<9x8x8xbf16, #tpu.memory_space<vmem>>, vector<1x8x8xbf16>
    %33 = vector.shape_cast %32 : vector<1x8x8xbf16> to vector<8x8xbf16>
    %cst_22 = arith.constant dense<0.000000e+00> : vector<288x8xf32>
    %34 = tpu.matmul %31, %33, %cst_22 {dimension_numbers = #tpu.dot_dimension_numbers<[1], [0], [0], [1], [0, 0, 1, 1], [], []>} : vector<288x8xbf16>, vector<8x8xbf16>, vector<288x8xf32> -> vector<288x8xf32>
    %35 = arith.addf %30, %34 : vector<288x8xf32>
    %36 = vector.extract_strided_slice %1 {offsets = [54, 0], sizes = [288, 8], strides = [1, 1]} : vector<360x8xbf16> to vector<288x8xbf16>
    %c7 = arith.constant 7 : index
    %c0_23 = arith.constant 0 : index
    %c0_24 = arith.constant 0 : index
    %37 = vector.load %arg2[%c7, %c0_23, %c0_24] : memref<9x8x8xbf16, #tpu.memory_space<vmem>>, vector<1x8x8xbf16>
    %38 = vector.shape_cast %37 : vector<1x8x8xbf16> to vector<8x8xbf16>
    %cst_25 = arith.constant dense<0.000000e+00> : vector<288x8xf32>
    %39 = tpu.matmul %36, %38, %cst_25 {dimension_numbers = #tpu.dot_dimension_numbers<[1], [0], [0], [1], [0, 0, 1, 1], [], []>} : vector<288x8xbf16>, vector<8x8xbf16>, vector<288x8xf32> -> vector<288x8xf32>
    %40 = arith.addf %35, %39 : vector<288x8xf32>
    %41 = vector.extract_strided_slice %1 {offsets = [55, 0], sizes = [288, 8], strides = [1, 1]} : vector<360x8xbf16> to vector<288x8xbf16>
    %c8 = arith.constant 8 : index
    %c0_26 = arith.constant 0 : index
    %c0_27 = arith.constant 0 : index
    %42 = vector.load %arg2[%c8, %c0_26, %c0_27] : memref<9x8x8xbf16, #tpu.memory_space<vmem>>, vector<1x8x8xbf16>
    %43 = vector.shape_cast %42 : vector<1x8x8xbf16> to vector<8x8xbf16>
    %cst_28 = arith.constant dense<0.000000e+00> : vector<288x8xf32>
    %44 = tpu.matmul %41, %43, %cst_28 {dimension_numbers = #tpu.dot_dimension_numbers<[1], [0], [0], [1], [0, 0, 1, 1], [], []>} : vector<288x8xbf16>, vector<8x8xbf16>, vector<288x8xf32> -> vector<288x8xf32>
    %45 = arith.addf %40, %44 : vector<288x8xf32>
    %c0_29 = arith.constant 0 : index
    %c0_30 = arith.constant 0 : index
    %46 = vector.load %arg3[%c0_29, %c0_30] : memref<1x8xf32, #tpu.memory_space<vmem>>, vector<1x8xf32>
    %47 = vector.broadcast %46 : vector<1x8xf32> to vector<288x8xf32>
    %48 = arith.mulf %45, %47 : vector<288x8xf32>
    %c0_31 = arith.constant 0 : index
    %c0_32 = arith.constant 0 : index
    %49 = vector.load %arg4[%c0_31, %c0_32] : memref<1x8xf32, #tpu.memory_space<vmem>>, vector<1x8xf32>
    %50 = vector.broadcast %49 : vector<1x8xf32> to vector<288x8xf32>
    %51 = arith.addf %48, %50 : vector<288x8xf32>
    %cst_33 = arith.constant 0.000000e+00 : f32
    %52 = vector.broadcast %cst_33 : f32 to vector<288x8xf32>
    %53 = arith.maximumf %51, %52 : vector<288x8xf32>
    %54 = arith.truncf %53 : vector<288x8xf32> to vector<288x8xbf16>
    %c0_34 = arith.constant 0 : index
    %c0_35 = arith.constant 0 : index
    %c0_36 = arith.constant 0 : index
    %55 = vector.load %arg5[%c0_34, %c0_35, %c0_36] : memref<1x288x8xbf16, #tpu.memory_space<vmem>>, vector<1x288x8xbf16>
    %56 = vector.shape_cast %55 : vector<1x288x8xbf16> to vector<288x8xbf16>
    %57 = vector.shape_cast %54 : vector<288x8xbf16> to vector<1x288x8xbf16>
    tpu.vector_store %arg5[%c0_34, %c0_35, %c0_36], %57 {strides = array<i32>} : memref<1x288x8xbf16, #tpu.memory_space<vmem>>, vector<1x288x8xbf16>,
    return
  }
  func.func @transform_0(%arg0: i32) -> (i32, i32, i32) {
    %c0_i32 = arith.constant 0 : i32
    %c0_i32_0 = arith.constant 0 : i32
    %c0_i32_1 = arith.constant 0 : i32
    return %arg0, %c0_i32, %c0_i32_0 : i32, i32, i32
  }
  func.func @transform_1(%arg0: i32) -> (i32, i32, i32) {
    %c0_i32 = arith.constant 0 : i32
    %c0_i32_0 = arith.constant 0 : i32
    %c0_i32_1 = arith.constant 0 : i32
    %c0_i32_2 = arith.constant 0 : i32
    return %c0_i32, %c0_i32_0, %c0_i32_1 : i32, i32, i32
  }
  func.func @transform_2(%arg0: i32) -> (i32, i32) {
    %c0_i32 = arith.constant 0 : i32
    %c0_i32_0 = arith.constant 0 : i32
    %c0_i32_1 = arith.constant 0 : i32
    return %c0_i32, %c0_i32_0 : i32, i32
  }
  func.func @transform_3(%arg0: i32) -> (i32, i32) {
    %c0_i32 = arith.constant 0 : i32
    %c0_i32_0 = arith.constant 0 : i32
    %c0_i32_1 = arith.constant 0 : i32
    return %c0_i32, %c0_i32_0 : i32, i32
  }
  func.func @transform_4(%arg0: i32) -> (i32, i32, i32) {
    %c0_i32 = arith.constant 0 : i32
    %c0_i32_0 = arith.constant 0 : i32
    %c0_i32_1 = arith.constant 0 : i32
    return %arg0, %c0_i32, %c0_i32_0 : i32, i32, i32
  }
}

module attributes {stable_mosaic.version = 11 : i64} {
  func.func @_conv3_residual_kernel(%arg0: i32, %arg1: memref<512x8xbf16, #tpu.memory_space<vmem>>, %arg2: memref<8x32xbf16, #tpu.memory_space<vmem>>, %arg3: memref<1x32xf32, #tpu.memory_space<vmem>>, %arg4: memref<1x32xf32, #tpu.memory_space<vmem>>, %arg5: memref<512x32xf32, #tpu.memory_space<vmem>>, %arg6: memref<512x32xf32, #tpu.memory_space<vmem>>) attributes {dimension_semantics = [#tpu.dimension_semantics<parallel>], iteration_bounds = array<i64: 1>, scalar_prefetch = 0 : i64, scratch_operands = 0 : i64, tpu.core_type = #tpu.core_type<tc>, window_params = [{transform_indices = @transform_0, window_bounds = array<i64: 512, 8>}, {pipeline_mode = #tpu.pipeline_mode<synchronous>, transform_indices = @transform_1, window_bounds = array<i64: 8, 32>}, {pipeline_mode = #tpu.pipeline_mode<synchronous>, transform_indices = @transform_2, window_bounds = array<i64: 1, 32>}, {pipeline_mode = #tpu.pipeline_mode<synchronous>, transform_indices = @transform_3, window_bounds = array<i64: 1, 32>}, {transform_indices = @transform_4, window_bounds = array<i64: 512, 32>}, {transform_indices = @transform_5, window_bounds = array<i64: 512, 32>}]} {
    %c0 = arith.constant 0 : index
    %c0_0 = arith.constant 0 : index
    %0 = vector.load %arg1[%c0, %c0_0] : memref<512x8xbf16, #tpu.memory_space<vmem>>, vector<512x8xbf16>
    %c0_1 = arith.constant 0 : index
    %c0_2 = arith.constant 0 : index
    %1 = vector.load %arg2[%c0_1, %c0_2] : memref<8x32xbf16, #tpu.memory_space<vmem>>, vector<8x32xbf16>
    %cst = arith.constant dense<0.000000e+00> : vector<512x32xf32>
    %2 = tpu.matmul %0, %1, %cst {dimension_numbers = #tpu.dot_dimension_numbers<[1], [0], [0], [1], [0, 0, 1, 1], [], []>} : vector<512x8xbf16>, vector<8x32xbf16>, vector<512x32xf32> -> vector<512x32xf32>
    %c0_3 = arith.constant 0 : index
    %c0_4 = arith.constant 0 : index
    %3 = vector.load %arg3[%c0_3, %c0_4] : memref<1x32xf32, #tpu.memory_space<vmem>>, vector<1x32xf32>
    %4 = vector.broadcast %3 : vector<1x32xf32> to vector<512x32xf32>
    %5 = arith.mulf %2, %4 : vector<512x32xf32>
    %c0_5 = arith.constant 0 : index
    %c0_6 = arith.constant 0 : index
    %6 = vector.load %arg4[%c0_5, %c0_6] : memref<1x32xf32, #tpu.memory_space<vmem>>, vector<1x32xf32>
    %7 = vector.broadcast %6 : vector<1x32xf32> to vector<512x32xf32>
    %8 = arith.addf %5, %7 : vector<512x32xf32>
    %c0_7 = arith.constant 0 : index
    %c0_8 = arith.constant 0 : index
    %9 = vector.load %arg5[%c0_7, %c0_8] : memref<512x32xf32, #tpu.memory_space<vmem>>, vector<512x32xf32>
    %10 = arith.addf %8, %9 : vector<512x32xf32>
    %cst_9 = arith.constant 0.000000e+00 : f32
    %11 = vector.broadcast %cst_9 : f32 to vector<512x32xf32>
    %12 = arith.maximumf %10, %11 : vector<512x32xf32>
    %c0_10 = arith.constant 0 : index
    %c0_11 = arith.constant 0 : index
    %13 = vector.load %arg6[%c0_10, %c0_11] : memref<512x32xf32, #tpu.memory_space<vmem>>, vector<512x32xf32>
    tpu.vector_store %arg6[%c0_10, %c0_11], %12 {strides = array<i32>} : memref<512x32xf32, #tpu.memory_space<vmem>>, vector<512x32xf32>,
    return
  }
  func.func @transform_0(%arg0: i32) -> (i32, i32) {
    %c0_i32 = arith.constant 0 : i32
    %c0_i32_0 = arith.constant 0 : i32
    return %arg0, %c0_i32 : i32, i32
  }
  func.func @transform_1(%arg0: i32) -> (i32, i32) {
    %c0_i32 = arith.constant 0 : i32
    %c0_i32_0 = arith.constant 0 : i32
    %c0_i32_1 = arith.constant 0 : i32
    return %c0_i32, %c0_i32_0 : i32, i32
  }
  func.func @transform_2(%arg0: i32) -> (i32, i32) {
    %c0_i32 = arith.constant 0 : i32
    %c0_i32_0 = arith.constant 0 : i32
    %c0_i32_1 = arith.constant 0 : i32
    return %c0_i32, %c0_i32_0 : i32, i32
  }
  func.func @transform_3(%arg0: i32) -> (i32, i32) {
    %c0_i32 = arith.constant 0 : i32
    %c0_i32_0 = arith.constant 0 : i32
    %c0_i32_1 = arith.constant 0 : i32
    return %c0_i32, %c0_i32_0 : i32, i32
  }
  func.func @transform_4(%arg0: i32) -> (i32, i32) {
    %c0_i32 = arith.constant 0 : i32
    %c0_i32_0 = arith.constant 0 : i32
    return %arg0, %c0_i32 : i32, i32
  }
  func.func @transform_5(%arg0: i32) -> (i32, i32) {
    %c0_i32 = arith.constant 0 : i32
    %c0_i32_0 = arith.constant 0 : i32
    return %arg0, %c0_i32 : i32, i32
  }
}

</mosaic_0001>

<bundles_post_ra>
// kernel: block_forward.3
= control target key start
LH: loop header
LB: loop body
LE: loop exit
PB: predicated region body
PF: predicated region fallthrough
CT: control target
= control target key end

     0   :  { %vm133_vm0 = vcmask 130048   ;;  %vm1485_vm1 = vcmask 261120   ;;  %vm981_vm2 = vcmask 60416   ;;  %s3075_s1 = inlined_call_operand.vmem [shape: bf16[16,8], index: 1, kind: input, shape index: {}]   ;;  %s3076_s4 = inlined_call_operand.vmem [shape: bf16[16,32], index: 4, kind: input, shape index: {}]   ;;  %s3077_s0 = inlined_call_operand.vmem [shape: f32[512,16], index: 0, kind: input, shape index: {}]   ;;  %s3078_s2 = inlined_call_operand.vmem [shape: f32[1,8], index: 2, kind: input, shape index: {}]   ;;  %s3079_s5 = inlined_call_operand.vmem [shape: f32[1,32], index: 5, kind: input, shape index: {}]   ;;  %s3080_s3 = inlined_call_operand.vmem [shape: f32[1,8], index: 3, kind: input, shape index: {}]   ;;  %s3081_s6 = inlined_call_operand.vmem [shape: f32[1,32], index: 6, kind: input, shape index: {}]   ;;  %s3082_s8 = inlined_call_operand.vmem [shape: f32[512,32], index: 8, kind: output, shape index: {1}]   ;;  %s3083_s7 = inlined_call_operand.vmem [shape: bf16[512,8], index: 7, kind: output, shape index: {0}]  }
   0x1   :  { %v1954_v0 = vld [vmem:[%s3075_s1] sm:$0xff]   ;;  %v30_v3 = vld [vmem:[%s3077_s0 + $0x8] sm:$0xff]  ;;  %v31_v4 = vld [vmem:[%s3077_s0 + $0x10] sm:$0xff] }
   0x2   :  { %v1955_v1 = vld [vmem:[%s3076_s4] sm:$0xff]   ;;  %1822 = vmatprep.subr.bf16.mxu0 %v1954_v0  ;;  %v32_v6 = vld [vmem:[%s3077_s0 + $0x18] sm:$0xff]  ;;  %v34_v8 = vld [vmem:[%s3077_s0 + $0x28] sm:$0xff] }
   0x3   :  { %v29_v2 = vld [vmem:[%s3077_s0] sm:$0xff]  ;;  %1823 = vmatpush3.bf16.msra.mxu0 %v1954_v0  ;;  %1888 = vmatprep.subr.bf16.mxu1 %v1955_v1  ;;  %v94_v9 = vpack.c.bf16 %v32_v6, %v31_v4  ;;  %v35_v11 = vld [vmem:[%s3077_s0 + $0x30] sm:$0xff]  ;;  %v36_v12 = vld [vmem:[%s3077_s0 + $0x38] sm:$0xff] }
   0x4   :  { %v93_v5 = vpack.c.bf16 %v30_v3, %v29_v2  ;;  %v33_v7 = vld [vmem:[%s3077_s0 + $0x20] sm:$0xff]  ;;  %1889 = vmatpush3.bf16.msra.mxu1 %v1955_v1  ;;  %v38_v14 = vld [vmem:[%s3077_s0 + $0x48] sm:$0xff]  ;;  %v96_v15 = vpack.c.bf16 %v36_v12, %v35_v11  ;;  %v39_v17 = vld [vmem:[%s3077_s0 + $0x50] sm:$0xff] }
   0x5   :  { %v95_v10 = vpack.c.bf16 %v34_v8, %v33_v7  ;;  %v37_v13 = vld [vmem:[%s3077_s0 + $0x40] sm:$0xff]  ;;  %v40_v18 = vld [vmem:[%s3077_s0 + $0x58] sm:$0xff]  ;;  %v42_v20 = vld [vmem:[%s3077_s0 + $0x68] sm:$0xff] }
   0x6   :  { %1824 = vmatprep.mubr.msk.bf16.mxu0 %vm133_vm0, %v93_v5  ;;  %1890 = vmatprep.mubr.msk.bf16.mxu1 %vm133_vm0, %v93_v5  ;;  %v97_v16 = vpack.c.bf16 %v38_v14, %v37_v13  ;;  %v41_v19 = vld [vmem:[%s3077_s0 + $0x60] sm:$0xff]  ;;  %v98_v21 = vpack.c.bf16 %v40_v18, %v39_v17  ;;  %v43_v23 = vld [vmem:[%s3077_s0 + $0x70] sm:$0xff]  ;;  %v44_v24 = vld [vmem:[%s3077_s0 + $0x78] sm:$0xff] }
   0x7   :  { %1825 = vmatmul.mubr.msk.bf16.vlgmr.msra.gmra.mrb[0].mxu0 %vm133_vm0, %v94_v9  ;;  %1891 = vmatmul.mubr.msk.bf16.vlgmr.msra.gmra.mrb[0].mxu1 %vm133_vm0, %v94_v9  ;;  %v99_v22 = vpack.c.bf16 %v42_v20, %v41_v19  ;;  %v45_v25 = vld [vmem:[%s3077_s0 + $0x80] sm:$0xff]  ;;  %v46_v26 = vld [vmem:[%s3077_s0 + $0x88] sm:$0xff]  ;;  %v100_v27 = vpack.c.bf16 %v44_v24, %v43_v23  ;;  %v47_v29 = vld [vmem:[%s3077_s0 + $0x90] sm:$0xff] }
   0x8   :  { %1828 = vmatprep.mubr.msk.bf16.mxu0 %vm133_vm0, %v95_v10  ;;  %1894 = vmatprep.mubr.msk.bf16.mxu1 %vm133_vm0, %v95_v10  ;;  %v101_v28 = vpack.c.bf16 %v46_v26, %v45_v25  ;;  %v48_v30 = vld [vmem:[%s3077_s0 + $0x98] sm:$0xff]  ;;  %v49_v31 = vld [vmem:[%s3077_s0 + $0xa0] sm:$0xff]  ;;  %v50_v32 = vld [vmem:[%s3077_s0 + $0xa8] sm:$0xff] }
   0x9   :  { %v102_v33 = vpack.c.bf16 %v48_v30, %v47_v29  ;;  %v103_v34 = vpack.c.bf16 %v50_v32, %v49_v31  ;;  %v51_v35 = vld [vmem:[%s3077_s0 + $0xb0] sm:$0xff]  ;;  %v52_v36 = vld [vmem:[%s3077_s0 + $0xb8] sm:$0xff]  ;;  %v53_v37 = vld [vmem:[%s3077_s0 + $0xc0] sm:$0xff] }
   0xa   :  { %v54_v38 = vld [vmem:[%s3077_s0 + $0xc8] sm:$0xff]  ;;  %v104_v39 = vpack.c.bf16 %v52_v36, %v51_v35  ;;  %v55_v41 = vld [vmem:[%s3077_s0 + $0xd0] sm:$0xff]  ;;  %v56_v42 = vld [vmem:[%s3077_s0 + $0xd8] sm:$0xff] }
   0xb   :  { %v105_v40 = vpack.c.bf16 %v54_v38, %v53_v37  ;;  %v57_v43 = vld [vmem:[%s3077_s0 + $0xe0] sm:$0xff]  ;;  %v58_v44 = vld [vmem:[%s3077_s0 + $0xe8] sm:$0xff]  ;;  %v106_v45 = vpack.c.bf16 %v56_v42, %v55_v41  ;;  %v59_v47 = vld [vmem:[%s3077_s0 + $0xf0] sm:$0xff] }
   0xc   :  { %v107_v46 = vpack.c.bf16 %v58_v44, %v57_v43  ;;  %v60_v48 = vld [vmem:[%s3077_s0 + $0xf8] sm:$0xff]  ;;  %v61_v49 = vld [vmem:[%s3077_s0 + $0x100] sm:$0xff]  ;;  %v62_v50 = vld [vmem:[%s3077_s0 + $0x108] sm:$0xff] }
   0xd   :  { %v108_v51 = vpack.c.bf16 %v60_v48, %v59_v47  ;;  %v109_v52 = vpack.c.bf16 %v62_v50, %v61_v49  ;;  %v63_v53 = vld [vmem:[%s3077_s0 + $0x110] sm:$0xff]  ;;  %v64_v54 = vld [vmem:[%s3077_s0 + $0x118] sm:$0xff]  ;;  %v65_v55 = vld [vmem:[%s3077_s0 + $0x120] sm:$0xff] }
   0xe   :  { %v66_v56 = vld [vmem:[%s3077_s0 + $0x128] sm:$0xff]  ;;  %v110_v57 = vpack.c.bf16 %v64_v54, %v63_v53  ;;  %v67_v59 = vld [vmem:[%s3077_s0 + $0x130] sm:$0xff]  ;;  %v68_v60 = vld [vmem:[%s3077_s0 + $0x138] sm:$0xff] }
   0xf   :  { %1829 = vmatmul.mubr.msk.bf16.gmra.mrb[4].mxu0 %vm133_vm0, %v96_v15  ;;  %1895 = vmatmul.mubr.msk.bf16.gmra.mrb[4].mxu1 %vm133_vm0, %v96_v15  ;;  %v111_v58 = vpack.c.bf16 %v66_v56, %v65_v55  ;;  %v69_v61 = vld [vmem:[%s3077_s0 + $0x140] sm:$0xff]  ;;  %v70_v62 = vld [vmem:[%s3077_s0 + $0x148] sm:$0xff]  ;;  %v112_v63 = vpack.c.bf16 %v68_v60, %v67_v59  ;;  %v71_v1 = vld [vmem:[%s3077_s0 + $0x150] sm:$0xff] }
  0x10   :  { %1832 = vmatprep.mubr.msk.bf16.mxu0 %vm133_vm0, %v97_v16  ;;  %1898 = vmatprep.mubr.msk.bf16.mxu1 %vm133_vm0, %v97_v16  ;;  %v113_v0 = vpack.c.bf16 %v70_v62, %v69_v61  ;;  %v72_v2 = vld [vmem:[%s3077_s0 + $0x158] sm:$0xff]  ;;  %v73_v3 = vld [vmem:[%s3077_s0 + $0x160] sm:$0xff]  ;;  %v74_v4 = vld [vmem:[%s3077_s0 + $0x168] sm:$0xff] }
  0x11   :  { %v114_v5 = vpack.c.bf16 %v72_v2, %v71_v1  ;;  %v115_v6 = vpack.c.bf16 %v74_v4, %v73_v3  ;;  %v75_v7 = vld [vmem:[%s3077_s0 + $0x170] sm:$0xff]  ;;  %v76_v8 = vld [vmem:[%s3077_s0 + $0x178] sm:$0xff]  ;;  %v77_v9 = vld [vmem:[%s3077_s0 + $0x180] sm:$0xff] }
  0x12   :  { %v78_v10 = vld [vmem:[%s3077_s0 + $0x188] sm:$0xff]  ;;  %v116_v11 = vpack.c.bf16 %v76_v8, %v75_v7  ;;  %v79_v13 = vld [vmem:[%s3077_s0 + $0x190] sm:$0xff]  ;;  %v80_v14 = vld [vmem:[%s3077_s0 + $0x198] sm:$0xff] }
  0x13   :  { %v117_v12 = vpack.c.bf16 %v78_v10, %v77_v9  ;;  %v81_v15 = vld [vmem:[%s3077_s0 + $0x1a0] sm:$0xff]  ;;  %v82_v16 = vld [vmem:[%s3077_s0 + $0x1a8] sm:$0xff]  ;;  %v118_v17 = vpack.c.bf16 %v80_v14, %v79_v13  ;;  %v83_v19 = vld [vmem:[%s3077_s0 + $0x1b0] sm:$0xff] }
  0x14   :  { %v119_v18 = vpack.c.bf16 %v82_v16, %v81_v15  ;;  %v84_v20 = vld [vmem:[%s3077_s0 + $0x1b8] sm:$0xff]  ;;  %v87_v25 = vld [vmem:[%s3077_s0 + $0x1d0] sm:$0xff]  ;;  %v2275_v35 = vld [vmem:[%s3079_s5] ss:$0 sm:$0xff] }
  0x15   :  { %v120_v23 = vpack.c.bf16 %v84_v20, %v83_v19  ;;  %v88_v26 = vld [vmem:[%s3077_s0 + $0x1d8] sm:$0xff]  ;;  %v91_v31 = vld [vmem:[%s3077_s0 + $0x1f0] sm:$0xff]  ;;  %v2280_v37 = vld [vmem:[%s3080_s3] ss:$0 sm:$0xff] }
  0x16   :  { %v122_v29 = vpack.c.bf16 %v88_v26, %v87_v25  ;;  %v92_v32 = vld [vmem:[%s3077_s0 + $0x1f8] sm:$0xff]  ;;  %v2286_v41 = vld [vmem:[%s3081_s6] ss:$0 sm:$0xff] }
  0x17   :  { %1833 = vmatmul.mubr.msk.bf16.gmra.mrb[8].mxu0 %vm133_vm0, %v98_v21  ;;  %1899 = vmatmul.mubr.msk.bf16.gmra.mrb[8].mxu1 %vm133_vm0, %v98_v21  ;;  %v85_v21 = vld [vmem:[%s3077_s0 + $0x1c0] sm:$0xff] }
  0x18   :  { %1836 = vmatprep.mubr.msk.bf16.mxu0 %vm133_vm0, %v99_v22  ;;  %1902 = vmatprep.mubr.msk.bf16.mxu1 %vm133_vm0, %v99_v22  ;;  %v86_v22 = vld [vmem:[%s3077_s0 + $0x1c8] sm:$0xff] }
  0x19   :  { %v121_v24 = vpack.c.bf16 %v86_v22, %v85_v21 }
  0x1f   :  { %1837 = vmatmul.mubr.msk.bf16.gmra.mrb[12].mxu0 %vm133_vm0, %v100_v27  ;;  %1903 = vmatmul.mubr.msk.bf16.gmra.mrb[12].mxu1 %vm133_vm0, %v100_v27  ;;  %v89_v27 = vld [vmem:[%s3077_s0 + $0x1e0] sm:$0xff] }
  0x20   :  { %1840 = vmatprep.mubr.msk.bf16.mxu0 %vm133_vm0, %v101_v28  ;;  %1906 = vmatprep.mubr.msk.bf16.mxu1 %vm133_vm0, %v101_v28  ;;  %v90_v28 = vld [vmem:[%s3077_s0 + $0x1e8] sm:$0xff] }
  0x21   :  { %v123_v30 = vpack.c.bf16 %v90_v28, %v89_v27 }
  0x27   :  { %1841 = vmatmul.mubr.msk.bf16.gmra.mrb[16].mxu0 %vm133_vm0, %v102_v33  ;;  %1907 = vmatmul.mubr.msk.bf16.gmra.mrb[16].mxu1 %vm133_vm0, %v102_v33  ;;  %v124_v33 = vpack.c.bf16 %v92_v32, %v91_v31 }
  0x28   :  { %1844 = vmatprep.mubr.msk.bf16.mxu0 %vm133_vm0, %v103_v34  ;;  %1910 = vmatprep.mubr.msk.bf16.mxu1 %vm133_vm0, %v103_v34  ;;  %v2270_v34 = vld [vmem:[%s3078_s2] ss:$0 sm:$0xff] }
  0x2f   :  { %1845 = vmatmul.mubr.msk.bf16.gmra.mrb[20].mxu0 %vm133_vm0, %v104_v39  ;;  %1911 = vmatmul.mubr.msk.bf16.gmra.mrb[20].mxu1 %vm133_vm0, %v104_v39 }
  0x30   :  { %1848 = vmatprep.mubr.msk.bf16.mxu0 %vm133_vm0, %v105_v40  ;;  %1914 = vmatprep.mubr.msk.bf16.mxu1 %vm133_vm0, %v105_v40 }
  0x37   :  { %1849 = vmatmul.mubr.msk.bf16.gmra.mrb[24].mxu0 %vm133_vm0, %v106_v45  ;;  %1915 = vmatmul.mubr.msk.bf16.gmra.mrb[24].mxu1 %vm133_vm0, %v106_v45 }
  0x38   :  { %1852 = vmatprep.mubr.msk.bf16.mxu0 %vm133_vm0, %v107_v46  ;;  %1918 = vmatprep.mubr.msk.bf16.mxu1 %vm133_vm0, %v107_v46 }
  0x3f   :  { %1853 = vmatmul.mubr.msk.bf16.gmra.mrb[28].mxu0 %vm133_vm0, %v108_v51  ;;  %1919 = vmatmul.mubr.msk.bf16.gmra.mrb[28].mxu1 %vm133_vm0, %v108_v51 }
  0x40   :  { %1856 = vmatprep.mubr.msk.bf16.mxu0 %vm133_vm0, %v109_v52  ;;  %1922 = vmatprep.mubr.msk.bf16.mxu1 %vm133_vm0, %v109_v52 }
  0x47   :  { %1857 = vmatmul.mubr.msk.bf16.gmra.mrb[32].mxu0 %vm133_vm0, %v110_v57  ;;  %1923 = vmatmul.mubr.msk.bf16.gmra.mrb[32].mxu1 %vm133_vm0, %v110_v57 }
  0x48   :  { %1860 = vmatprep.mubr.msk.bf16.mxu0 %vm133_vm0, %v111_v58  ;;  %1926 = vmatprep.mubr.msk.bf16.mxu1 %vm133_vm0, %v111_v58 }
  0x4f   :  { %1861 = vmatmul.mubr.msk.bf16.gmra.mrb[36].mxu0 %vm133_vm0, %v112_v63  ;;  %1927 = vmatmul.mubr.msk.bf16.gmra.mrb[36].mxu1 %vm133_vm0, %v112_v63 }
  0x50   :  { %1864 = vmatprep.mubr.msk.bf16.mxu0 %vm133_vm0, %v113_v0  ;;  %1930 = vmatprep.mubr.msk.bf16.mxu1 %vm133_vm0, %v113_v0 }
  0x57   :  { %1865 = vmatmul.mubr.msk.bf16.gmra.mrb[40].mxu0 %vm133_vm0, %v114_v5  ;;  %1931 = vmatmul.mubr.msk.bf16.gmra.mrb[40].mxu1 %vm133_vm0, %v114_v5 }
  0x58   :  { %1868 = vmatprep.mubr.msk.bf16.mxu0 %vm133_vm0, %v115_v6  ;;  %1934 = vmatprep.mubr.msk.bf16.mxu1 %vm133_vm0, %v115_v6 }
  0x5f   :  { %1869 = vmatmul.mubr.msk.bf16.gmra.mrb[44].mxu0 %vm133_vm0, %v116_v11  ;;  %1935 = vmatmul.mubr.msk.bf16.gmra.mrb[44].mxu1 %vm133_vm0, %v116_v11 }
  0x60   :  { %1872 = vmatprep.mubr.msk.bf16.mxu0 %vm133_vm0, %v117_v12  ;;  %1938 = vmatprep.mubr.msk.bf16.mxu1 %vm133_vm0, %v117_v12 }
  0x67   :  { %1873 = vmatmul.mubr.msk.bf16.gmra.mrb[48].mxu0 %vm133_vm0, %v118_v17  ;;  %1939 = vmatmul.mubr.msk.bf16.gmra.mrb[48].mxu1 %vm133_vm0, %v118_v17 }
  0x68   :  { %1876 = vmatprep.mubr.msk.bf16.mxu0 %vm133_vm0, %v119_v18  ;;  %1942 = vmatprep.mubr.msk.bf16.mxu1 %vm133_vm0, %v119_v18 }
  0x6f   :  { %1877 = vmatmul.mubr.msk.bf16.gmra.mrb[52].mxu0 %vm133_vm0, %v120_v23  ;;  %1943 = vmatmul.mubr.msk.bf16.gmra.mrb[52].mxu1 %vm133_vm0, %v120_v23 }
  0x70   :  { %1880 = vmatprep.mubr.msk.bf16.mxu0 %vm133_vm0, %v121_v24  ;;  %1946 = vmatprep.mubr.msk.bf16.mxu1 %vm133_vm0, %v121_v24 }
  0x77   :  { %1881 = vmatmul.mubr.msk.bf16.gmra.mrb[56].mxu0 %vm133_vm0, %v122_v29  ;;  %1947 = vmatmul.mubr.msk.bf16.gmra.mrb[56].mxu1 %vm133_vm0, %v122_v29 }
  0x78   :  { %1884 = vmatprep.mubr.msk.bf16.mxu0 %vm133_vm0, %v123_v30  ;;  %1950 = vmatprep.mubr.msk.bf16.mxu1 %vm133_vm0, %v123_v30 }
  0x7f   :  { %1885 = vmatmul.mubr.msk.bf16.gmra.mrb[60].mxu0 %vm133_vm0, %v124_v33  ;;  %1951 = vmatmul.mubr.msk.bf16.gmra.mrb[60].mxu1 %vm133_vm0, %v124_v33 }
  0xda   :  { %v1826_v36 = vpop.f32.mrb[0].mxu0  ;;  %v1892_v40 = vpop.f32.mrb[0].mxu1 }
  0xdb   :  { %v528_v38 = vmul.f32 %v1826_v36, %v2270_v34  ;;  %v264_v39 = vpop.f32.mrb[1].mxu0  ;;  %v1352_v43 = vmul.f32 %v1892_v40, %v2275_v35  ;;  %v1088_v45 = vpop.f32.mrb[1].mxu1 }
  0xdc   :  { %v526_v42 = vmul.f32 %v2270_v34, %v264_v39  ;;  %v1827_v44 = vpop.f32.mrb[2].mxu0  ;;  %v1350_v48 = vmul.f32 %v2275_v35, %v1088_v45  ;;  %v1893_v50 = vpop.f32.mrb[2].mxu1 }
  0xdd   :  { %v599_v46 = vadd.f32 %v2280_v37, %v528_v38  ;;  %v529_v47 = vmul.f32 %v1827_v44, %v2270_v34  ;;  %v267_v49 = vpop.f32.mrb[3].mxu0  ;;  %v1423_v52 = vadd.f32 %v2286_v41, %v1352_v43  ;;  %v1353_v54 = vmul.f32 %v1893_v50, %v2275_v35  ;;  %v1091_v55 = vpop.f32.mrb[3].mxu1 }
  0xde   :  { %v597_v51 = vadd.f32 %v2280_v37, %v526_v42  ;;  %v527_v53 = vmul.f32 %v2270_v34, %v267_v49  ;;  %v1421_v58 = vadd.f32 %v2286_v41, %v1350_v48  ;;  %v1351_v59 = vmul.f32 %v2275_v35, %v1091_v55 }
  0xdf   :  { %v663_v56 = vmax.f32 %v599_v46, 0.0  ;;  %v600_v57 = vadd.f32 %v2280_v37, %v529_v47  ;;  %1488 = vst.msk [vmem:[%s3082_s8 + $0x10] sm:$0xff] %vm1485_vm1, %v1423_v52  ;;  %v1424_v62 = vadd.f32 %v2286_v41, %v1353_v54 }
  0xe0   :  { %v661_v60 = vmax.f32 %v597_v51, 0.0  ;;  %v598_v61 = vadd.f32 %v2280_v37, %v527_v53  ;;  %1486 = vst.msk [vmem:[%s3082_s8] sm:$0xff] %vm1485_vm1, %v1421_v58  ;;  %v1422_v1 = vadd.f32 %v2286_v41, %v1351_v59 }
  0xe1   :  { %v1694_v63 = vpack.c.bf16 %v663_v56, %v663_v56  ;;  %v664_v0 = vmax.f32 %v600_v57, 0.0  ;;  %1489 = vst.msk [vmem:[%s3082_s8 + $0x18] sm:$0xff] %vm1485_vm1, %v1424_v62 }
  0xe2   :  { %v1692_v2 = vpack.c.bf16 %v661_v60, %v661_v60  ;;  %v662_v3 = vmax.f32 %v598_v61, 0.0  ;;  %v1830_v4 = vpop.f32.mrb[4].mxu0  ;;  %1487 = vst.msk [vmem:[%s3082_s8 + $0x8] sm:$0xff] %vm1485_vm1, %v1422_v1  ;;  %v1896_v8 = vpop.f32.mrb[4].mxu1 }
  0xe3   :  { %984 = vst.msk [vmem:[%s3083_s7 + $0x8] sm:$0xf] %vm981_vm2, %v1694_v63  ;;  %v1695_v5 = vpack.c.bf16 %v664_v0, %v664_v0  ;;  %v532_v6 = vmul.f32 %v1830_v4, %v2270_v34  ;;  %v280_v7 = vpop.f32.mrb[5].mxu0  ;;  %v1356_v11 = vmul.f32 %v1896_v8, %v2275_v35  ;;  %v1104_v13 = vpop.f32.mrb[5].mxu1 }
  0xe4   :  { %982 = vst.msk [vmem:[%s3083_s7] sm:$0xf] %vm981_vm2, %v1692_v2  ;;  %v1693_v9 = vpack.c.bf16 %v662_v3, %v662_v3  ;;  %v530_v10 = vmul.f32 %v2270_v34, %v280_v7  ;;  %v1831_v12 = vpop.f32.mrb[6].mxu0  ;;  %v1354_v16 = vmul.f32 %v2275_v35, %v1104_v13  ;;  %v1897_v18 = vpop.f32.mrb[6].mxu1 }
  0xe5   :  { %985 = vst.msk [vmem:[%s3083_s7 + $0xc] sm:$0xf] %vm981_vm2, %v1695_v5  ;;  %v603_v14 = vadd.f32 %v2280_v37, %v532_v6  ;;  %v533_v15 = vmul.f32 %v1831_v12, %v2270_v34  ;;  %v283_v17 = vpop.f32.mrb[7].mxu0  ;;  %v1427_v20 = vadd.f32 %v2286_v41, %v1356_v11  ;;  %v1357_v22 = vmul.f32 %v1897_v18, %v2275_v35  ;;  %v1107_v23 = vpop.f32.mrb[7].mxu1 }
  0xe6   :  { %983 = vst.msk [vmem:[%s3083_s7 + $0x4] sm:$0xf] %vm981_vm2, %v1693_v9  ;;  %v601_v19 = vadd.f32 %v2280_v37, %v530_v10  ;;  %v531_v21 = vmul.f32 %v2270_v34, %v283_v17  ;;  %v1425_v26 = vadd.f32 %v2286_v41, %v1354_v16  ;;  %v1355_v27 = vmul.f32 %v2275_v35, %v1107_v23 }
  0xe7   :  { %v667_v24 = vmax.f32 %v603_v14, 0.0  ;;  %v604_v25 = vadd.f32 %v2280_v37, %v533_v15  ;;  %1492 = vst.msk [vmem:[%s3082_s8 + $0x30] sm:$0xff] %vm1485_vm1, %v1427_v20  ;;  %v1428_v30 = vadd.f32 %v2286_v41, %v1357_v22 }
  0xe8   :  { %v665_v28 = vmax.f32 %v601_v19, 0.0  ;;  %v602_v29 = vadd.f32 %v2280_v37, %v531_v21  ;;  %1490 = vst.msk [vmem:[%s3082_s8 + $0x20] sm:$0xff] %vm1485_vm1, %v1425_v26  ;;  %v1426_v33 = vadd.f32 %v2286_v41, %v1355_v27 }
  0xe9   :  { %v1698_v31 = vpack.c.bf16 %v667_v24, %v667_v24  ;;  %v668_v32 = vmax.f32 %v604_v25, 0.0  ;;  %1493 = vst.msk [vmem:[%s3082_s8 + $0x38] sm:$0xff] %vm1485_vm1, %v1428_v30 }
  0xea   :  { %v1696_v36 = vpack.c.bf16 %v665_v28, %v665_v28  ;;  %v666_v38 = vmax.f32 %v602_v29, 0.0  ;;  %v1834_v39 = vpop.f32.mrb[8].mxu0  ;;  %1491 = vst.msk [vmem:[%s3082_s8 + $0x28] sm:$0xff] %vm1485_vm1, %v1426_v33  ;;  %v1900_v44 = vpop.f32.mrb[8].mxu1 }
  0xeb   :  { %988 = vst.msk [vmem:[%s3083_s7 + $0x18] sm:$0xf] %vm981_vm2, %v1698_v31  ;;  %v1699_v40 = vpack.c.bf16 %v668_v32, %v668_v32  ;;  %v536_v42 = vmul.f32 %v1834_v39, %v2270_v34  ;;  %v296_v43 = vpop.f32.mrb[9].mxu0  ;;  %v1360_v47 = vmul.f32 %v1900_v44, %v2275_v35  ;;  %v1120_v49 = vpop.f32.mrb[9].mxu1 }
  0xec   :  { %986 = vst.msk [vmem:[%s3083_s7 + $0x10] sm:$0xf] %vm981_vm2, %v1696_v36  ;;  %v1697_v45 = vpack.c.bf16 %v666_v38, %v666_v38  ;;  %v534_v46 = vmul.f32 %v2270_v34, %v296_v43  ;;  %v1835_v48 = vpop.f32.mrb[10].mxu0  ;;  %v1358_v52 = vmul.f32 %v2275_v35, %v1120_v49  ;;  %v1901_v54 = vpop.f32.mrb[10].mxu1 }
  0xed   :  { %989 = vst.msk [vmem:[%s3083_s7 + $0x1c] sm:$0xf] %vm981_vm2, %v1699_v40  ;;  %v607_v50 = vadd.f32 %v2280_v37, %v536_v42  ;;  %v537_v51 = vmul.f32 %v1835_v48, %v2270_v34  ;;  %v299_v53 = vpop.f32.mrb[11].mxu0  ;;  %v1431_v56 = vadd.f32 %v2286_v41, %v1360_v47  ;;  %v1361_v58 = vmul.f32 %v1901_v54, %v2275_v35  ;;  %v1123_v59 = vpop.f32.mrb[11].mxu1 }
  0xee   :  { %987 = vst.msk [vmem:[%s3083_s7 + $0x14] sm:$0xf] %vm981_vm2, %v1697_v45  ;;  %v605_v55 = vadd.f32 %v2280_v37, %v534_v46  ;;  %v535_v57 = vmul.f32 %v2270_v34, %v299_v53  ;;  %v1429_v62 = vadd.f32 %v2286_v41, %v1358_v52  ;;  %v1359_v63 = vmul.f32 %v2275_v35, %v1123_v59 }
  0xef   :  { %v671_v60 = vmax.f32 %v607_v50, 0.0  ;;  %v608_v61 = vadd.f32 %v2280_v37, %v537_v51  ;;  %1496 = vst.msk [vmem:[%s3082_s8 + $0x50] sm:$0xff] %vm1485_vm1, %v1431_v56  ;;  %v1432_v2 = vadd.f32 %v2286_v41, %v1361_v58 }
  0xf0   :  { %v669_v0 = vmax.f32 %v605_v55, 0.0  ;;  %v606_v1 = vadd.f32 %v2280_v37, %v535_v57  ;;  %1494 = vst.msk [vmem:[%s3082_s8 + $0x40] sm:$0xff] %vm1485_vm1, %v1429_v62  ;;  %v1430_v5 = vadd.f32 %v2286_v41, %v1359_v63 }
  0xf1   :  { %v1702_v3 = vpack.c.bf16 %v671_v60, %v671_v60  ;;  %v672_v4 = vmax.f32 %v608_v61, 0.0  ;;  %1497 = vst.msk [vmem:[%s3082_s8 + $0x58] sm:$0xff] %vm1485_vm1, %v1432_v2 }
  0xf2   :  { %v1700_v6 = vpack.c.bf16 %v669_v0, %v669_v0  ;;  %v670_v7 = vmax.f32 %v606_v1, 0.0  ;;  %v1838_v8 = vpop.f32.mrb[12].mxu0  ;;  %1495 = vst.msk [vmem:[%s3082_s8 + $0x48] sm:$0xff] %vm1485_vm1, %v1430_v5  ;;  %v1904_v12 = vpop.f32.mrb[12].mxu1 }
  0xf3   :  { %992 = vst.msk [vmem:[%s3083_s7 + $0x28] sm:$0xf] %vm981_vm2, %v1702_v3  ;;  %v1703_v9 = vpack.c.bf16 %v672_v4, %v672_v4  ;;  %v540_v10 = vmul.f32 %v1838_v8, %v2270_v34  ;;  %v312_v11 = vpop.f32.mrb[13].mxu0  ;;  %v1364_v15 = vmul.f32 %v1904_v12, %v2275_v35  ;;  %v1136_v17 = vpop.f32.mrb[13].mxu1 }
  0xf4   :  { %990 = vst.msk [vmem:[%s3083_s7 + $0x20] sm:$0xf] %vm981_vm2, %v1700_v6  ;;  %v1701_v13 = vpack.c.bf16 %v670_v7, %v670_v7  ;;  %v538_v14 = vmul.f32 %v2270_v34, %v312_v11  ;;  %v1839_v16 = vpop.f32.mrb[14].mxu0  ;;  %v1362_v20 = vmul.f32 %v2275_v35, %v1136_v17  ;;  %v1905_v22 = vpop.f32.mrb[14].mxu1 }
  0xf5   :  { %993 = vst.msk [vmem:[%s3083_s7 + $0x2c] sm:$0xf] %vm981_vm2, %v1703_v9  ;;  %v611_v18 = vadd.f32 %v2280_v37, %v540_v10  ;;  %v541_v19 = vmul.f32 %v1839_v16, %v2270_v34  ;;  %v315_v21 = vpop.f32.mrb[15].mxu0  ;;  %v1435_v24 = vadd.f32 %v2286_v41, %v1364_v15  ;;  %v1365_v26 = vmul.f32 %v1905_v22, %v2275_v35  ;;  %v1139_v27 = vpop.f32.mrb[15].mxu1 }
  0xf6   :  { %991 = vst.msk [vmem:[%s3083_s7 + $0x24] sm:$0xf] %vm981_vm2, %v1701_v13  ;;  %v609_v23 = vadd.f32 %v2280_v37, %v538_v14  ;;  %v539_v25 = vmul.f32 %v2270_v34, %v315_v21  ;;  %v1433_v30 = vadd.f32 %v2286_v41, %v1362_v20  ;;  %v1363_v31 = vmul.f32 %v2275_v35, %v1139_v27 }
  0xf7   :  { %v675_v28 = vmax.f32 %v611_v18, 0.0  ;;  %v612_v29 = vadd.f32 %v2280_v37, %v541_v19  ;;  %1500 = vst.msk [vmem:[%s3082_s8 + $0x70] sm:$0xff] %vm1485_vm1, %v1435_v24  ;;  %v1436_v36 = vadd.f32 %v2286_v41, %v1365_v26 }
  0xf8   :  { %v673_v32 = vmax.f32 %v609_v23, 0.0  ;;  %v610_v33 = vadd.f32 %v2280_v37, %v539_v25  ;;  %1498 = vst.msk [vmem:[%s3082_s8 + $0x60] sm:$0xff] %vm1485_vm1, %v1433_v30  ;;  %v1434_v40 = vadd.f32 %v2286_v41, %v1363_v31 }
  0xf9   :  { %v1706_v38 = vpack.c.bf16 %v675_v28, %v675_v28  ;;  %v676_v39 = vmax.f32 %v612_v29, 0.0  ;;  %1501 = vst.msk [vmem:[%s3082_s8 + $0x78] sm:$0xff] %vm1485_vm1, %v1436_v36 }
  0xfa   :  { %v1704_v42 = vpack.c.bf16 %v673_v32, %v673_v32  ;;  %v674_v43 = vmax.f32 %v610_v33, 0.0  ;;  %v1842_v44 = vpop.f32.mrb[16].mxu0  ;;  %1499 = vst.msk [vmem:[%s3082_s8 + $0x68] sm:$0xff] %vm1485_vm1, %v1434_v40  ;;  %v1908_v48 = vpop.f32.mrb[16].mxu1 }
  0xfb   :  { %996 = vst.msk [vmem:[%s3083_s7 + $0x38] sm:$0xf] %vm981_vm2, %v1706_v38  ;;  %v1707_v45 = vpack.c.bf16 %v676_v39, %v676_v39  ;;  %v544_v46 = vmul.f32 %v1842_v44, %v2270_v34  ;;  %v328_v47 = vpop.f32.mrb[17].mxu0  ;;  %v1368_v51 = vmul.f32 %v1908_v48, %v2275_v35  ;;  %v1152_v53 = vpop.f32.mrb[17].mxu1 }
  0xfc   :  { %994 = vst.msk [vmem:[%s3083_s7 + $0x30] sm:$0xf] %vm981_vm2, %v1704_v42  ;;  %v1705_v49 = vpack.c.bf16 %v674_v43, %v674_v43  ;;  %v542_v50 = vmul.f32 %v2270_v34, %v328_v47  ;;  %v1843_v52 = vpop.f32.mrb[18].mxu0  ;;  %v1366_v56 = vmul.f32 %v2275_v35, %v1152_v53  ;;  %v1909_v58 = vpop.f32.mrb[18].mxu1 }
  0xfd   :  { %997 = vst.msk [vmem:[%s3083_s7 + $0x3c] sm:$0xf] %vm981_vm2, %v1707_v45  ;;  %v615_v54 = vadd.f32 %v2280_v37, %v544_v46  ;;  %v545_v55 = vmul.f32 %v1843_v52, %v2270_v34  ;;  %v331_v57 = vpop.f32.mrb[19].mxu0  ;;  %v1439_v60 = vadd.f32 %v2286_v41, %v1368_v51  ;;  %v1369_v62 = vmul.f32 %v1909_v58, %v2275_v35  ;;  %v1155_v63 = vpop.f32.mrb[19].mxu1 }
  0xfe   :  { %995 = vst.msk [vmem:[%s3083_s7 + $0x34] sm:$0xf] %vm981_vm2, %v1705_v49  ;;  %v613_v59 = vadd.f32 %v2280_v37, %v542_v50  ;;  %v543_v61 = vmul.f32 %v2270_v34, %v331_v57  ;;  %v1437_v2 = vadd.f32 %v2286_v41, %v1366_v56  ;;  %v1367_v3 = vmul.f32 %v2275_v35, %v1155_v63 }
  0xff   :  { %v679_v0 = vmax.f32 %v615_v54, 0.0  ;;  %v616_v1 = vadd.f32 %v2280_v37, %v545_v55  ;;  %1504 = vst.msk [vmem:[%s3082_s8 + $0x90] sm:$0xff] %vm1485_vm1, %v1439_v60  ;;  %v1440_v6 = vadd.f32 %v2286_v41, %v1369_v62 }
 0x100   :  { %v677_v4 = vmax.f32 %v613_v59, 0.0  ;;  %v614_v5 = vadd.f32 %v2280_v37, %v543_v61  ;;  %1502 = vst.msk [vmem:[%s3082_s8 + $0x80] sm:$0xff] %vm1485_vm1, %v1437_v2  ;;  %v1438_v9 = vadd.f32 %v2286_v41, %v1367_v3 }
 0x101   :  { %v1710_v7 = vpack.c.bf16 %v679_v0, %v679_v0  ;;  %v680_v8 = vmax.f32 %v616_v1, 0.0  ;;  %1505 = vst.msk [vmem:[%s3082_s8 + $0x98] sm:$0xff] %vm1485_vm1, %v1440_v6 }
 0x102   :  { %v1708_v10 = vpack.c.bf16 %v677_v4, %v677_v4  ;;  %v678_v11 = vmax.f32 %v614_v5, 0.0  ;;  %v1846_v12 = vpop.f32.mrb[20].mxu0  ;;  %1503 = vst.msk [vmem:[%s3082_s8 + $0x88] sm:$0xff] %vm1485_vm1, %v1438_v9  ;;  %v1912_v16 = vpop.f32.mrb[20].mxu1 }
 0x103   :  { %1000 = vst.msk [vmem:[%s3083_s7 + $0x48] sm:$0xf] %vm981_vm2, %v1710_v7  ;;  %v1711_v13 = vpack.c.bf16 %v680_v8, %v680_v8  ;;  %v548_v14 = vmul.f32 %v1846_v12, %v2270_v34  ;;  %v344_v15 = vpop.f32.mrb[21].mxu0  ;;  %v1372_v19 = vmul.f32 %v1912_v16, %v2275_v35  ;;  %v1168_v21 = vpop.f32.mrb[21].mxu1 }
 0x104   :  { %998 = vst.msk [vmem:[%s3083_s7 + $0x40] sm:$0xf] %vm981_vm2, %v1708_v10  ;;  %v1709_v17 = vpack.c.bf16 %v678_v11, %v678_v11  ;;  %v546_v18 = vmul.f32 %v2270_v34, %v344_v15  ;;  %v1847_v20 = vpop.f32.mrb[22].mxu0  ;;  %v1370_v24 = vmul.f32 %v2275_v35, %v1168_v21  ;;  %v1913_v26 = vpop.f32.mrb[22].mxu1 }
 0x105   :  { %1001 = vst.msk [vmem:[%s3083_s7 + $0x4c] sm:$0xf] %vm981_vm2, %v1711_v13  ;;  %v619_v22 = vadd.f32 %v2280_v37, %v548_v14  ;;  %v549_v23 = vmul.f32 %v1847_v20, %v2270_v34  ;;  %v347_v25 = vpop.f32.mrb[23].mxu0  ;;  %v1443_v28 = vadd.f32 %v2286_v41, %v1372_v19  ;;  %v1373_v30 = vmul.f32 %v1913_v26, %v2275_v35  ;;  %v1171_v31 = vpop.f32.mrb[23].mxu1 }
 0x106   :  { %999 = vst.msk [vmem:[%s3083_s7 + $0x44] sm:$0xf] %vm981_vm2, %v1709_v17  ;;  %v617_v27 = vadd.f32 %v2280_v37, %v546_v18  ;;  %v547_v29 = vmul.f32 %v2270_v34, %v347_v25  ;;  %v1441_v36 = vadd.f32 %v2286_v41, %v1370_v24  ;;  %v1371_v38 = vmul.f32 %v2275_v35, %v1171_v31 }
 0x107   :  { %v683_v32 = vmax.f32 %v619_v22, 0.0  ;;  %v620_v33 = vadd.f32 %v2280_v37, %v549_v23  ;;  %1508 = vst.msk [vmem:[%s3082_s8 + $0xb0] sm:$0xff] %vm1485_vm1, %v1443_v28  ;;  %v1444_v42 = vadd.f32 %v2286_v41, %v1373_v30 }
 0x108   :  { %v681_v39 = vmax.f32 %v617_v27, 0.0  ;;  %v618_v40 = vadd.f32 %v2280_v37, %v547_v29  ;;  %1506 = vst.msk [vmem:[%s3082_s8 + $0xa0] sm:$0xff] %vm1485_vm1, %v1441_v36  ;;  %v1442_v45 = vadd.f32 %v2286_v41, %v1371_v38 }
 0x109   :  { %v1714_v43 = vpack.c.bf16 %v683_v32, %v683_v32  ;;  %v684_v44 = vmax.f32 %v620_v33, 0.0  ;;  %1509 = vst.msk [vmem:[%s3082_s8 + $0xb8] sm:$0xff] %vm1485_vm1, %v1444_v42 }
 0x10a   :  { %v1712_v46 = vpack.c.bf16 %v681_v39, %v681_v39  ;;  %v682_v47 = vmax.f32 %v618_v40, 0.0  ;;  %v1850_v48 = vpop.f32.mrb[24].mxu0  ;;  %1507 = vst.msk [vmem:[%s3082_s8 + $0xa8] sm:$0xff] %vm1485_vm1, %v1442_v45  ;;  %v1916_v52 = vpop.f32.mrb[24].mxu1 }
 0x10b   :  { %1004 = vst.msk [vmem:[%s3083_s7 + $0x58] sm:$0xf] %vm981_vm2, %v1714_v43  ;;  %v1715_v49 = vpack.c.bf16 %v684_v44, %v684_v44  ;;  %v552_v50 = vmul.f32 %v1850_v48, %v2270_v34  ;;  %v360_v51 = vpop.f32.mrb[25].mxu0  ;;  %v1376_v55 = vmul.f32 %v1916_v52, %v2275_v35  ;;  %v1184_v57 = vpop.f32.mrb[25].mxu1 }
 0x10c   :  { %1002 = vst.msk [vmem:[%s3083_s7 + $0x50] sm:$0xf] %vm981_vm2, %v1712_v46  ;;  %v1713_v53 = vpack.c.bf16 %v682_v47, %v682_v47  ;;  %v550_v54 = vmul.f32 %v2270_v34, %v360_v51  ;;  %v1851_v56 = vpop.f32.mrb[26].mxu0  ;;  %v1374_v60 = vmul.f32 %v2275_v35, %v1184_v57  ;;  %v1917_v62 = vpop.f32.mrb[26].mxu1 }
 0x10d   :  { %1005 = vst.msk [vmem:[%s3083_s7 + $0x5c] sm:$0xf] %vm981_vm2, %v1715_v49  ;;  %v623_v58 = vadd.f32 %v2280_v37, %v552_v50  ;;  %v553_v59 = vmul.f32 %v1851_v56, %v2270_v34  ;;  %v363_v61 = vpop.f32.mrb[27].mxu0  ;;  %v1447_v0 = vadd.f32 %v2286_v41, %v1376_v55  ;;  %v1377_v2 = vmul.f32 %v1917_v62, %v2275_v35  ;;  %v1187_v3 = vpop.f32.mrb[27].mxu1 }
 0x10e   :  { %1003 = vst.msk [vmem:[%s3083_s7 + $0x54] sm:$0xf] %vm981_vm2, %v1713_v53  ;;  %v621_v63 = vadd.f32 %v2280_v37, %v550_v54  ;;  %v551_v1 = vmul.f32 %v2270_v34, %v363_v61  ;;  %v1445_v6 = vadd.f32 %v2286_v41, %v1374_v60  ;;  %v1375_v7 = vmul.f32 %v2275_v35, %v1187_v3 }
 0x10f   :  { %v687_v4 = vmax.f32 %v623_v58, 0.0  ;;  %v624_v5 = vadd.f32 %v2280_v37, %v553_v59  ;;  %1512 = vst.msk [vmem:[%s3082_s8 + $0xd0] sm:$0xff] %vm1485_vm1, %v1447_v0  ;;  %v1448_v10 = vadd.f32 %v2286_v41, %v1377_v2 }
 0x110   :  { %v685_v8 = vmax.f32 %v621_v63, 0.0  ;;  %v622_v9 = vadd.f32 %v2280_v37, %v551_v1  ;;  %1510 = vst.msk [vmem:[%s3082_s8 + $0xc0] sm:$0xff] %vm1485_vm1, %v1445_v6  ;;  %v1446_v13 = vadd.f32 %v2286_v41, %v1375_v7 }
 0x111   :  { %v1718_v11 = vpack.c.bf16 %v687_v4, %v687_v4  ;;  %v688_v12 = vmax.f32 %v624_v5, 0.0  ;;  %1513 = vst.msk [vmem:[%s3082_s8 + $0xd8] sm:$0xff] %vm1485_vm1, %v1448_v10 }
 0x112   :  { %v1716_v14 = vpack.c.bf16 %v685_v8, %v685_v8  ;;  %v686_v15 = vmax.f32 %v622_v9, 0.0  ;;  %v1854_v16 = vpop.f32.mrb[28].mxu0  ;;  %1511 = vst.msk [vmem:[%s3082_s8 + $0xc8] sm:$0xff] %vm1485_vm1, %v1446_v13  ;;  %v1920_v20 = vpop.f32.mrb[28].mxu1 }
 0x113   :  { %1008 = vst.msk [vmem:[%s3083_s7 + $0x68] sm:$0xf] %vm981_vm2, %v1718_v11  ;;  %v1719_v17 = vpack.c.bf16 %v688_v12, %v688_v12  ;;  %v556_v18 = vmul.f32 %v1854_v16, %v2270_v34  ;;  %v376_v19 = vpop.f32.mrb[29].mxu0  ;;  %v1380_v23 = vmul.f32 %v1920_v20, %v2275_v35  ;;  %v1200_v25 = vpop.f32.mrb[29].mxu1 }
 0x114   :  { %1006 = vst.msk [vmem:[%s3083_s7 + $0x60] sm:$0xf] %vm981_vm2, %v1716_v14  ;;  %v1717_v21 = vpack.c.bf16 %v686_v15, %v686_v15  ;;  %v554_v22 = vmul.f32 %v2270_v34, %v376_v19  ;;  %v1855_v24 = vpop.f32.mrb[30].mxu0  ;;  %v1378_v28 = vmul.f32 %v2275_v35, %v1200_v25  ;;  %v1921_v30 = vpop.f32.mrb[30].mxu1 }
 0x115   :  { %1009 = vst.msk [vmem:[%s3083_s7 + $0x6c] sm:$0xf] %vm981_vm2, %v1719_v17  ;;  %v627_v26 = vadd.f32 %v2280_v37, %v556_v18  ;;  %v557_v27 = vmul.f32 %v1855_v24, %v2270_v34  ;;  %v379_v29 = vpop.f32.mrb[31].mxu0  ;;  %v1451_v32 = vadd.f32 %v2286_v41, %v1380_v23  ;;  %v1381_v36 = vmul.f32 %v1921_v30, %v2275_v35  ;;  %v1203_v38 = vpop.f32.mrb[31].mxu1 }
 0x116   :  { %1007 = vst.msk [vmem:[%s3083_s7 + $0x64] sm:$0xf] %vm981_vm2, %v1717_v21  ;;  %v625_v31 = vadd.f32 %v2280_v37, %v554_v22  ;;  %v555_v33 = vmul.f32 %v2270_v34, %v379_v29  ;;  %v1449_v42 = vadd.f32 %v2286_v41, %v1378_v28  ;;  %v1379_v43 = vmul.f32 %v2275_v35, %v1203_v38 }
 0x117   :  { %v691_v39 = vmax.f32 %v627_v26, 0.0  ;;  %v628_v40 = vadd.f32 %v2280_v37, %v557_v27  ;;  %1516 = vst.msk [vmem:[%s3082_s8 + $0xf0] sm:$0xff] %vm1485_vm1, %v1451_v32  ;;  %v1452_v46 = vadd.f32 %v2286_v41, %v1381_v36 }
 0x118   :  { %v689_v44 = vmax.f32 %v625_v31, 0.0  ;;  %v626_v45 = vadd.f32 %v2280_v37, %v555_v33  ;;  %1514 = vst.msk [vmem:[%s3082_s8 + $0xe0] sm:$0xff] %vm1485_vm1, %v1449_v42  ;;  %v1450_v49 = vadd.f32 %v2286_v41, %v1379_v43 }
 0x119   :  { %v1722_v47 = vpack.c.bf16 %v691_v39, %v691_v39  ;;  %v692_v48 = vmax.f32 %v628_v40, 0.0  ;;  %1517 = vst.msk [vmem:[%s3082_s8 + $0xf8] sm:$0xff] %vm1485_vm1, %v1452_v46 }
 0x11a   :  { %v1720_v50 = vpack.c.bf16 %v689_v44, %v689_v44  ;;  %v690_v51 = vmax.f32 %v626_v45, 0.0  ;;  %v1858_v52 = vpop.f32.mrb[32].mxu0  ;;  %1515 = vst.msk [vmem:[%s3082_s8 + $0xe8] sm:$0xff] %vm1485_vm1, %v1450_v49  ;;  %v1924_v56 = vpop.f32.mrb[32].mxu1 }
 0x11b   :  { %1012 = vst.msk [vmem:[%s3083_s7 + $0x78] sm:$0xf] %vm981_vm2, %v1722_v47  ;;  %v1723_v53 = vpack.c.bf16 %v692_v48, %v692_v48  ;;  %v560_v54 = vmul.f32 %v1858_v52, %v2270_v34  ;;  %v392_v55 = vpop.f32.mrb[33].mxu0  ;;  %v1384_v59 = vmul.f32 %v1924_v56, %v2275_v35  ;;  %v1216_v61 = vpop.f32.mrb[33].mxu1 }
 0x11c   :  { %1010 = vst.msk [vmem:[%s3083_s7 + $0x70] sm:$0xf] %vm981_vm2, %v1720_v50  ;;  %v1721_v57 = vpack.c.bf16 %v690_v51, %v690_v51  ;;  %v558_v58 = vmul.f32 %v2270_v34, %v392_v55  ;;  %v1859_v60 = vpop.f32.mrb[34].mxu0  ;;  %v1382_v0 = vmul.f32 %v2275_v35, %v1216_v61  ;;  %v1925_v2 = vpop.f32.mrb[34].mxu1 }
 0x11d   :  { %1013 = vst.msk [vmem:[%s3083_s7 + $0x7c] sm:$0xf] %vm981_vm2, %v1723_v53  ;;  %v631_v62 = vadd.f32 %v2280_v37, %v560_v54  ;;  %v561_v63 = vmul.f32 %v1859_v60, %v2270_v34  ;;  %v395_v1 = vpop.f32.mrb[35].mxu0  ;;  %v1455_v4 = vadd.f32 %v2286_v41, %v1384_v59  ;;  %v1385_v6 = vmul.f32 %v1925_v2, %v2275_v35  ;;  %v1219_v7 = vpop.f32.mrb[35].mxu1 }
 0x11e   :  { %1011 = vst.msk [vmem:[%s3083_s7 + $0x74] sm:$0xf] %vm981_vm2, %v1721_v57  ;;  %v629_v3 = vadd.f32 %v2280_v37, %v558_v58  ;;  %v559_v5 = vmul.f32 %v2270_v34, %v395_v1  ;;  %v1453_v10 = vadd.f32 %v2286_v41, %v1382_v0  ;;  %v1383_v11 = vmul.f32 %v2275_v35, %v1219_v7 }
 0x11f   :  { %v695_v8 = vmax.f32 %v631_v62, 0.0  ;;  %v632_v9 = vadd.f32 %v2280_v37, %v561_v63  ;;  %1520 = vst.msk [vmem:[%s3082_s8 + $0x110] sm:$0xff] %vm1485_vm1, %v1455_v4  ;;  %v1456_v14 = vadd.f32 %v2286_v41, %v1385_v6 }
 0x120   :  { %v693_v12 = vmax.f32 %v629_v3, 0.0  ;;  %v630_v13 = vadd.f32 %v2280_v37, %v559_v5  ;;  %1518 = vst.msk [vmem:[%s3082_s8 + $0x100] sm:$0xff] %vm1485_vm1, %v1453_v10  ;;  %v1454_v17 = vadd.f32 %v2286_v41, %v1383_v11 }
 0x121   :  { %v1726_v15 = vpack.c.bf16 %v695_v8, %v695_v8  ;;  %v696_v16 = vmax.f32 %v632_v9, 0.0  ;;  %1521 = vst.msk [vmem:[%s3082_s8 + $0x118] sm:$0xff] %vm1485_vm1, %v1456_v14 }
 0x122   :  { %v1724_v18 = vpack.c.bf16 %v693_v12, %v693_v12  ;;  %v694_v19 = vmax.f32 %v630_v13, 0.0  ;;  %v1862_v20 = vpop.f32.mrb[36].mxu0  ;;  %1519 = vst.msk [vmem:[%s3082_s8 + $0x108] sm:$0xff] %vm1485_vm1, %v1454_v17  ;;  %v1928_v24 = vpop.f32.mrb[36].mxu1 }
 0x123   :  { %1016 = vst.msk [vmem:[%s3083_s7 + $0x88] sm:$0xf] %vm981_vm2, %v1726_v15  ;;  %v1727_v21 = vpack.c.bf16 %v696_v16, %v696_v16  ;;  %v564_v22 = vmul.f32 %v1862_v20, %v2270_v34  ;;  %v408_v23 = vpop.f32.mrb[37].mxu0  ;;  %v1388_v27 = vmul.f32 %v1928_v24, %v2275_v35  ;;  %v1232_v29 = vpop.f32.mrb[37].mxu1 }
 0x124   :  { %1014 = vst.msk [vmem:[%s3083_s7 + $0x80] sm:$0xf] %vm981_vm2, %v1724_v18  ;;  %v1725_v25 = vpack.c.bf16 %v694_v19, %v694_v19  ;;  %v562_v26 = vmul.f32 %v2270_v34, %v408_v23  ;;  %v1863_v28 = vpop.f32.mrb[38].mxu0  ;;  %v1386_v32 = vmul.f32 %v2275_v35, %v1232_v29  ;;  %v1929_v36 = vpop.f32.mrb[38].mxu1 }
 0x125   :  { %1017 = vst.msk [vmem:[%s3083_s7 + $0x8c] sm:$0xf] %vm981_vm2, %v1727_v21  ;;  %v635_v30 = vadd.f32 %v2280_v37, %v564_v22  ;;  %v565_v31 = vmul.f32 %v1863_v28, %v2270_v34  ;;  %v411_v33 = vpop.f32.mrb[39].mxu0  ;;  %v1459_v39 = vadd.f32 %v2286_v41, %v1388_v27  ;;  %v1389_v42 = vmul.f32 %v1929_v36, %v2275_v35  ;;  %v1235_v43 = vpop.f32.mrb[39].mxu1 }
 0x126   :  { %1015 = vst.msk [vmem:[%s3083_s7 + $0x84] sm:$0xf] %vm981_vm2, %v1725_v25  ;;  %v633_v38 = vadd.f32 %v2280_v37, %v562_v26  ;;  %v563_v40 = vmul.f32 %v2270_v34, %v411_v33  ;;  %v1457_v46 = vadd.f32 %v2286_v41, %v1386_v32  ;;  %v1387_v47 = vmul.f32 %v2275_v35, %v1235_v43 }
 0x127   :  { %v699_v44 = vmax.f32 %v635_v30, 0.0  ;;  %v636_v45 = vadd.f32 %v2280_v37, %v565_v31  ;;  %1524 = vst.msk [vmem:[%s3082_s8 + $0x130] sm:$0xff] %vm1485_vm1, %v1459_v39  ;;  %v1460_v50 = vadd.f32 %v2286_v41, %v1389_v42 }
 0x128   :  { %v697_v48 = vmax.f32 %v633_v38, 0.0  ;;  %v634_v49 = vadd.f32 %v2280_v37, %v563_v40  ;;  %1522 = vst.msk [vmem:[%s3082_s8 + $0x120] sm:$0xff] %vm1485_vm1, %v1457_v46  ;;  %v1458_v53 = vadd.f32 %v2286_v41, %v1387_v47 }
 0x129   :  { %v1730_v51 = vpack.c.bf16 %v699_v44, %v699_v44  ;;  %v700_v52 = vmax.f32 %v636_v45, 0.0  ;;  %1525 = vst.msk [vmem:[%s3082_s8 + $0x138] sm:$0xff] %vm1485_vm1, %v1460_v50 }
 0x12a   :  { %v1728_v54 = vpack.c.bf16 %v697_v48, %v697_v48  ;;  %v698_v55 = vmax.f32 %v634_v49, 0.0  ;;  %v1866_v56 = vpop.f32.mrb[40].mxu0  ;;  %1523 = vst.msk [vmem:[%s3082_s8 + $0x128] sm:$0xff] %vm1485_vm1, %v1458_v53  ;;  %v1932_v60 = vpop.f32.mrb[40].mxu1 }
 0x12b   :  { %1020 = vst.msk [vmem:[%s3083_s7 + $0x98] sm:$0xf] %vm981_vm2, %v1730_v51  ;;  %v1731_v57 = vpack.c.bf16 %v700_v52, %v700_v52  ;;  %v568_v58 = vmul.f32 %v1866_v56, %v2270_v34  ;;  %v424_v59 = vpop.f32.mrb[41].mxu0  ;;  %v1392_v63 = vmul.f32 %v1932_v60, %v2275_v35  ;;  %v1248_v1 = vpop.f32.mrb[41].mxu1 }
 0x12c   :  { %1018 = vst.msk [vmem:[%s3083_s7 + $0x90] sm:$0xf] %vm981_vm2, %v1728_v54  ;;  %v1729_v61 = vpack.c.bf16 %v698_v55, %v698_v55  ;;  %v566_v62 = vmul.f32 %v2270_v34, %v424_v59  ;;  %v1867_v0 = vpop.f32.mrb[42].mxu0  ;;  %v1390_v4 = vmul.f32 %v2275_v35, %v1248_v1  ;;  %v1933_v6 = vpop.f32.mrb[42].mxu1 }
 0x12d   :  { %1021 = vst.msk [vmem:[%s3083_s7 + $0x9c] sm:$0xf] %vm981_vm2, %v1731_v57  ;;  %v639_v2 = vadd.f32 %v2280_v37, %v568_v58  ;;  %v569_v3 = vmul.f32 %v1867_v0, %v2270_v34  ;;  %v427_v5 = vpop.f32.mrb[43].mxu0  ;;  %v1463_v8 = vadd.f32 %v2286_v41, %v1392_v63  ;;  %v1393_v10 = vmul.f32 %v1933_v6, %v2275_v35  ;;  %v1251_v11 = vpop.f32.mrb[43].mxu1 }
 0x12e   :  { %1019 = vst.msk [vmem:[%s3083_s7 + $0x94] sm:$0xf] %vm981_vm2, %v1729_v61  ;;  %v637_v7 = vadd.f32 %v2280_v37, %v566_v62  ;;  %v567_v9 = vmul.f32 %v2270_v34, %v427_v5  ;;  %v1461_v14 = vadd.f32 %v2286_v41, %v1390_v4  ;;  %v1391_v15 = vmul.f32 %v2275_v35, %v1251_v11 }
 0x12f   :  { %v703_v12 = vmax.f32 %v639_v2, 0.0  ;;  %v640_v13 = vadd.f32 %v2280_v37, %v569_v3  ;;  %1528 = vst.msk [vmem:[%s3082_s8 + $0x150] sm:$0xff] %vm1485_vm1, %v1463_v8  ;;  %v1464_v18 = vadd.f32 %v2286_v41, %v1393_v10 }
 0x130   :  { %v701_v16 = vmax.f32 %v637_v7, 0.0  ;;  %v638_v17 = vadd.f32 %v2280_v37, %v567_v9  ;;  %1526 = vst.msk [vmem:[%s3082_s8 + $0x140] sm:$0xff] %vm1485_vm1, %v1461_v14  ;;  %v1462_v21 = vadd.f32 %v2286_v41, %v1391_v15 }
 0x131   :  { %v1734_v19 = vpack.c.bf16 %v703_v12, %v703_v12  ;;  %v704_v20 = vmax.f32 %v640_v13, 0.0  ;;  %1529 = vst.msk [vmem:[%s3082_s8 + $0x158] sm:$0xff] %vm1485_vm1, %v1464_v18 }
 0x132   :  { %v1732_v22 = vpack.c.bf16 %v701_v16, %v701_v16  ;;  %v702_v23 = vmax.f32 %v638_v17, 0.0  ;;  %v1870_v24 = vpop.f32.mrb[44].mxu0  ;;  %1527 = vst.msk [vmem:[%s3082_s8 + $0x148] sm:$0xff] %vm1485_vm1, %v1462_v21  ;;  %v1936_v28 = vpop.f32.mrb[44].mxu1 }
 0x133   :  { %1024 = vst.msk [vmem:[%s3083_s7 + $0xa8] sm:$0xf] %vm981_vm2, %v1734_v19  ;;  %v1735_v25 = vpack.c.bf16 %v704_v20, %v704_v20  ;;  %v572_v26 = vmul.f32 %v1870_v24, %v2270_v34  ;;  %v440_v27 = vpop.f32.mrb[45].mxu0  ;;  %v1396_v31 = vmul.f32 %v1936_v28, %v2275_v35  ;;  %v1264_v33 = vpop.f32.mrb[45].mxu1 }
 0x134   :  { %1022 = vst.msk [vmem:[%s3083_s7 + $0xa0] sm:$0xf] %vm981_vm2, %v1732_v22  ;;  %v1733_v29 = vpack.c.bf16 %v702_v23, %v702_v23  ;;  %v570_v30 = vmul.f32 %v2270_v34, %v440_v27  ;;  %v1871_v32 = vpop.f32.mrb[46].mxu0  ;;  %v1394_v39 = vmul.f32 %v2275_v35, %v1264_v33  ;;  %v1937_v42 = vpop.f32.mrb[46].mxu1 }
 0x135   :  { %1025 = vst.msk [vmem:[%s3083_s7 + $0xac] sm:$0xf] %vm981_vm2, %v1735_v25  ;;  %v643_v36 = vadd.f32 %v2280_v37, %v572_v26  ;;  %v573_v38 = vmul.f32 %v1871_v32, %v2270_v34  ;;  %v443_v40 = vpop.f32.mrb[47].mxu0  ;;  %v1467_v44 = vadd.f32 %v2286_v41, %v1396_v31  ;;  %v1397_v46 = vmul.f32 %v1937_v42, %v2275_v35  ;;  %v1267_v47 = vpop.f32.mrb[47].mxu1  ;;  %v2913_v32 = vld [vmem:[%s3079_s5] ss:$0 sm:$0xff] }
 0x136   :  { %1023 = vst.msk [vmem:[%s3083_s7 + $0xa4] sm:$0xf] %vm981_vm2, %v1733_v29  ;;  %v641_v43 = vadd.f32 %v2280_v37, %v570_v30  ;;  %v571_v45 = vmul.f32 %v2270_v34, %v443_v40  ;;  %v1465_v50 = vadd.f32 %v2286_v41, %v1394_v39  ;;  %v1395_v51 = vmul.f32 %v2275_v35, %v1267_v47  ;;  %v2923_v39 = vld [vmem:[%s3080_s3] ss:$0 sm:$0xff] }
 0x137   :  { %v707_v48 = vmax.f32 %v643_v36, 0.0  ;;  %v644_v49 = vadd.f32 %v2280_v37, %v573_v38  ;;  %1532 = vst.msk [vmem:[%s3082_s8 + $0x170] sm:$0xff] %vm1485_vm1, %v1467_v44  ;;  %v1468_v54 = vadd.f32 %v2286_v41, %v1397_v46  ;;  %v2936_v47 = vld [vmem:[%s3081_s6] ss:$0 sm:$0xff] }
 0x138   :  { %v705_v52 = vmax.f32 %v641_v43, 0.0  ;;  %v642_v53 = vadd.f32 %v2280_v37, %v571_v45  ;;  %1530 = vst.msk [vmem:[%s3082_s8 + $0x160] sm:$0xff] %vm1485_vm1, %v1465_v50  ;;  %v1466_v57 = vadd.f32 %v2286_v41, %v1395_v51 }
 0x139   :  { %v1738_v55 = vpack.c.bf16 %v707_v48, %v707_v48  ;;  %v708_v56 = vmax.f32 %v644_v49, 0.0  ;;  %1533 = vst.msk [vmem:[%s3082_s8 + $0x178] sm:$0xff] %vm1485_vm1, %v1468_v54 }
 0x13a   :  { %v1736_v58 = vpack.c.bf16 %v705_v52, %v705_v52  ;;  %v706_v59 = vmax.f32 %v642_v53, 0.0  ;;  %v1874_v60 = vpop.f32.mrb[48].mxu0  ;;  %1531 = vst.msk [vmem:[%s3082_s8 + $0x168] sm:$0xff] %vm1485_vm1, %v1466_v57  ;;  %v1940_v0 = vpop.f32.mrb[48].mxu1 }
 0x13b   :  { %1028 = vst.msk [vmem:[%s3083_s7 + $0xb8] sm:$0xf] %vm981_vm2, %v1738_v55  ;;  %v1739_v61 = vpack.c.bf16 %v708_v56, %v708_v56  ;;  %v576_v62 = vmul.f32 %v1874_v60, %v2270_v34  ;;  %v456_v63 = vpop.f32.mrb[49].mxu0  ;;  %v1400_v3 = vmul.f32 %v1940_v0, %v2275_v35  ;;  %v1280_v5 = vpop.f32.mrb[49].mxu1 }
 0x13c   :  { %1026 = vst.msk [vmem:[%s3083_s7 + $0xb0] sm:$0xf] %vm981_vm2, %v1736_v58  ;;  %v1737_v1 = vpack.c.bf16 %v706_v59, %v706_v59  ;;  %v574_v2 = vmul.f32 %v2270_v34, %v456_v63  ;;  %v1875_v4 = vpop.f32.mrb[50].mxu0  ;;  %v1398_v8 = vmul.f32 %v2275_v35, %v1280_v5  ;;  %v1941_v10 = vpop.f32.mrb[50].mxu1 }
 0x13d   :  { %1029 = vst.msk [vmem:[%s3083_s7 + $0xbc] sm:$0xf] %vm981_vm2, %v1739_v61  ;;  %v647_v6 = vadd.f32 %v2280_v37, %v576_v62  ;;  %v577_v7 = vmul.f32 %v1875_v4, %v2270_v34  ;;  %v459_v9 = vpop.f32.mrb[51].mxu0  ;;  %v1471_v12 = vadd.f32 %v2286_v41, %v1400_v3  ;;  %v1401_v14 = vmul.f32 %v1941_v10, %v2275_v35  ;;  %v1283_v15 = vpop.f32.mrb[51].mxu1 }
 0x13e   :  { %1027 = vst.msk [vmem:[%s3083_s7 + $0xb4] sm:$0xf] %vm981_vm2, %v1737_v1  ;;  %v645_v11 = vadd.f32 %v2280_v37, %v574_v2  ;;  %v575_v13 = vmul.f32 %v2270_v34, %v459_v9  ;;  %v1469_v18 = vadd.f32 %v2286_v41, %v1398_v8  ;;  %v1399_v19 = vmul.f32 %v2275_v35, %v1283_v15 }
 0x13f   :  { %v711_v16 = vmax.f32 %v647_v6, 0.0  ;;  %v648_v17 = vadd.f32 %v2280_v37, %v577_v7  ;;  %1536 = vst.msk [vmem:[%s3082_s8 + $0x190] sm:$0xff] %vm1485_vm1, %v1471_v12  ;;  %v1472_v34 = vadd.f32 %v2286_v41, %v1401_v14 }
 0x140   :  { %v709_v20 = vmax.f32 %v645_v11, 0.0  ;;  %v646_v21 = vadd.f32 %v2280_v37, %v575_v13  ;;  %1534 = vst.msk [vmem:[%s3082_s8 + $0x180] sm:$0xff] %vm1485_vm1, %v1469_v18  ;;  %v1470_v24 = vadd.f32 %v2286_v41, %v1399_v19  ;;  %v2902_v41 = vld [vmem:[%s3078_s2] ss:$0 sm:$0xff] }
 0x141   :  { %v1742_v22 = vpack.c.bf16 %v711_v16, %v711_v16  ;;  %v712_v23 = vmax.f32 %v648_v17, 0.0  ;;  %1537 = vst.msk [vmem:[%s3082_s8 + $0x198] sm:$0xff] %vm1485_vm1, %v1472_v34 }
 0x142   :  { %v1740_v35 = vpack.c.bf16 %v709_v20, %v709_v20  ;;  %v710_v25 = vmax.f32 %v646_v21, 0.0  ;;  %v1878_v26 = vpop.f32.mrb[52].mxu0  ;;  %1535 = vst.msk [vmem:[%s3082_s8 + $0x188] sm:$0xff] %vm1485_vm1, %v1470_v24  ;;  %v1944_v29 = vpop.f32.mrb[52].mxu1 }
 0x143   :  { %1032 = vst.msk [vmem:[%s3083_s7 + $0xc8] sm:$0xf] %vm981_vm2, %v1742_v22  ;;  %v1743_v37 = vpack.c.bf16 %v712_v23, %v712_v23  ;;  %v580_v27 = vmul.f32 %v2902_v41, %v1878_v26  ;;  %v472_v28 = vpop.f32.mrb[53].mxu0  ;;  %v1404_v33 = vmul.f32 %v2913_v32, %v1944_v29  ;;  %v1296_v38 = vpop.f32.mrb[53].mxu1 }
 0x144   :  { %1030 = vst.msk [vmem:[%s3083_s7 + $0xc0] sm:$0xf] %vm981_vm2, %v1740_v35  ;;  %v1741_v30 = vpack.c.bf16 %v710_v25, %v710_v25  ;;  %v578_v31 = vmul.f32 %v2902_v41, %v472_v28  ;;  %v1879_v36 = vpop.f32.mrb[54].mxu0  ;;  %v1402_v43 = vmul.f32 %v2913_v32, %v1296_v38  ;;  %v1945_v45 = vpop.f32.mrb[54].mxu1 }
 0x145   :  { %1033 = vst.msk [vmem:[%s3083_s7 + $0xcc] sm:$0xf] %vm981_vm2, %v1743_v37  ;;  %v651_v40 = vadd.f32 %v2923_v39, %v580_v27  ;;  %v581_v42 = vmul.f32 %v2902_v41, %v1879_v36  ;;  %v475_v44 = vpop.f32.mrb[55].mxu0  ;;  %v1475_v48 = vadd.f32 %v2936_v47, %v1404_v33  ;;  %v1405_v50 = vmul.f32 %v2913_v32, %v1945_v45  ;;  %v1299_v51 = vpop.f32.mrb[55].mxu1 }
 0x146   :  { %1031 = vst.msk [vmem:[%s3083_s7 + $0xc4] sm:$0xf] %vm981_vm2, %v1741_v30  ;;  %v649_v46 = vadd.f32 %v2923_v39, %v578_v31  ;;  %v579_v49 = vmul.f32 %v2902_v41, %v475_v44  ;;  %v1473_v54 = vadd.f32 %v2936_v47, %v1402_v43  ;;  %v1403_v55 = vmul.f32 %v2913_v32, %v1299_v51 }
 0x147   :  { %v715_v52 = vmax.f32 %v651_v40, 0.0  ;;  %v652_v53 = vadd.f32 %v2923_v39, %v581_v42  ;;  %1540 = vst.msk [vmem:[%s3082_s8 + $0x1b0] sm:$0xff] %vm1485_vm1, %v1475_v48  ;;  %v1476_v58 = vadd.f32 %v2936_v47, %v1405_v50 }
 0x148   :  { %v713_v56 = vmax.f32 %v649_v46, 0.0  ;;  %v650_v57 = vadd.f32 %v2923_v39, %v579_v49  ;;  %1538 = vst.msk [vmem:[%s3082_s8 + $0x1a0] sm:$0xff] %vm1485_vm1, %v1473_v54  ;;  %v1474_v61 = vadd.f32 %v2936_v47, %v1403_v55 }
 0x149   :  { %v1746_v59 = vpack.c.bf16 %v715_v52, %v715_v52  ;;  %v716_v60 = vmax.f32 %v652_v53, 0.0  ;;  %1541 = vst.msk [vmem:[%s3082_s8 + $0x1b8] sm:$0xff] %vm1485_vm1, %v1476_v58 }
 0x14a   :  { %v1744_v62 = vpack.c.bf16 %v713_v56, %v713_v56  ;;  %v714_v63 = vmax.f32 %v650_v57, 0.0  ;;  %v1882_v0 = vpop.f32.mrb[56].mxu0  ;;  %1539 = vst.msk [vmem:[%s3082_s8 + $0x1a8] sm:$0xff] %vm1485_vm1, %v1474_v61  ;;  %v1948_v4 = vpop.f32.mrb[56].mxu1 }
 0x14b   :  { %1036 = vst.msk [vmem:[%s3083_s7 + $0xd8] sm:$0xf] %vm981_vm2, %v1746_v59  ;;  %v1747_v1 = vpack.c.bf16 %v716_v60, %v716_v60  ;;  %v584_v2 = vmul.f32 %v2902_v41, %v1882_v0  ;;  %v488_v3 = vpop.f32.mrb[57].mxu0  ;;  %v1408_v7 = vmul.f32 %v2913_v32, %v1948_v4  ;;  %v1312_v9 = vpop.f32.mrb[57].mxu1 }
 0x14c   :  { %1034 = vst.msk [vmem:[%s3083_s7 + $0xd0] sm:$0xf] %vm981_vm2, %v1744_v62  ;;  %v1745_v5 = vpack.c.bf16 %v714_v63, %v714_v63  ;;  %v582_v6 = vmul.f32 %v2902_v41, %v488_v3  ;;  %v1883_v8 = vpop.f32.mrb[58].mxu0  ;;  %v1406_v12 = vmul.f32 %v2913_v32, %v1312_v9  ;;  %v1949_v14 = vpop.f32.mrb[58].mxu1 }
 0x14d   :  { %1037 = vst.msk [vmem:[%s3083_s7 + $0xdc] sm:$0xf] %vm981_vm2, %v1747_v1  ;;  %v655_v10 = vadd.f32 %v2923_v39, %v584_v2  ;;  %v585_v11 = vmul.f32 %v2902_v41, %v1883_v8  ;;  %v491_v13 = vpop.f32.mrb[59].mxu0  ;;  %v1479_v16 = vadd.f32 %v2936_v47, %v1408_v7  ;;  %v1409_v18 = vmul.f32 %v2913_v32, %v1949_v14  ;;  %v1315_v19 = vpop.f32.mrb[59].mxu1 }
 0x14e   :  { %1035 = vst.msk [vmem:[%s3083_s7 + $0xd4] sm:$0xf] %vm981_vm2, %v1745_v5  ;;  %v653_v15 = vadd.f32 %v2923_v39, %v582_v6  ;;  %v583_v17 = vmul.f32 %v2902_v41, %v491_v13  ;;  %v1477_v34 = vadd.f32 %v2936_v47, %v1406_v12  ;;  %v1407_v22 = vmul.f32 %v2913_v32, %v1315_v19 }
 0x14f   :  { %v719_v20 = vmax.f32 %v655_v10, 0.0  ;;  %v656_v21 = vadd.f32 %v2923_v39, %v585_v11  ;;  %1544 = vst.msk [vmem:[%s3082_s8 + $0x1d0] sm:$0xff] %vm1485_vm1, %v1479_v16  ;;  %v1480_v35 = vadd.f32 %v2936_v47, %v1409_v18 }
 0x150   :  { %v717_v23 = vmax.f32 %v653_v15, 0.0  ;;  %v654_v24 = vadd.f32 %v2923_v39, %v583_v17  ;;  %1542 = vst.msk [vmem:[%s3082_s8 + $0x1c0] sm:$0xff] %vm1485_vm1, %v1477_v34  ;;  %v1478_v37 = vadd.f32 %v2936_v47, %v1407_v22 }
 0x151   :  { %v1750_v25 = vpack.c.bf16 %v719_v20, %v719_v20  ;;  %v720_v26 = vmax.f32 %v656_v21, 0.0  ;;  %1545 = vst.msk [vmem:[%s3082_s8 + $0x1d8] sm:$0xff] %vm1485_vm1, %v1480_v35 }
 0x152   :  { %v1748_v27 = vpack.c.bf16 %v717_v23, %v717_v23  ;;  %v718_v28 = vmax.f32 %v654_v24, 0.0  ;;  %v1886_v29 = vpop.f32.mrb[60].mxu0  ;;  %1543 = vst.msk [vmem:[%s3082_s8 + $0x1c8] sm:$0xff] %vm1485_vm1, %v1478_v37  ;;  %v1952_v36 = vpop.f32.mrb[60].mxu1 }
 0x153   :  { %1040 = vst.msk [vmem:[%s3083_s7 + $0xe8] sm:$0xf] %vm981_vm2, %v1750_v25  ;;  %v1751_v30 = vpack.c.bf16 %v720_v26, %v720_v26  ;;  %v588_v31 = vmul.f32 %v2902_v41, %v1886_v29  ;;  %v504_v33 = vpop.f32.mrb[61].mxu0  ;;  %v1412_v42 = vmul.f32 %v2913_v32, %v1952_v36  ;;  %v1328_v44 = vpop.f32.mrb[61].mxu1 }
 0x154   :  { %1038 = vst.msk [vmem:[%s3083_s7 + $0xe0] sm:$0xf] %vm981_vm2, %v1748_v27  ;;  %v1749_v38 = vpack.c.bf16 %v718_v28, %v718_v28  ;;  %v586_v40 = vmul.f32 %v2902_v41, %v504_v33  ;;  %v1887_v43 = vpop.f32.mrb[62].mxu0  ;;  %v1410_v48 = vmul.f32 %v2913_v32, %v1328_v44  ;;  %v1953_v50 = vpop.f32.mrb[62].mxu1 }
 0x155   :  { %1041 = vst.msk [vmem:[%s3083_s7 + $0xec] sm:$0xf] %vm981_vm2, %v1751_v30  ;;  %v659_v45 = vadd.f32 %v2923_v39, %v588_v31  ;;  %v589_v46 = vmul.f32 %v2902_v41, %v1887_v43  ;;  %v507_v49 = vpop.f32.mrb[63].mxu0  ;;  %v1483_v52 = vadd.f32 %v2936_v47, %v1412_v42  ;;  %v1413_v54 = vmul.f32 %v2913_v32, %v1953_v50  ;;  %v1331_v55 = vpop.f32.mrb[63].mxu1 }
 0x156   :  { %1039 = vst.msk [vmem:[%s3083_s7 + $0xe4] sm:$0xf] %vm981_vm2, %v1749_v38  ;;  %v657_v51 = vadd.f32 %v2923_v39, %v586_v40  ;;  %v587_v53 = vmul.f32 %v2902_v41, %v507_v49  ;;  %v1481_v58 = vadd.f32 %v2936_v47, %v1410_v48  ;;  %v1411_v59 = vmul.f32 %v2913_v32, %v1331_v55 }
 0x157   :  { %v723_v56 = vmax.f32 %v659_v45, 0.0  ;;  %v660_v57 = vadd.f32 %v2923_v39, %v589_v46  ;;  %1548 = vst.msk [vmem:[%s3082_s8 + $0x1f0] sm:$0xff] %vm1485_vm1, %v1483_v52  ;;  %v1484_v41 = vadd.f32 %v2936_v47, %v1413_v54 }
 0x158   :  { %v721_v60 = vmax.f32 %v657_v51, 0.0  ;;  %v658_v61 = vadd.f32 %v2923_v39, %v587_v53  ;;  %1546 = vst.msk [vmem:[%s3082_s8 + $0x1e0] sm:$0xff] %vm1485_vm1, %v1481_v58  ;;  %v1482_v0 = vadd.f32 %v2936_v47, %v1411_v59 }
 0x159   :  { %v1754_v62 = vpack.c.bf16 %v723_v56, %v723_v56  ;;  %v724_v63 = vmax.f32 %v660_v57, 0.0  ;;  %1549 = vst.msk [vmem:[%s3082_s8 + $0x1f8] sm:$0xff] %vm1485_vm1, %v1484_v41 }
 0x15a   :  { %v1752_v32 = vpack.c.bf16 %v721_v60, %v721_v60  ;;  %v722_v1 = vmax.f32 %v658_v61, 0.0  ;;  %1547 = vst.msk [vmem:[%s3082_s8 + $0x1e8] sm:$0xff] %vm1485_vm1, %v1482_v0 }
 0x15b   :  { %1044 = vst.msk [vmem:[%s3083_s7 + $0xf8] sm:$0xf] %vm981_vm2, %v1754_v62  ;;  %v1755_v39 = vpack.c.bf16 %v724_v63, %v724_v63 }
 0x15c   :  { %1042 = vst.msk [vmem:[%s3083_s7 + $0xf0] sm:$0xf] %vm981_vm2, %v1752_v32  ;;  %v1753_v47 = vpack.c.bf16 %v722_v1, %v722_v1 }
 0x15d   :  { %1045 = vst.msk [vmem:[%s3083_s7 + $0xfc] sm:$0xf] %vm981_vm2, %v1755_v39 }
 0x15e   :  { %1043 = vst.msk [vmem:[%s3083_s7 + $0xf4] sm:$0xf] %vm981_vm2, %v1753_v47 }

// kernel: block_forward.5
= control target key start
LH: loop header
LB: loop body
LE: loop exit
PB: predicated region body
PF: predicated region fallthrough
CT: control target
= control target key end

     0   :  { %vm344_vm0 = vcmask 1043456   ;;  %vm247_vm1 = vcmask 64512   ;;  %s1850_s0 = inlined_call_operand.vmem [shape: bf16[512,8], index: 0, kind: input, shape index: {}]   ;;  %s1851_s1 = inlined_call_operand.vmem [shape: bf16[8,32], index: 1, kind: input, shape index: {}]   ;;  %s1852_s2 = inlined_call_operand.vmem [shape: f32[1,32], index: 2, kind: input, shape index: {}]   ;;  %s1853_s3 = inlined_call_operand.vmem [shape: f32[1,32], index: 3, kind: input, shape index: {}]   ;;  %s1854_s4 = inlined_call_operand.vmem [shape: f32[512,32], index: 4, kind: input, shape index: {}]   ;;  %s1855_s5 = inlined_call_operand.hbm [shape: f32[512,32], index: 5, kind: output, shape index: {}]  }
   0x1   :  { %v86_v0 = vld [vmem:[%s1851_s1] sm:$0xf]  ;;  %v1226_v4 = vld [vmem:[%s1850_s0 + $0x8] sm:$0xff]   ;;  %v1228_v6 = vld [vmem:[%s1850_s0 + $0x10] sm:$0xff]  }
   0x2   :  { %v1224_v1 = vld [vmem:[%s1850_s0] sm:$0xff]   ;;  %1219 = vmatprep.subr.msk.bf16.mxu0 %vm344_vm0, %v86_v0  ;;  %1220 = vmatprep.subr.msk.bf16.mxu1 %vm344_vm0, %v86_v0  ;;  %v346_v2 = vsel %vm344_vm0, %v86_v0, 0  ;;  %v1227_v5 = vld [vmem:[%s1850_s0 + $0x88] sm:$0xff]   ;;  %v1229_v7 = vld [vmem:[%s1850_s0 + $0x90] sm:$0xff]  }
   0x3   :  { %1152 = vmatpush3.bf16.msra.mxu0 %v346_v2  ;;  %1218 = vmatpush3.bf16.msra.mxu1 %v346_v2  ;;  %v1225_v3 = vld [vmem:[%s1850_s0 + $0x80] sm:$0xff]   ;;  %v1230_v8 = vld [vmem:[%s1850_s0 + $0x18] sm:$0xff]   ;;  %v1234_v12 = vld [vmem:[%s1850_s0 + $0x28] sm:$0xff]  }
   0x4   :  { %1153 = vmatprep.mubr.msk.bf16.mxu0 %vm247_vm1, %v1224_v1  ;;  %1185 = vmatprep.mubr.msk.bf16.mxu1 %vm247_vm1, %v1225_v3  ;;  %v1231_v9 = vld [vmem:[%s1850_s0 + $0x98] sm:$0xff]   ;;  %v1232_v10 = vld [vmem:[%s1850_s0 + $0x20] sm:$0xff]   ;;  %v1235_v13 = vld [vmem:[%s1850_s0 + $0xa8] sm:$0xff]  }
   0x5   :  { %v1233_v11 = vld [vmem:[%s1850_s0 + $0xa0] sm:$0xff]   ;;  %v1236_v14 = vld [vmem:[%s1850_s0 + $0x30] sm:$0xff]   ;;  %v1238_v16 = vld [vmem:[%s1850_s0 + $0x38] sm:$0xff]  }
   0x6   :  { %1154 = vmatmul.mubr.msk.bf16.vlgmr.msra.gmra.mrb[0].mxu0 %vm247_vm1, %v1226_v4  ;;  %1186 = vmatmul.mubr.msk.bf16.vlgmr.msra.gmra.mrb[0].mxu1 %vm247_vm1, %v1227_v5  ;;  %v1237_v15 = vld [vmem:[%s1850_s0 + $0xb0] sm:$0xff]   ;;  %v1239_v17 = vld [vmem:[%s1850_s0 + $0xb8] sm:$0xff]   ;;  %v1240_v18 = vld [vmem:[%s1850_s0 + $0x40] sm:$0xff]  }
   0x7   :  { %1157 = vmatprep.mubr.msk.bf16.mxu0 %vm247_vm1, %v1228_v6  ;;  %1189 = vmatprep.mubr.msk.bf16.mxu1 %vm247_vm1, %v1229_v7  ;;  %v1241_v19 = vld [vmem:[%s1850_s0 + $0xc0] sm:$0xff]  }
   0xe   :  { %1158 = vmatmul.mubr.msk.bf16.gmra.mrb[4].mxu0 %vm247_vm1, %v1230_v8  ;;  %1190 = vmatmul.mubr.msk.bf16.gmra.mrb[4].mxu1 %vm247_vm1, %v1231_v9 }
   0xf   :  { %1161 = vmatprep.mubr.msk.bf16.mxu0 %vm247_vm1, %v1232_v10  ;;  %1193 = vmatprep.mubr.msk.bf16.mxu1 %vm247_vm1, %v1233_v11 }
  0x16   :  { %1162 = vmatmul.mubr.msk.bf16.gmra.mrb[8].mxu0 %vm247_vm1, %v1234_v12  ;;  %1194 = vmatmul.mubr.msk.bf16.gmra.mrb[8].mxu1 %vm247_vm1, %v1235_v13 }
  0x17   :  { %1165 = vmatprep.mubr.msk.bf16.mxu0 %vm247_vm1, %v1236_v14  ;;  %1197 = vmatprep.mubr.msk.bf16.mxu1 %vm247_vm1, %v1237_v15 }
  0x1e   :  { %1166 = vmatmul.mubr.msk.bf16.gmra.mrb[12].mxu0 %vm247_vm1, %v1238_v16  ;;  %1198 = vmatmul.mubr.msk.bf16.gmra.mrb[12].mxu1 %vm247_vm1, %v1239_v17 }
  0x1f   :  { %1169 = vmatprep.mubr.msk.bf16.mxu0 %vm247_vm1, %v1240_v18  ;;  %1201 = vmatprep.mubr.msk.bf16.mxu1 %vm247_vm1, %v1241_v19 }
  0x20   :  { %10 = vsyncpa [#allocation3], 0  ;;  %v1242_v20 = vld [vmem:[%s1850_s0 + $0x48] sm:$0xff]   ;;  %v1244_v22 = vld [vmem:[%s1850_s0 + $0x50] sm:$0xff]   ;;  %vm971_vm2 = vcmask 261120   ;;  %s1280_s19 = smov [#allocation2]  }
  0x21   :  { %v1243_v21 = vld [vmem:[%s1850_s0 + $0xc8] sm:$0xff]   ;;  %v1245_v23 = vld [vmem:[%s1850_s0 + $0xd0] sm:$0xff]   ;;  %v1246_v24 = vld [vmem:[%s1850_s0 + $0x58] sm:$0xff]   ;;  %s1041_s20 = sshll.u32 %s1280_s19, 4  ;;  %s1042_s20 = int_to_ptr.vmem [resolvable:$true] %s1041_s20 }
  0x22   :  { %v1247_v25 = vld [vmem:[%s1850_s0 + $0xd8] sm:$0xff]   ;;  %v1248_v26 = vld [vmem:[%s1850_s0 + $0x60] sm:$0xff]   ;;  %v1250_v28 = vld [vmem:[%s1850_s0 + $0x68] sm:$0xff]   ;;  %p1261_p1 = scmp.lt.s32.totalorder %s1042_s20, %s1042_s20 }
  0x23   :  { %v1249_v27 = vld [vmem:[%s1850_s0 + $0xe0] sm:$0xff]   ;;  %v1251_v29 = vld [vmem:[%s1850_s0 + $0xe8] sm:$0xff]   ;;  %v1252_v30 = vld [vmem:[%s1850_s0 + $0x70] sm:$0xff]  }
  0x24   :  { %v1253_v31 = vld [vmem:[%s1850_s0 + $0xf0] sm:$0xff]   ;;  %v1254_v32 = vld [vmem:[%s1850_s0 + $0x78] sm:$0xff]   ;;  %v1447_v34 = vld [vmem:[%s1852_s2] ss:$0 sm:$0xff] }
  0x25   :  { %v1255_v33 = vld [vmem:[%s1850_s0 + $0xf8] sm:$0xff]   ;;  %v1452_v36 = vld [vmem:[%s1853_s3] ss:$0 sm:$0xff]  ;;  %v781_v40 = vld [vmem:[%s1854_s4 + $0x10] sm:$0xff] }
  0x26   :  { %1170 = vmatmul.mubr.msk.bf16.gmra.mrb[16].mxu0 %vm247_vm1, %v1242_v20  ;;  %1202 = vmatmul.mubr.msk.bf16.gmra.mrb[16].mxu1 %vm247_vm1, %v1243_v21  ;;  %v813_v46 = vld [vmem:[%s1854_s4 + $0x110] sm:$0xff]  ;;  %v779_v47 = vld [vmem:[%s1854_s4] sm:$0xff]  ;;  %v782_v55 = vld [vmem:[%s1854_s4 + $0x18] sm:$0xff] }
  0x27   :  { %1173 = vmatprep.mubr.msk.bf16.mxu0 %vm247_vm1, %v1244_v22  ;;  %1205 = vmatprep.mubr.msk.bf16.mxu1 %vm247_vm1, %v1245_v23  ;;  %v811_v54 = vld [vmem:[%s1854_s4 + $0x100] sm:$0xff]  ;;  %v814_v62 = vld [vmem:[%s1854_s4 + $0x118] sm:$0xff]  ;;  %v780_v63 = vld [vmem:[%s1854_s4 + $0x8] sm:$0xff] }
  0x28   :  { %v812_v5 = vld [vmem:[%s1854_s4 + $0x108] sm:$0xff]  ;;  %v785_v23 = vld [vmem:[%s1854_s4 + $0x30] sm:$0xff] }
  0x2e   :  { %1174 = vmatmul.mubr.msk.bf16.gmra.mrb[20].mxu0 %vm247_vm1, %v1246_v24  ;;  %1206 = vmatmul.mubr.msk.bf16.gmra.mrb[20].mxu1 %vm247_vm1, %v1247_v25 }
  0x2f   :  { %1177 = vmatprep.mubr.msk.bf16.mxu0 %vm247_vm1, %v1248_v26  ;;  %1209 = vmatprep.mubr.msk.bf16.mxu1 %vm247_vm1, %v1249_v27 }
  0x36   :  { %1178 = vmatmul.mubr.msk.bf16.gmra.mrb[24].mxu0 %vm247_vm1, %v1250_v28  ;;  %1210 = vmatmul.mubr.msk.bf16.gmra.mrb[24].mxu1 %vm247_vm1, %v1251_v29 }
  0x37   :  { %1181 = vmatprep.mubr.msk.bf16.mxu0 %vm247_vm1, %v1252_v30  ;;  %1213 = vmatprep.mubr.msk.bf16.mxu1 %vm247_vm1, %v1253_v31  ;;  %v817_v30 = vld [vmem:[%s1854_s4 + $0x130] sm:$0xff]  ;;  %v783_v31 = vld [vmem:[%s1854_s4 + $0x20] sm:$0xff] }
  0x3e   :  { %1182 = vmatmul.mubr.msk.bf16.gmra.mrb[28].mxu0 %vm247_vm1, %v1254_v32  ;;  %1214 = vmatmul.mubr.msk.bf16.gmra.mrb[28].mxu1 %vm247_vm1, %v1255_v33 }
  0xd9   :  { %v1155_v35 = vpop.f32.mrb[0].mxu0  ;;  %v1187_v38 = vpop.f32.mrb[0].mxu1 }
  0xda   :  { %v646_v37 = vmul.f32 %v1155_v35, %v1447_v34  ;;  %v382_v39 = vpop.f32.mrb[1].mxu0  ;;  %v678_v41 = vmul.f32 %v1187_v38, %v1447_v34  ;;  %v510_v43 = vpop.f32.mrb[1].mxu1 }
  0xdb   :  { %v644_v42 = vmul.f32 %v1447_v34, %v382_v39  ;;  %v1156_v44 = vpop.f32.mrb[2].mxu0  ;;  %v676_v48 = vmul.f32 %v1447_v34, %v510_v43  ;;  %v1188_v50 = vpop.f32.mrb[2].mxu1 }
  0xdc   :  { %v717_v45 = vadd.f32 %v1452_v36, %v646_v37  ;;  %v647_v49 = vmul.f32 %v1156_v44, %v1447_v34  ;;  %v385_v51 = vpop.f32.mrb[3].mxu0  ;;  %v749_v52 = vadd.f32 %v1452_v36, %v678_v41  ;;  %v679_v56 = vmul.f32 %v1188_v50, %v1447_v34  ;;  %v513_v58 = vpop.f32.mrb[3].mxu1  ;;  %v786_v41 = vld [vmem:[%s1854_s4 + $0x38] sm:$0xff] }
  0xdd   :  { %v715_v53 = vadd.f32 %v1452_v36, %v644_v42  ;;  %v645_v57 = vmul.f32 %v1447_v34, %v385_v51  ;;  %v747_v60 = vadd.f32 %v1452_v36, %v676_v48  ;;  %v677_v0 = vmul.f32 %v1447_v34, %v513_v58  ;;  %v818_v48 = vld [vmem:[%s1854_s4 + $0x138] sm:$0xff] }
  0xde   :  { %v845_v59 = vadd.f32 %v781_v40, %v717_v45  ;;  %v718_v61 = vadd.f32 %v1452_v36, %v647_v49  ;;  %v877_v1 = vadd.f32 %v813_v46, %v749_v52  ;;  %v750_v3 = vadd.f32 %v1452_v36, %v679_v56  ;;  %v815_v40 = vld [vmem:[%s1854_s4 + $0x120] sm:$0xff]  ;;  %v784_v49 = vld [vmem:[%s1854_s4 + $0x28] sm:$0xff] }
  0xdf   :  { %v843_v2 = vadd.f32 %v779_v47, %v715_v53  ;;  %v716_v4 = vadd.f32 %v1452_v36, %v645_v57  ;;  %v875_v7 = vadd.f32 %v811_v54, %v747_v60  ;;  %v748_v9 = vadd.f32 %v1452_v36, %v677_v0 }
  0xe0   :  { %v909_v6 = vmax.f32 %v845_v59, 0.0  ;;  %v846_v8 = vadd.f32 %v782_v55, %v718_v61  ;;  %v941_v10 = vmax.f32 %v877_v1, 0.0  ;;  %v878_v12 = vadd.f32 %v814_v62, %v750_v3  ;;  %v816_v55 = vld [vmem:[%s1854_s4 + $0x128] sm:$0xff] }
  0xe1   :  { %v907_v11 = vmax.f32 %v843_v2, 0.0  ;;  %v844_v13 = vadd.f32 %v780_v63, %v716_v4  ;;  %v1159_v14 = vpop.f32.mrb[4].mxu0  ;;  %v939_v15 = vmax.f32 %v875_v7, 0.0  ;;  %v876_v17 = vadd.f32 %v812_v5, %v748_v9  ;;  %v1191_v19 = vpop.f32.mrb[4].mxu1  ;;  %v789_v9 = vld [vmem:[%s1854_s4 + $0x50] sm:$0xff] }
  0xe2   :  { %974 = vst.msk [vmem:[#allocation2 + $0x10] sm:$0xff] %vm971_vm2, %v909_v6  ;;  %v910_v16 = vmax.f32 %v846_v8, 0.0  ;;  %v650_v18 = vmul.f32 %v1159_v14, %v1447_v34  ;;  %v398_v20 = vpop.f32.mrb[5].mxu0  ;;  %1006 = vst.msk [vmem:[#allocation2 + $0x110] sm:$0xff] %vm971_vm2, %v941_v10  ;;  %v942_v21 = vmax.f32 %v878_v12, 0.0  ;;  %v682_v24 = vmul.f32 %v1191_v19, %v1447_v34  ;;  %v526_v26 = vpop.f32.mrb[5].mxu1 }
  0xe3   :  { %972 = vst.msk [vmem:[#allocation2] sm:$0xff] %vm971_vm2, %v907_v11  ;;  %v908_v22 = vmax.f32 %v844_v13, 0.0  ;;  %v648_v25 = vmul.f32 %v1447_v34, %v398_v20  ;;  %v1160_v27 = vpop.f32.mrb[6].mxu0  ;;  %1004 = vst.msk [vmem:[#allocation2 + $0x100] sm:$0xff] %vm971_vm2, %v939_v15  ;;  %v940_v28 = vmax.f32 %v876_v17, 0.0  ;;  %v680_v32 = vmul.f32 %v1447_v34, %v526_v26  ;;  %v1192_v35 = vpop.f32.mrb[6].mxu1 }
  0xe4   :  { %975 = vst.msk [vmem:[#allocation2 + $0x18] sm:$0xff] %vm971_vm2, %v910_v16  ;;  %v721_v29 = vadd.f32 %v1452_v36, %v650_v18  ;;  %v651_v33 = vmul.f32 %v1160_v27, %v1447_v34  ;;  %v401_v37 = vpop.f32.mrb[7].mxu0  ;;  %1007 = vst.msk [vmem:[#allocation2 + $0x118] sm:$0xff] %vm971_vm2, %v942_v21  ;;  %v753_v38 = vadd.f32 %v1452_v36, %v682_v24  ;;  %v529_v44 = vpop.f32.mrb[7].mxu1  ;;  %v821_v16 = vld [vmem:[%s1854_s4 + $0x150] sm:$0xff]  ;;  %v787_v17 = vld [vmem:[%s1854_s4 + $0x40] sm:$0xff] }
  0xe5   :  { %973 = vst.msk [vmem:[#allocation2 + $0x8] sm:$0xff] %vm971_vm2, %v908_v22  ;;  %v719_v39 = vadd.f32 %v1452_v36, %v648_v25  ;;  %v683_v42 = vmul.f32 %v1192_v35, %v1447_v34  ;;  %v649_v43 = vmul.f32 %v1447_v34, %v401_v37  ;;  %1005 = vst.msk [vmem:[#allocation2 + $0x108] sm:$0xff] %vm971_vm2, %v940_v28  ;;  %v819_v24 = vld [vmem:[%s1854_s4 + $0x140] sm:$0xff]  ;;  %v790_v25 = vld [vmem:[%s1854_s4 + $0x58] sm:$0xff] }
  0xe6   :  { %v849_v45 = vadd.f32 %v785_v23, %v721_v29  ;;  %v751_v46 = vadd.f32 %v1452_v36, %v680_v32  ;;  %v722_v47 = vadd.f32 %v1452_v36, %v651_v33  ;;  %v681_v50 = vmul.f32 %v1447_v34, %v529_v44  ;;  %v822_v32 = vld [vmem:[%s1854_s4 + $0x158] sm:$0xff]  ;;  %v788_v33 = vld [vmem:[%s1854_s4 + $0x48] sm:$0xff] }
  0xe7   :  { %v881_v51 = vadd.f32 %v817_v30, %v753_v38  ;;  %v847_v52 = vadd.f32 %v783_v31, %v719_v39  ;;  %v754_v53 = vadd.f32 %v1452_v36, %v683_v42  ;;  %v720_v54 = vadd.f32 %v1452_v36, %v649_v43 }
  0xe8   :  { %v913_v56 = vmax.f32 %v849_v45, 0.0  ;;  %v879_v57 = vadd.f32 %v815_v40, %v751_v46  ;;  %v850_v58 = vadd.f32 %v786_v41, %v722_v47  ;;  %v752_v59 = vadd.f32 %v1452_v36, %v681_v50  ;;  %v820_v41 = vld [vmem:[%s1854_s4 + $0x148] sm:$0xff] }
  0xe9   :  { %v945_v60 = vmax.f32 %v881_v51, 0.0  ;;  %v911_v61 = vmax.f32 %v847_v52, 0.0  ;;  %v882_v62 = vadd.f32 %v818_v48, %v754_v53  ;;  %v848_v63 = vadd.f32 %v784_v49, %v720_v54  ;;  %v1163_v0 = vpop.f32.mrb[8].mxu0  ;;  %v1195_v5 = vpop.f32.mrb[8].mxu1 }
  0xea   :  { %978 = vst.msk [vmem:[#allocation2 + $0x30] sm:$0xff] %vm971_vm2, %v913_v56  ;;  %v943_v1 = vmax.f32 %v879_v57, 0.0  ;;  %v914_v2 = vmax.f32 %v850_v58, 0.0  ;;  %v880_v3 = vadd.f32 %v816_v55, %v752_v59  ;;  %v654_v4 = vmul.f32 %v1163_v0, %v1447_v34  ;;  %v414_v6 = vpop.f32.mrb[9].mxu0  ;;  %v542_v12 = vpop.f32.mrb[9].mxu1  ;;  %v793_v59 = vld [vmem:[%s1854_s4 + $0x70] sm:$0xff] }
  0xeb   :  { %1010 = vst.msk [vmem:[#allocation2 + $0x130] sm:$0xff] %vm971_vm2, %v945_v60  ;;  %976 = vst.msk [vmem:[#allocation2 + $0x20] sm:$0xff] %vm971_vm2, %v911_v61  ;;  %v946_v7 = vmax.f32 %v882_v62, 0.0  ;;  %v912_v8 = vmax.f32 %v848_v63, 0.0  ;;  %v686_v10 = vmul.f32 %v1195_v5, %v1447_v34  ;;  %v652_v11 = vmul.f32 %v1447_v34, %v414_v6  ;;  %v1164_v13 = vpop.f32.mrb[10].mxu0  ;;  %v1196_v20 = vpop.f32.mrb[10].mxu1 }
  0xec   :  { %1008 = vst.msk [vmem:[#allocation2 + $0x120] sm:$0xff] %vm971_vm2, %v943_v1  ;;  %979 = vst.msk [vmem:[#allocation2 + $0x38] sm:$0xff] %vm971_vm2, %v914_v2  ;;  %v944_v14 = vmax.f32 %v880_v3, 0.0  ;;  %v725_v15 = vadd.f32 %v1452_v36, %v654_v4  ;;  %v684_v18 = vmul.f32 %v1447_v34, %v542_v12  ;;  %v655_v19 = vmul.f32 %v1164_v13, %v1447_v34  ;;  %v417_v21 = vpop.f32.mrb[11].mxu0  ;;  %v545_v28 = vpop.f32.mrb[11].mxu1  ;;  %v825_v2 = vld [vmem:[%s1854_s4 + $0x170] sm:$0xff] }
  0xed   :  { %1011 = vst.msk [vmem:[#allocation2 + $0x138] sm:$0xff] %vm971_vm2, %v946_v7  ;;  %977 = vst.msk [vmem:[#allocation2 + $0x28] sm:$0xff] %vm971_vm2, %v912_v8  ;;  %v757_v22 = vadd.f32 %v1452_v36, %v686_v10  ;;  %v723_v23 = vadd.f32 %v1452_v36, %v652_v11  ;;  %v687_v26 = vmul.f32 %v1196_v20, %v1447_v34  ;;  %v791_v3 = vld [vmem:[%s1854_s4 + $0x60] sm:$0xff]  ;;  %v794_v11 = vld [vmem:[%s1854_s4 + $0x78] sm:$0xff] }
  0xee   :  { %v653_v27 = vmul.f32 %v1447_v34, %v417_v21  ;;  %1009 = vst.msk [vmem:[#allocation2 + $0x128] sm:$0xff] %vm971_vm2, %v944_v14  ;;  %v853_v29 = vadd.f32 %v789_v9, %v725_v15  ;;  %v755_v30 = vadd.f32 %v1452_v36, %v684_v18  ;;  %v726_v31 = vadd.f32 %v1452_v36, %v655_v19  ;;  %v823_v10 = vld [vmem:[%s1854_s4 + $0x160] sm:$0xff]  ;;  %v826_v18 = vld [vmem:[%s1854_s4 + $0x178] sm:$0xff]  ;;  %v792_v19 = vld [vmem:[%s1854_s4 + $0x68] sm:$0xff] }
  0xef   :  { %v685_v35 = vmul.f32 %v1447_v34, %v545_v28  ;;  %v885_v37 = vadd.f32 %v821_v16, %v757_v22  ;;  %v851_v38 = vadd.f32 %v787_v17, %v723_v23  ;;  %v758_v39 = vadd.f32 %v1452_v36, %v687_v26 }
  0xf0   :  { %v724_v40 = vadd.f32 %v1452_v36, %v653_v27  ;;  %v917_v42 = vmax.f32 %v853_v29, 0.0  ;;  %v883_v43 = vadd.f32 %v819_v24, %v755_v30  ;;  %v854_v44 = vadd.f32 %v790_v25, %v726_v31  ;;  %v824_v25 = vld [vmem:[%s1854_s4 + $0x168] sm:$0xff] }
  0xf1   :  { %v756_v45 = vadd.f32 %v1452_v36, %v685_v35  ;;  %v949_v46 = vmax.f32 %v885_v37, 0.0  ;;  %v915_v47 = vmax.f32 %v851_v38, 0.0  ;;  %v886_v48 = vadd.f32 %v822_v32, %v758_v39  ;;  %v1167_v50 = vpop.f32.mrb[12].mxu0  ;;  %v1199_v55 = vpop.f32.mrb[12].mxu1 }
  0xf2   :  { %v852_v49 = vadd.f32 %v788_v33, %v724_v40  ;;  %982 = vst.msk [vmem:[#allocation2 + $0x50] sm:$0xff] %vm971_vm2, %v917_v42  ;;  %v947_v51 = vmax.f32 %v883_v43, 0.0  ;;  %v918_v52 = vmax.f32 %v854_v44, 0.0  ;;  %v658_v54 = vmul.f32 %v1167_v50, %v1447_v34  ;;  %v430_v56 = vpop.f32.mrb[13].mxu0  ;;  %v558_v62 = vpop.f32.mrb[13].mxu1 }
  0xf3   :  { %v884_v53 = vadd.f32 %v820_v41, %v756_v45  ;;  %1014 = vst.msk [vmem:[#allocation2 + $0x150] sm:$0xff] %vm971_vm2, %v949_v46  ;;  %980 = vst.msk [vmem:[#allocation2 + $0x40] sm:$0xff] %vm971_vm2, %v915_v47  ;;  %v950_v57 = vmax.f32 %v886_v48, 0.0  ;;  %v690_v60 = vmul.f32 %v1199_v55, %v1447_v34  ;;  %v656_v61 = vmul.f32 %v1447_v34, %v430_v56  ;;  %v1168_v63 = vpop.f32.mrb[14].mxu0  ;;  %v1200_v6 = vpop.f32.mrb[14].mxu1  ;;  %v797_v45 = vld [vmem:[%s1854_s4 + $0x90] sm:$0xff] }
  0xf4   :  { %v916_v58 = vmax.f32 %v852_v49, 0.0  ;;  %1012 = vst.msk [vmem:[#allocation2 + $0x140] sm:$0xff] %vm971_vm2, %v947_v51  ;;  %983 = vst.msk [vmem:[#allocation2 + $0x58] sm:$0xff] %vm971_vm2, %v918_v52  ;;  %v729_v1 = vadd.f32 %v1452_v36, %v658_v54  ;;  %v688_v4 = vmul.f32 %v1447_v34, %v558_v62  ;;  %v659_v5 = vmul.f32 %v1168_v63, %v1447_v34  ;;  %v433_v7 = vpop.f32.mrb[15].mxu0  ;;  %v561_v14 = vpop.f32.mrb[15].mxu1  ;;  %v829_v52 = vld [vmem:[%s1854_s4 + $0x190] sm:$0xff] }
  0xf5   :  { %v948_v0 = vmax.f32 %v884_v53, 0.0  ;;  %1015 = vst.msk [vmem:[#allocation2 + $0x158] sm:$0xff] %vm971_vm2, %v950_v57  ;;  %v761_v8 = vadd.f32 %v1452_v36, %v690_v60  ;;  %v727_v9 = vadd.f32 %v1452_v36, %v656_v61  ;;  %v691_v12 = vmul.f32 %v1200_v6, %v1447_v34  ;;  %v795_v53 = vld [vmem:[%s1854_s4 + $0x80] sm:$0xff]  ;;  %v798_v61 = vld [vmem:[%s1854_s4 + $0x98] sm:$0xff] }
  0xf6   :  { %981 = vst.msk [vmem:[#allocation2 + $0x48] sm:$0xff] %vm971_vm2, %v916_v58  ;;  %v657_v13 = vmul.f32 %v1447_v34, %v433_v7  ;;  %v857_v15 = vadd.f32 %v793_v59, %v729_v1  ;;  %v759_v16 = vadd.f32 %v1452_v36, %v688_v4  ;;  %v730_v17 = vadd.f32 %v1452_v36, %v659_v5  ;;  %v827_v60 = vld [vmem:[%s1854_s4 + $0x180] sm:$0xff]  ;;  %v830_v4 = vld [vmem:[%s1854_s4 + $0x198] sm:$0xff]  ;;  %v796_v5 = vld [vmem:[%s1854_s4 + $0x88] sm:$0xff] }
  0xf7   :  { %1013 = vst.msk [vmem:[#allocation2 + $0x148] sm:$0xff] %vm971_vm2, %v948_v0  ;;  %v689_v20 = vmul.f32 %v1447_v34, %v561_v14  ;;  %v889_v21 = vadd.f32 %v825_v2, %v761_v8  ;;  %v855_v22 = vadd.f32 %v791_v3, %v727_v9  ;;  %v762_v23 = vadd.f32 %v1452_v36, %v691_v12 }
  0xf8   :  { %v728_v24 = vadd.f32 %v1452_v36, %v657_v13  ;;  %v921_v26 = vmax.f32 %v857_v15, 0.0  ;;  %v887_v27 = vadd.f32 %v823_v10, %v759_v16  ;;  %v858_v28 = vadd.f32 %v794_v11, %v730_v17  ;;  %v828_v11 = vld [vmem:[%s1854_s4 + $0x188] sm:$0xff] }
  0xf9   :  { %v760_v29 = vadd.f32 %v1452_v36, %v689_v20  ;;  %v953_v30 = vmax.f32 %v889_v21, 0.0  ;;  %v919_v31 = vmax.f32 %v855_v22, 0.0  ;;  %v890_v32 = vadd.f32 %v826_v18, %v762_v23  ;;  %v1171_v35 = vpop.f32.mrb[16].mxu0  ;;  %v1203_v41 = vpop.f32.mrb[16].mxu1 }
  0xfa   :  { %v856_v33 = vadd.f32 %v792_v19, %v728_v24  ;;  %986 = vst.msk [vmem:[#allocation2 + $0x70] sm:$0xff] %vm971_vm2, %v921_v26  ;;  %v951_v37 = vmax.f32 %v887_v27, 0.0  ;;  %v922_v38 = vmax.f32 %v858_v28, 0.0  ;;  %v662_v40 = vmul.f32 %v1171_v35, %v1447_v34  ;;  %v446_v42 = vpop.f32.mrb[17].mxu0  ;;  %v574_v48 = vpop.f32.mrb[17].mxu1 }
  0xfb   :  { %v888_v39 = vadd.f32 %v824_v25, %v760_v29  ;;  %1018 = vst.msk [vmem:[#allocation2 + $0x170] sm:$0xff] %vm971_vm2, %v953_v30  ;;  %984 = vst.msk [vmem:[#allocation2 + $0x60] sm:$0xff] %vm971_vm2, %v919_v31  ;;  %v954_v43 = vmax.f32 %v890_v32, 0.0  ;;  %v694_v46 = vmul.f32 %v1203_v41, %v1447_v34  ;;  %v660_v47 = vmul.f32 %v1447_v34, %v446_v42  ;;  %v1172_v49 = vpop.f32.mrb[18].mxu0  ;;  %v1204_v56 = vpop.f32.mrb[18].mxu1  ;;  %v801_v29 = vld [vmem:[%s1854_s4 + $0xb0] sm:$0xff] }
  0xfc   :  { %v920_v44 = vmax.f32 %v856_v33, 0.0  ;;  %1016 = vst.msk [vmem:[#allocation2 + $0x160] sm:$0xff] %vm971_vm2, %v951_v37  ;;  %987 = vst.msk [vmem:[#allocation2 + $0x78] sm:$0xff] %vm971_vm2, %v922_v38  ;;  %v733_v51 = vadd.f32 %v1452_v36, %v662_v40  ;;  %v692_v54 = vmul.f32 %v1447_v34, %v574_v48  ;;  %v663_v55 = vmul.f32 %v1172_v49, %v1447_v34  ;;  %v449_v57 = vpop.f32.mrb[19].mxu0  ;;  %v577_v0 = vpop.f32.mrb[19].mxu1  ;;  %v833_v38 = vld [vmem:[%s1854_s4 + $0x1b0] sm:$0xff] }
  0xfd   :  { %v952_v50 = vmax.f32 %v888_v39, 0.0  ;;  %1019 = vst.msk [vmem:[#allocation2 + $0x178] sm:$0xff] %vm971_vm2, %v954_v43  ;;  %v765_v58 = vadd.f32 %v1452_v36, %v694_v46  ;;  %v731_v59 = vadd.f32 %v1452_v36, %v660_v47  ;;  %v695_v62 = vmul.f32 %v1204_v56, %v1447_v34  ;;  %v799_v39 = vld [vmem:[%s1854_s4 + $0xa0] sm:$0xff]  ;;  %v802_v47 = vld [vmem:[%s1854_s4 + $0xb8] sm:$0xff] }
  0xfe   :  { %985 = vst.msk [vmem:[#allocation2 + $0x68] sm:$0xff] %vm971_vm2, %v920_v44  ;;  %v661_v63 = vmul.f32 %v1447_v34, %v449_v57  ;;  %v861_v1 = vadd.f32 %v797_v45, %v733_v51  ;;  %v763_v2 = vadd.f32 %v1452_v36, %v692_v54  ;;  %v734_v3 = vadd.f32 %v1452_v36, %v663_v55  ;;  %v831_v46 = vld [vmem:[%s1854_s4 + $0x1a0] sm:$0xff]  ;;  %v834_v54 = vld [vmem:[%s1854_s4 + $0x1b8] sm:$0xff]  ;;  %v800_v55 = vld [vmem:[%s1854_s4 + $0xa8] sm:$0xff] }
  0xff   :  { %1017 = vst.msk [vmem:[#allocation2 + $0x168] sm:$0xff] %vm971_vm2, %v952_v50  ;;  %v693_v6 = vmul.f32 %v1447_v34, %v577_v0  ;;  %v893_v7 = vadd.f32 %v829_v52, %v765_v58  ;;  %v859_v8 = vadd.f32 %v795_v53, %v731_v59  ;;  %v766_v9 = vadd.f32 %v1452_v36, %v695_v62 }
 0x100   :  { %v732_v10 = vadd.f32 %v1452_v36, %v661_v63  ;;  %v925_v12 = vmax.f32 %v861_v1, 0.0  ;;  %v891_v13 = vadd.f32 %v827_v60, %v763_v2  ;;  %v862_v14 = vadd.f32 %v798_v61, %v734_v3  ;;  %v832_v61 = vld [vmem:[%s1854_s4 + $0x1a8] sm:$0xff] }
 0x101   :  { %v764_v15 = vadd.f32 %v1452_v36, %v693_v6  ;;  %v957_v16 = vmax.f32 %v893_v7, 0.0  ;;  %v923_v17 = vmax.f32 %v859_v8, 0.0  ;;  %v894_v18 = vadd.f32 %v830_v4, %v766_v9  ;;  %v1175_v20 = vpop.f32.mrb[20].mxu0  ;;  %v1207_v25 = vpop.f32.mrb[20].mxu1 }
 0x102   :  { %v860_v19 = vadd.f32 %v796_v5, %v732_v10  ;;  %990 = vst.msk [vmem:[#allocation2 + $0x90] sm:$0xff] %vm971_vm2, %v925_v12  ;;  %v955_v21 = vmax.f32 %v891_v13, 0.0  ;;  %v926_v22 = vmax.f32 %v862_v14, 0.0  ;;  %v666_v24 = vmul.f32 %v1175_v20, %v1447_v34  ;;  %v462_v26 = vpop.f32.mrb[21].mxu0  ;;  %v590_v32 = vpop.f32.mrb[21].mxu1 }
 0x103   :  { %v892_v23 = vadd.f32 %v828_v11, %v764_v15  ;;  %1022 = vst.msk [vmem:[#allocation2 + $0x190] sm:$0xff] %vm971_vm2, %v957_v16  ;;  %988 = vst.msk [vmem:[#allocation2 + $0x80] sm:$0xff] %vm971_vm2, %v923_v17  ;;  %v958_v27 = vmax.f32 %v894_v18, 0.0  ;;  %v698_v30 = vmul.f32 %v1207_v25, %v1447_v34  ;;  %v664_v31 = vmul.f32 %v1447_v34, %v462_v26  ;;  %v1176_v33 = vpop.f32.mrb[22].mxu0  ;;  %v1208_v42 = vpop.f32.mrb[22].mxu1  ;;  %v805_v15 = vld [vmem:[%s1854_s4 + $0xd0] sm:$0xff] }
 0x104   :  { %v924_v28 = vmax.f32 %v860_v19, 0.0  ;;  %1020 = vst.msk [vmem:[#allocation2 + $0x180] sm:$0xff] %vm971_vm2, %v955_v21  ;;  %991 = vst.msk [vmem:[#allocation2 + $0x98] sm:$0xff] %vm971_vm2, %v926_v22  ;;  %v737_v37 = vadd.f32 %v1452_v36, %v666_v24  ;;  %v696_v40 = vmul.f32 %v1447_v34, %v590_v32  ;;  %v667_v41 = vmul.f32 %v1176_v33, %v1447_v34  ;;  %v465_v43 = vpop.f32.mrb[23].mxu0  ;;  %v593_v50 = vpop.f32.mrb[23].mxu1  ;;  %v837_v22 = vld [vmem:[%s1854_s4 + $0x1d0] sm:$0xff] }
 0x105   :  { %v956_v35 = vmax.f32 %v892_v23, 0.0  ;;  %1023 = vst.msk [vmem:[#allocation2 + $0x198] sm:$0xff] %vm971_vm2, %v958_v27  ;;  %v769_v44 = vadd.f32 %v1452_v36, %v698_v30  ;;  %v735_v45 = vadd.f32 %v1452_v36, %v664_v31  ;;  %v699_v48 = vmul.f32 %v1208_v42, %v1447_v34  ;;  %v803_v23 = vld [vmem:[%s1854_s4 + $0xc0] sm:$0xff]  ;;  %v806_v31 = vld [vmem:[%s1854_s4 + $0xd8] sm:$0xff] }
 0x106   :  { %989 = vst.msk [vmem:[#allocation2 + $0x88] sm:$0xff] %vm971_vm2, %v924_v28  ;;  %v665_v49 = vmul.f32 %v1447_v34, %v465_v43  ;;  %v865_v51 = vadd.f32 %v801_v29, %v737_v37  ;;  %v767_v52 = vadd.f32 %v1452_v36, %v696_v40  ;;  %v738_v53 = vadd.f32 %v1452_v36, %v667_v41  ;;  %v835_v30 = vld [vmem:[%s1854_s4 + $0x1c0] sm:$0xff]  ;;  %v838_v40 = vld [vmem:[%s1854_s4 + $0x1d8] sm:$0xff]  ;;  %v804_v41 = vld [vmem:[%s1854_s4 + $0xc8] sm:$0xff] }
 0x107   :  { %1021 = vst.msk [vmem:[#allocation2 + $0x188] sm:$0xff] %vm971_vm2, %v956_v35  ;;  %v697_v56 = vmul.f32 %v1447_v34, %v593_v50  ;;  %v897_v57 = vadd.f32 %v833_v38, %v769_v44  ;;  %v863_v58 = vadd.f32 %v799_v39, %v735_v45  ;;  %v770_v59 = vadd.f32 %v1452_v36, %v699_v48 }
 0x108   :  { %v736_v60 = vadd.f32 %v1452_v36, %v665_v49  ;;  %v929_v62 = vmax.f32 %v865_v51, 0.0  ;;  %v895_v63 = vadd.f32 %v831_v46, %v767_v52  ;;  %v866_v0 = vadd.f32 %v802_v47, %v738_v53  ;;  %v836_v47 = vld [vmem:[%s1854_s4 + $0x1c8] sm:$0xff] }
 0x109   :  { %v768_v1 = vadd.f32 %v1452_v36, %v697_v56  ;;  %v961_v2 = vmax.f32 %v897_v57, 0.0  ;;  %v927_v3 = vmax.f32 %v863_v58, 0.0  ;;  %v898_v4 = vadd.f32 %v834_v54, %v770_v59  ;;  %v1179_v6 = vpop.f32.mrb[24].mxu0  ;;  %v1211_v11 = vpop.f32.mrb[24].mxu1 }
 0x10a   :  { %v864_v5 = vadd.f32 %v800_v55, %v736_v60  ;;  %994 = vst.msk [vmem:[#allocation2 + $0xb0] sm:$0xff] %vm971_vm2, %v929_v62  ;;  %v959_v7 = vmax.f32 %v895_v63, 0.0  ;;  %v930_v8 = vmax.f32 %v866_v0, 0.0  ;;  %v670_v10 = vmul.f32 %v1179_v6, %v1447_v34  ;;  %v478_v12 = vpop.f32.mrb[25].mxu0  ;;  %v606_v18 = vpop.f32.mrb[25].mxu1 }
 0x10b   :  { %v896_v9 = vadd.f32 %v832_v61, %v768_v1  ;;  %1026 = vst.msk [vmem:[#allocation2 + $0x1b0] sm:$0xff] %vm971_vm2, %v961_v2  ;;  %992 = vst.msk [vmem:[#allocation2 + $0xa0] sm:$0xff] %vm971_vm2, %v927_v3  ;;  %v962_v13 = vmax.f32 %v898_v4, 0.0  ;;  %v702_v16 = vmul.f32 %v1211_v11, %v1447_v34  ;;  %v668_v17 = vmul.f32 %v1447_v34, %v478_v12  ;;  %v1180_v19 = vpop.f32.mrb[26].mxu0  ;;  %v1212_v26 = vpop.f32.mrb[26].mxu1  ;;  %v809_v1 = vld [vmem:[%s1854_s4 + $0xf0] sm:$0xff] }
 0x10c   :  { %v928_v14 = vmax.f32 %v864_v5, 0.0  ;;  %1024 = vst.msk [vmem:[#allocation2 + $0x1a0] sm:$0xff] %vm971_vm2, %v959_v7  ;;  %995 = vst.msk [vmem:[#allocation2 + $0xb8] sm:$0xff] %vm971_vm2, %v930_v8  ;;  %v741_v21 = vadd.f32 %v1452_v36, %v670_v10  ;;  %v700_v24 = vmul.f32 %v1447_v34, %v606_v18  ;;  %v671_v25 = vmul.f32 %v1180_v19, %v1447_v34  ;;  %v481_v27 = vpop.f32.mrb[27].mxu0  ;;  %v609_v35 = vpop.f32.mrb[27].mxu1  ;;  %v841_v8 = vld [vmem:[%s1854_s4 + $0x1f0] sm:$0xff] }
 0x10d   :  { %v960_v20 = vmax.f32 %v896_v9, 0.0  ;;  %1027 = vst.msk [vmem:[#allocation2 + $0x1b8] sm:$0xff] %vm971_vm2, %v962_v13  ;;  %v773_v28 = vadd.f32 %v1452_v36, %v702_v16  ;;  %v739_v29 = vadd.f32 %v1452_v36, %v668_v17  ;;  %v703_v32 = vmul.f32 %v1212_v26, %v1447_v34  ;;  %v807_v9 = vld [vmem:[%s1854_s4 + $0xe0] sm:$0xff]  ;;  %v810_v17 = vld [vmem:[%s1854_s4 + $0xf8] sm:$0xff] }
 0x10e   :  { %993 = vst.msk [vmem:[#allocation2 + $0xa8] sm:$0xff] %vm971_vm2, %v928_v14  ;;  %v669_v33 = vmul.f32 %v1447_v34, %v481_v27  ;;  %v869_v37 = vadd.f32 %v805_v15, %v741_v21  ;;  %v771_v38 = vadd.f32 %v1452_v36, %v700_v24  ;;  %v742_v39 = vadd.f32 %v1452_v36, %v671_v25  ;;  %v839_v16 = vld [vmem:[%s1854_s4 + $0x1e0] sm:$0xff]  ;;  %v842_v24 = vld [vmem:[%s1854_s4 + $0x1f8] sm:$0xff]  ;;  %v808_v25 = vld [vmem:[%s1854_s4 + $0xe8] sm:$0xff] }
 0x10f   :  { %1025 = vst.msk [vmem:[#allocation2 + $0x1a8] sm:$0xff] %vm971_vm2, %v960_v20  ;;  %v701_v42 = vmul.f32 %v1447_v34, %v609_v35  ;;  %v901_v43 = vadd.f32 %v837_v22, %v773_v28  ;;  %v867_v44 = vadd.f32 %v803_v23, %v739_v29  ;;  %v774_v45 = vadd.f32 %v1452_v36, %v703_v32 }
 0x110   :  { %v740_v46 = vadd.f32 %v1452_v36, %v669_v33  ;;  %v933_v48 = vmax.f32 %v869_v37, 0.0  ;;  %v899_v49 = vadd.f32 %v835_v30, %v771_v38  ;;  %v870_v50 = vadd.f32 %v806_v31, %v742_v39  ;;  %v840_v31 = vld [vmem:[%s1854_s4 + $0x1e8] sm:$0xff]  ;;  %s1256_s4 = scalar_lea.vmem %s1042_s20, 8192 }
 0x111   :  { %v772_v51 = vadd.f32 %v1452_v36, %v701_v42  ;;  %v965_v52 = vmax.f32 %v901_v43, 0.0  ;;  %v931_v53 = vmax.f32 %v867_v44, 0.0  ;;  %v902_v54 = vadd.f32 %v838_v40, %v774_v45  ;;  %v1183_v56 = vpop.f32.mrb[28].mxu0  ;;  %v1215_v61 = vpop.f32.mrb[28].mxu1  ;;  %p1257_p0 = scmp.ne.s32.totalorder %s1042_s20, %s1256_s4  ;;  %p1262_p2 = scmp.lt.s32.totalorder %s1256_s4, %s1256_s4 }
 0x112   :  { %v868_v55 = vadd.f32 %v804_v41, %v740_v46  ;;  %998 = vst.msk [vmem:[#allocation2 + $0xd0] sm:$0xff] %vm971_vm2, %v933_v48  ;;  %v963_v57 = vmax.f32 %v899_v49, 0.0  ;;  %v934_v58 = vmax.f32 %v870_v50, 0.0  ;;  %v674_v60 = vmul.f32 %v1183_v56, %v1447_v34  ;;  %v494_v62 = vpop.f32.mrb[29].mxu0  ;;  %v622_v4 = vpop.f32.mrb[29].mxu1 }
 0x113   :  { %v900_v59 = vadd.f32 %v836_v47, %v772_v51  ;;  %1030 = vst.msk [vmem:[#allocation2 + $0x1d0] sm:$0xff] %vm971_vm2, %v965_v52  ;;  %996 = vst.msk [vmem:[#allocation2 + $0xc0] sm:$0xff] %vm971_vm2, %v931_v53  ;;  %v966_v63 = vmax.f32 %v902_v54, 0.0  ;;  %v706_v2 = vmul.f32 %v1215_v61, %v1447_v34  ;;  %v672_v3 = vmul.f32 %v1447_v34, %v494_v62  ;;  %v1184_v5 = vpop.f32.mrb[30].mxu0  ;;  %v1216_v12 = vpop.f32.mrb[30].mxu1  ;;  %p1263_p3 = por %p1262_p2, %p1261_p1 }
 0x114   :  { %v932_v0 = vmax.f32 %v868_v55, 0.0  ;;  %1028 = vst.msk [vmem:[#allocation2 + $0x1c0] sm:$0xff] %vm971_vm2, %v963_v57  ;;  %999 = vst.msk [vmem:[#allocation2 + $0xd8] sm:$0xff] %vm971_vm2, %v934_v58  ;;  %v745_v7 = vadd.f32 %v1452_v36, %v674_v60  ;;  %v704_v10 = vmul.f32 %v1447_v34, %v622_v4  ;;  %v675_v11 = vmul.f32 %v1184_v5, %v1447_v34  ;;  %v497_v13 = vpop.f32.mrb[31].mxu0  ;;  %v625_v20 = vpop.f32.mrb[31].mxu1 }
 0x115   :  { %v964_v6 = vmax.f32 %v900_v59, 0.0  ;;  %1031 = vst.msk [vmem:[#allocation2 + $0x1d8] sm:$0xff] %vm971_vm2, %v966_v63  ;;  %v777_v14 = vadd.f32 %v1452_v36, %v706_v2  ;;  %v743_v15 = vadd.f32 %v1452_v36, %v672_v3  ;;  %v707_v18 = vmul.f32 %v1216_v12, %v1447_v34  ;;  %p1264_p4 = pnand %p1263_p3, %p1257_p0 }
 0x116   :  { %997 = vst.msk [vmem:[#allocation2 + $0xc8] sm:$0xff] %vm971_vm2, %v932_v0  ;;  %v673_v19 = vmul.f32 %v1447_v34, %v497_v13  ;;  %v873_v21 = vadd.f32 %v809_v1, %v745_v7  ;;  %v775_v22 = vadd.f32 %v1452_v36, %v704_v10  ;;  %v746_v23 = vadd.f32 %v1452_v36, %v675_v11 }
 0x117   :  { %1029 = vst.msk [vmem:[#allocation2 + $0x1c8] sm:$0xff] %vm971_vm2, %v964_v6  ;;  %v705_v26 = vmul.f32 %v1447_v34, %v625_v20  ;;  %v905_v27 = vadd.f32 %v841_v8, %v777_v14  ;;  %v871_v28 = vadd.f32 %v807_v9, %v743_v15  ;;  %v778_v29 = vadd.f32 %v1452_v36, %v707_v18 }
 0x118   :  { %v744_v30 = vadd.f32 %v1452_v36, %v673_v19  ;;  %v937_v32 = vmax.f32 %v873_v21, 0.0  ;;  %v903_v33 = vadd.f32 %v839_v16, %v775_v22  ;;  %v874_v35 = vadd.f32 %v810_v17, %v746_v23 }
 0x119   :  { %v776_v37 = vadd.f32 %v1452_v36, %v705_v26  ;;  %v969_v38 = vmax.f32 %v905_v27, 0.0  ;;  %v935_v39 = vmax.f32 %v871_v28, 0.0  ;;  %v906_v34 = vadd.f32 %v842_v24, %v778_v29 }
 0x11a   :  { %v872_v40 = vadd.f32 %v808_v25, %v744_v30  ;;  %1002 = vst.msk [vmem:[#allocation2 + $0xf0] sm:$0xff] %vm971_vm2, %v937_v32  ;;  %v967_v41 = vmax.f32 %v903_v33, 0.0  ;;  %v938_v42 = vmax.f32 %v874_v35, 0.0 }
 0x11b   :  { %v904_v43 = vadd.f32 %v840_v31, %v776_v37  ;;  %1034 = vst.msk [vmem:[#allocation2 + $0x1f0] sm:$0xff] %vm971_vm2, %v969_v38  ;;  %1000 = vst.msk [vmem:[#allocation2 + $0xe0] sm:$0xff] %vm971_vm2, %v935_v39  ;;  %v970_v44 = vmax.f32 %v906_v34, 0.0 }
 0x11c   :  { %v936_v45 = vmax.f32 %v872_v40, 0.0  ;;  %1032 = vst.msk [vmem:[#allocation2 + $0x1e0] sm:$0xff] %vm971_vm2, %v967_v41  ;;  %1003 = vst.msk [vmem:[#allocation2 + $0xf8] sm:$0xff] %vm971_vm2, %v938_v42 }
 0x11d   :  { %v968_v36 = vmax.f32 %v904_v43, 0.0  ;;  %1035 = vst.msk [vmem:[#allocation2 + $0x1f8] sm:$0xff] %vm971_vm2, %v970_v44 }
 0x11e   :  { %1001 = vst.msk [vmem:[#allocation2 + $0xe8] sm:$0xff] %vm971_vm2, %v936_v45 }
 0x11f   :  { %1033 = vst.msk [vmem:[#allocation2 + $0x1e8] sm:$0xff] %vm971_vm2, %v968_v36 }
 0x120   :  { %1267 = shalt.err (!%p1264_p4)
}
 0x121   :  { %s1268_s23 = scalar_lea.hbm %s1855_s5, 8192 }
 0x122   :  { %p1269_p5 = scmp.ne.s32.totalorder %s1855_s5, %s1268_s23  ;;  %p1272_p6 = scmp.lt.u32.totalorder %s1268_s23, %s1855_s5 }
 0x124   :  { %p1274_p7 = pnand %p1272_p6, %p1269_p5 }
 0x126   :  { %1277 = shalt.err (!%p1274_p7)
}
 0x127   :  { %s1281_s27 = smov 128   ;;  %s1282_s28 = smov 8  }
 0x128   :  { %1047 = dma.vmem_to_hbm [thread:$0]  %s1042_s20, 8192, %s1855_s5, [#allocation3], %s1281_s27, %s1281_s27, %s1282_s28  }
 0x129   :  { %1278 = dma.done.wait [#allocation3], 8192  }
 0x12a   :  { %1279 = vsyncadd [#allocation3], 4294959104 }
 0x12b   :  { %1051 = vsyncpa [#allocation3], 1 }

// kernel: block_forward.4
= control target key start
LH: loop header
LB: loop body
LE: loop exit
PB: predicated region body
PF: predicated region fallthrough
CT: control target
= control target key end

     0   :  { %s4669_s15 = smov 0   ;;  %s5862_s0 = inlined_call_operand.vmem [shape: bf16[2,360,8], index: 0, kind: input, shape index: {}]   ;;  %s5863_s1 = inlined_call_operand.vmem [shape: bf16[9,8,8], index: 1, kind: input, shape index: {}]   ;;  %s5864_s2 = inlined_call_operand.vmem [shape: f32[1,8], index: 2, kind: input, shape index: {}]   ;;  %s5865_s3 = inlined_call_operand.vmem [shape: f32[1,8], index: 3, kind: input, shape index: {}]   ;;  %s5866_s4 = inlined_call_operand.vmem [shape: bf16[2,288,8], index: 4, kind: output, shape index: {}]  }
   0x1 LB: > { %s3513_s16 = sadd.s32 4294967295, %s4642_s15   ;;  %p3517_p0 = scmp.ge.s32.totalorder %s4642_s15, 1  ;;  %s4642_s15 = sphi %s4669_s15, %s14_s15  }
   0x2   : > { %p162_p1 = scmp.lt.s32.totalorder %s4642_s15, 3 }
   0x4   : > { %p163_p2 = pnand %p3517_p0, %p162_p1 }
   0x6   : > { %166 = sbr.rel (%p163_p2) target bundleno = 570 (0x23a), region = 36 }
   0xd   : > { %vm429_vm0 = vcmask 1043456   ;;  %v4680_v0 = vld [vmem:[%s5863_s1 + $0x10] sm:$0xf]  ;;  %v3520_v1 = vld [vmem:[%s5863_s1 + $0x4] sm:$0xf]  ;;  %p188_p3 = scmp.lt.s32.totalorder %s3513_s16, 1 }
   0xe   : > { %5927 = vst [vmem:[#allocation2_spill] sm:$0xff] %v4680_v0  ;;  %4596 = vmatprep.subr.msk.bf16.mxu0 %vm429_vm0, %v4680_v0  ;;  %4592 = vmatprep.subr.msk.bf16.mxu1 %vm429_vm0, %v3520_v1  ;;  %v4690_v2 = vsel %vm429_vm0, %v4680_v0, 0  ;;  %v431_v3 = vsel %vm429_vm0, %v3520_v1, 0  ;;  %v3635_v4 = vld [vmem:[%s5863_s1 + $0x14] sm:$0xf]  ;;  %vm336_vm1 = vcmask 1046528  }
   0xf   : > { %5928 = vst [vmem:[#allocation3_spill] sm:$0xff] %v4690_v2  ;;  %4113 = vmatpush3.bf16.msra.mxu0 %v4690_v2  ;;  %3961 = vmatpush3.bf16.msra.mxu1 %v431_v3  ;;  %s6015_s16 = smov (!%p188_p3, %s3513_s16), 1  ;;  %v240_v5 = vld [vmem:[%s5863_s1] sm:$0xf]  ;;  %vm374_vm2 = vcmask 64512   ;;  %vm1593_vm3 = vcmask 1045504  }
  0x10   : > { %4598 = vmatprep.subr.msk.bf16.mxu0 %vm429_vm0, %v3635_v4  ;;  %4593 = vmatprep.subr.msk.bf16.mxu1 %vm429_vm0, %v240_v5  ;;  %s4602_s25 = smul.u32 180, %s6015_s16  ;;  %v2034_v8 = vsel %vm429_vm0, %v3635_v4, 0  ;;  %v814_v10 = vsel %vm429_vm0, %v240_v5, 0  ;;  %v4741_v22 = vld [vmem:[%s5863_s1 + $0x18] sm:$0xf]  ;;  %vm2499_vm7 = vcmask 1044480  }
  0x11   : > { %v4757_v29 = vld [vmem:[%s5863_s1 + $0x8] sm:$0xf]  ;;  %vm1903_vm4 = vsmask.f32 5376  ;;  %vm610_vm5 = vsmask.f32 7424 }
  0x12   : > { %s4708_s28 = scalar_lea.vmem %s5862_s0, %s4602_s25  ;;  %vm995_vm6 = vsmask.f32 6400  ;;  %vm2809_vm8 = vsmask.f32 4352  ;;  %s4603_s19 = smul.u32 144, %s6015_s16  ;;  %vm3421_vm9 = vcmask 60416  }
  0x13   : > { %v4711_v6 = vld [vmem:[%s4708_s28 + $0x8] sm:$0xff]   ;;  %v4714_v7 = vld [vmem:[%s4708_s28 + $0x10] sm:$0xff]   ;;  %v4718_v9 = vld [vmem:[%s4708_s28 + $0x18] sm:$0xff]  }
  0x14   : > { %5929 = vst [vmem:[#allocation4_spill] sm:$0xff] %v4718_v9  ;;  %v337_v11 = vrot.slane %v4711_v6, 1  ;;  %v338_v12 = vrot.slane %v4714_v7, 1  ;;  %v1594_v13 = vrot.slane %v4714_v7, 2  ;;  %v4725_v14 = vld [vmem:[%s4708_s28 + $0x20] sm:$0xff]   ;;  %v1595_v15 = vrot.slane %v4718_v9, 2  ;;  %s5708_s22 = scalar_lea.vmem %s5866_s4, %s4603_s19 }
  0x15   : > { %5930 = vst [vmem:[#allocation5_spill] sm:$0xff] %v4725_v14  ;;  %v340_v16 = vrot.slane %v4718_v9, 1  ;;  %v1597_v18 = vrot.slane %v4725_v14, 2  ;;  %v342_v19 = vrot.slane %v4725_v14, 1  ;;  %v4733_v20 = vld [vmem:[%s4708_s28 + $0x28] sm:$0xff]   ;;  %v4736_v21 = vld [vmem:[%s4708_s28 + $0x30] sm:$0xff]  }
  0x16   : > { %v339_v17 = vsel %vm336_vm1, %v337_v11, %v338_v12  ;;  %5931 = vst [vmem:[#allocation6_spill] sm:$0xff] %v4733_v20  ;;  %5932 = vst [vmem:[#allocation7_spill] sm:$0xff] %v4736_v21  ;;  %v1596_v23 = vsel %vm1593_vm3, %v1594_v13, %v1595_v15  ;;  %v1599_v27 = vrot.slane %v4733_v20, 2  ;;  %v4752_v28 = vld [vmem:[%s4708_s28 + $0x38] sm:$0xff]   ;;  %v344_v30 = vrot.slane %v4733_v20, 1  ;;  %v4775_v38 = vld [vmem:[%s4708_s28 + $0x40] sm:$0xff]  }
  0x17   : > { %3962 = vmatprep.mubr.msk.bf16.mxu1 %vm374_vm2, %v339_v17  ;;  %v341_v24 = vsel %vm336_vm1, %v338_v12, %v340_v16  ;;  %4114 = vmatprep.mubr.msk.bf16.mxu0 %vm374_vm2, %v1596_v23  ;;  %v1598_v25 = vsel %vm1593_vm3, %v1595_v15, %v1597_v18  ;;  %v343_v26 = vsel %vm336_vm1, %v340_v16, %v342_v19  ;;  %v1601_v32 = vrot.slane %v4736_v21, 2  ;;  %v4779_v40 = vld [vmem:[%s4708_s28 + $0x48] sm:$0xff]   ;;  %v4791_v46 = vld [vmem:[%s4708_s28 + $0x50] sm:$0xff]   ;;  %v4796_v49 = vld [vmem:[%s4708_s28 + $0x58] sm:$0xff]  }
  0x18   : > { %3963 = vmatmul.mubr.msk.bf16.vlgmr.msra.gmra.mrb[0].mxu1 %vm374_vm2, %v341_v24  ;;  %5933 = vst [vmem:[#allocation8_spill] sm:$0xff] %v4752_v28  ;;  %4115 = vmatmul.mubr.msk.bf16.vlgmr.msra.gmra.mrb[0].mxu0 %vm374_vm2, %v1598_v25  ;;  %v1600_v31 = vsel %vm1593_vm3, %v1597_v18, %v1599_v27  ;;  %v346_v33 = vrot.slane %v4736_v21, 1  ;;  %v1603_v34 = vrot.slane %v4752_v28, 2  ;;  %v345_v35 = vsel %vm336_vm1, %v342_v19, %v344_v30  ;;  %v4808_v55 = vld [vmem:[%s4708_s28 + $0x90] sm:$0xff]   ;;  %v4823_v60 = vld [vmem:[%s4708_s28 + $0x98] sm:$0xf] }
  0x19   : > { %3966 = vmatprep.mubr.msk.bf16.mxu1 %vm374_vm2, %v343_v26  ;;  %4151 = vmatpush3.bf16.msra.mxu0 %v2034_v8  ;;  %v1602_v36 = vsel %vm1593_vm3, %v1599_v27, %v1601_v32  ;;  %5934 = vst [vmem:[#allocation9_spill] sm:$0xff] %v4775_v38  ;;  %5935 = vst [vmem:[#allocation10_spill] sm:$0xff] %v4779_v40  ;;  %v348_v41 = vrot.slane %v4752_v28, 1  ;;  %v1605_v42 = vrot.slane %v4775_v38, 2  ;;  %v350_v43 = vrot.slane %v4775_v38, 1  ;;  %v4828_v63 = vld [vmem:[%s4708_s28 + $0x60] sm:$0xff]  }
  0x1a   : > { %3999 = vmatpush3.bf16.msra.mxu1 %v814_v10  ;;  %4118 = vmatprep.mubr.msk.bf16.mxu0 %vm374_vm2, %v1600_v31  ;;  %v347_v37 = vsel %vm336_vm1, %v344_v30, %v346_v33  ;;  %v1604_v39 = vsel %vm1593_vm3, %v1601_v32, %v1603_v34  ;;  %v1607_v44 = vrot.slane %v4779_v40, 2  ;;  %5936 = vst [vmem:[#allocation11_spill] sm:$0xff] %v4791_v46  ;;  %5937 = vst [vmem:[#allocation12_spill] sm:$0xff] %v4796_v49  ;;  %v4868_v30 = vld [vmem:[%s4708_s28 + $0x68] sm:$0xff]  }
  0x1b   : > { %4599 = vmatprep.subr.msk.bf16.mxu0 %vm429_vm0, %v4741_v22  ;;  %4594 = vmatprep.subr.msk.bf16.mxu1 %vm429_vm0, %v4757_v29  ;;  %v349_v45 = vsel %vm336_vm1, %v346_v33, %v348_v41  ;;  %v1606_v47 = vsel %vm1593_vm3, %v1603_v34, %v1605_v42  ;;  %v351_v48 = vsel %vm336_vm1, %v348_v41, %v350_v43  ;;  %v352_v51 = vrot.slane %v4779_v40, 1 }
  0x1c   : > { %v1608_v50 = vsel %vm1593_vm3, %v1605_v42, %v1607_v44  ;;  %v1609_v52 = vrot.slane %v4791_v46, 2  ;;  %v354_v53 = vrot.slane %v4791_v46, 1  ;;  %v1611_v54 = vrot.slane %v4796_v49, 2  ;;  %5938 = vst [vmem:[#allocation13_spill] sm:$0xff] %v4808_v55  ;;  %5939 = vst [vmem:[#allocation14_spill] sm:$0xff] %v4828_v63 }
  0x1d   : > { %v4811_v56 = vshll.u32 %v4714_v7, 16  ;;  %v4814_v57 = vshrl.u32 %v4714_v7, 16  ;;  %v4817_v58 = vshll.u32 %v4718_v9, 16  ;;  %v4820_v59 = vshrl.u32 %v4718_v9, 16  ;;  %5941 = vst [vmem:[#allocation16_spill] sm:$0xff] %v4868_v30 }
  0x1e   : > { %v353_v61 = vsel %vm336_vm1, %v350_v43, %v352_v51  ;;  %v1610_v62 = vsel %vm1593_vm3, %v1607_v44, %v1609_v52  ;;  %v355_v1 = vsel %vm336_vm1, %v352_v51, %v354_v53  ;;  %v1612_v3 = vsel %vm1593_vm3, %v1609_v52, %v1611_v54  ;;  %v4901_v51 = vld [vmem:[%s4708_s28 + $0x78] sm:$0xff]  }
  0x1f   : > { %v370_v4 = vrot.slane %v4808_v55, 1  ;;  %v4835_v5 = vcombine.low %v4823_v60, %v4823_v60  ;;  %v1904_v7 = vrot.slane %v4814_v57, 2  ;;  %v1905_v8 = vrot.slane %v4811_v56, 3  ;;  %5945 = vst [vmem:[#allocation20_spill] sm:$0xff] %v4901_v51 }
  0x20   : > { %3967 = vmatmul.mubr.msk.bf16.gmra.mrb[4].mxu1 %vm374_vm2, %v345_v35  ;;  %4119 = vmatmul.mubr.msk.bf16.gmra.mrb[4].mxu0 %vm374_vm2, %v1602_v36  ;;  %v1907_v10 = vrot.slane %v4820_v59, 2  ;;  %v1908_v11 = vrot.slane %v4817_v58, 3  ;;  %v356_v13 = vrot.slane %v4796_v49, 1  ;;  %v5867_v15 = vrot.slane %v4828_v63, 2  ;;  %v4877_v35 = vld [vmem:[%s4708_s28 + $0x70] sm:$0xff]  }
  0x21   : > { %3970 = vmatprep.mubr.msk.bf16.mxu1 %vm374_vm2, %v347_v37  ;;  %4122 = vmatprep.mubr.msk.bf16.mxu0 %vm374_vm2, %v1604_v39  ;;  %v372_v12 = vrot.slane %v4835_v5, 1  ;;  %v358_v16 = vrot.slane %v4828_v63, 1  ;;  %v4850_v17 = vshll.u32 %v4725_v14, 16  ;;  %v4853_v18 = vshrl.u32 %v4725_v14, 16  ;;  %5942 = vst [vmem:[#allocation17_spill] sm:$0xff] %v4877_v35 }
  0x22   : > { %v1906_v23 = vor.u32 %v1905_v8, %v1904_v7  ;;  %v1909_v24 = vor.u32 %v1908_v11, %v1907_v10  ;;  %v4861_v25 = vshll.u32 %v4733_v20, 16  ;;  %v4864_v26 = vshrl.u32 %v4733_v20, 16 }
  0x23   : > { %v4858_v19 = vsel %vm336_vm1, %v370_v4, %v372_v12  ;;  %v357_v27 = vsel %vm336_vm1, %v354_v53, %v356_v13  ;;  %v1614_v31 = vsel %vm1593_vm3, %v1611_v54, %v5867_v15  ;;  %v359_v32 = vsel %vm336_vm1, %v356_v13, %v358_v16  ;;  %v4925_v12 = vld [vmem:[%s5863_s1 + $0x1c] sm:$0xf] }
  0x24   : > { %5940 = vst [vmem:[#allocation15_spill] sm:$0xff] %v4861_v25  ;;  %v1911_v33 = vrot.slane %v4853_v18, 2  ;;  %v1912_v34 = vrot.slane %v4850_v17, 3  ;;  %v1910_v36 = vsel %vm1903_vm4, %v1906_v23, %v1909_v24  ;;  %v1915_v37 = vrot.slane %v4864_v26, 2 }
  0x25   : > { %v1916_v39 = vrot.slane %v4861_v25, 3  ;;  %v360_v41 = vrot.slane %v4868_v30, 1  ;;  %v4887_v42 = vshll.u32 %v4736_v21, 16  ;;  %v4890_v43 = vshrl.u32 %v4736_v21, 16 }
  0x26   : > { %v1913_v44 = vor.u32 %v1912_v34, %v1911_v33  ;;  %v364_v11 = vrot.slane %v4901_v51, 1  ;;  %v4935_v23 = vshrl.u32 %v4775_v38, 16  ;;  %v4949_v33 = vld [vmem:[%s4708_s28 + $0x88] sm:$0xff]   ;;  %v4994_v15 = vshrl.u32 %v4808_v55, 16 }
  0x27   : > { %v361_v52 = vsel %vm336_vm1, %v358_v16, %v360_v41  ;;  %v1919_v53 = vrot.slane %v4890_v43, 2  ;;  %v1920_v54 = vrot.slane %v4887_v42, 3  ;;  %v4932_v16 = vshll.u32 %v4775_v38, 16  ;;  %5948 = vst [vmem:[#allocation23_spill] sm:$0xff] %v4949_v33  ;;  %v236_v38 = vld [vmem:[%s4708_s28 + $0x9c] sm:$0xf] }
  0x28   : > { %3971 = vmatmul.mubr.msk.bf16.gmra.mrb[8].mxu1 %vm374_vm2, %v349_v45  ;;  %4123 = vmatmul.mubr.msk.bf16.gmra.mrb[8].mxu0 %vm374_vm2, %v1606_v47  ;;  %v362_v45 = vrot.slane %v4877_v35, 1  ;;  %v1917_v47 = vor.u32 %v1916_v39, %v1915_v37  ;;  %v1927_v37 = vrot.slane %v4935_v23, 2  ;;  %v5075_v14 = vshll.u32 %v4877_v35, 16 }
  0x29   : > { %3974 = vmatprep.mubr.msk.bf16.mxu1 %vm374_vm2, %v351_v48  ;;  %4126 = vmatprep.mubr.msk.bf16.mxu0 %vm374_vm2, %v1608_v50  ;;  %v4895_v48 = vshll.u32 %v4752_v28, 16  ;;  %v4898_v50 = vshrl.u32 %v4752_v28, 16  ;;  %5947 = vst [vmem:[#allocation22_spill] sm:$0xff] %v4932_v16  ;;  %v1928_v39 = vrot.slane %v4932_v16, 3  ;;  %v5012_v28 = vshll.u32 %v4828_v63, 16 }
  0x2a   : > { %v4916_v7 = vsel %vm1903_vm4, %v1913_v44, %v1917_v47 }
  0x2b   : > { %5943 = vst [vmem:[#allocation18_spill] sm:$0xff] %v4895_v48  ;;  %5944 = vst [vmem:[#allocation19_spill] sm:$0xff] %v4898_v50  ;;  %v1923_v8 = vrot.slane %v4898_v50, 2  ;;  %v1924_v10 = vrot.slane %v4895_v48, 3  ;;  %v1944_v20 = vrot.slane %v5012_v28, 3 }
  0x2c   : > { %5950 = vst [vmem:[#allocation25_spill] sm:$0xff] %v5012_v28 }
  0x30   : > { %3975 = vmatmul.mubr.msk.bf16.gmra.mrb[12].mxu1 %vm374_vm2, %v353_v61  ;;  %4127 = vmatmul.mubr.msk.bf16.gmra.mrb[12].mxu0 %vm374_vm2, %v1610_v62  ;;  %v4907_v61 = vld [vmem:[%s4708_s28 + $0x80] sm:$0xff]   ;;  %v4910_v62 = vsel %vm1903_vm4, %v1909_v24, %v1913_v44  ;;  %v4940_v24 = vshll.u32 %v4779_v40, 16 }
  0x31   : > { %3978 = vmatprep.mubr.msk.bf16.mxu1 %vm374_vm2, %v355_v1  ;;  %4130 = vmatprep.mubr.msk.bf16.mxu0 %vm374_vm2, %v1612_v3  ;;  %5946 = vst [vmem:[#allocation21_spill] sm:$0xff] %v4907_v61  ;;  %v363_v1 = vsel %vm336_vm1, %v360_v41, %v362_v45  ;;  %v2282_v3 = vsel %vm429_vm0, %v4741_v22, 0  ;;  %v1921_v22 = vor.u32 %v1920_v54, %v1919_v53  ;;  %v366_v13 = vrot.slane %v4907_v61, 1 }
  0x32   : > { %v1932_v44 = vrot.slane %v4940_v24, 3  ;;  %v614_v54 = vshll.u32 %v4711_v6, 16 }
  0x33   : > { %v4952_v34 = vsel %vm1903_vm4, %v1917_v47, %v1921_v22  ;;  %v368_v47 = vrot.slane %v4949_v33, 1 }
  0x38   : > { %3979 = vmatmul.mubr.msk.bf16.gmra.mrb[16].mxu1 %vm374_vm2, %v357_v27  ;;  %4131 = vmatmul.mubr.msk.bf16.gmra.mrb[16].mxu0 %vm374_vm2, %v1614_v31  ;;  %v4943_v27 = vshrl.u32 %v4779_v40, 16  ;;  %v1925_v31 = vor.u32 %v1924_v10, %v1923_v8 }
  0x39   : > { %3982 = vmatprep.mubr.msk.bf16.mxu1 %vm374_vm2, %v359_v32  ;;  %4152 = vmatprep.mubr.msk.bf16.mxu0 %vm374_vm2, %v1910_v36  ;;  %v365_v32 = vsel %vm336_vm1, %v362_v45, %v364_v11  ;;  %v367_v36 = vsel %vm336_vm1, %v364_v11, %v366_v13  ;;  %v4963_v45 = vshrl.u32 %v4791_v46, 16  ;;  %v4979_v11 = vshll.u32 %v4796_v49, 16 }
  0x3a   : > { %v1931_v41 = vrot.slane %v4943_v27, 2  ;;  %v4966_v53 = vsel %vm1903_vm4, %v1921_v22, %v1925_v31  ;;  %v4982_v22 = vshrl.u32 %v4796_v49, 16 }
  0x3b   : > { %v1935_v8 = vrot.slane %v4963_v45, 2  ;;  %5949 = vst [vmem:[#allocation24_spill] sm:$0xff] %v4979_v11 }
  0x3c   : > { %v1939_v40 = vrot.slane %v4982_v22, 2 }
  0x40   : > { %3983 = vmatmul.mubr.msk.bf16.gmra.mrb[20].mxu1 %vm374_vm2, %v361_v52  ;;  %4153 = vmatmul.mubr.msk.bf16.vlgmr.msra.gmra.mrb[0].mxu0 %vm374_vm2, %v4910_v62  ;;  %v4960_v52 = vshll.u32 %v4791_v46, 16 }
  0x41   : > { %3986 = vmatprep.mubr.msk.bf16.mxu1 %vm374_vm2, %v363_v1  ;;  %4189 = vmatpush3.bf16.msra.mxu0 %v2282_v3  ;;  %v1929_v1 = vor.u32 %v1928_v39, %v1927_v37  ;;  %v1933_v3 = vor.u32 %v1932_v44, %v1931_v41  ;;  %v612_v37 = vshrl.u32 %v4711_v6, 16  ;;  %v616_v39 = vrot.slane %v614_v54, 1 }
  0x42   : > { %4156 = vmatprep.mubr.msk.bf16.mxu0 %vm374_vm2, %v4916_v7  ;;  %4600 = vmatprep.subr.msk.bf16.mxu0 %vm429_vm0, %v4925_v12  ;;  %v1936_v10 = vrot.slane %v4960_v52, 3  ;;  %v371_v41 = vsel %vm336_vm1, %v368_v47, %v370_v4  ;;  %v621_v44 = vrot.slane %v4811_v56, 1  ;;  %v5876_v6 = vshll.u32 %v4835_v5, 16 }
  0x43   : > { %v4998_v49 = vsel %vm1903_vm4, %v1925_v31, %v1929_v1  ;;  %v1940_v4 = vrot.slane %v4979_v11, 3  ;;  %v617_v31 = vor.u32 %v616_v39, %v612_v37 }
  0x44   : > { %v1937_v46 = vor.u32 %v1936_v10, %v1935_v8  ;;  %v997_v8 = vrot.slane %v614_v54, 2  ;;  %v5020_v10 = vshrl.u32 %v4828_v63, 16  ;;  %v5030_v54 = vshrl.u32 %v4868_v30, 16 }
  0x45   : > { %v1941_v63 = vor.u32 %v1940_v4, %v1939_v40 }
  0x46   : > { %5951 = vst [vmem:[#allocation26_spill] sm:$0xff] %v5020_v10 }
  0x47   : > { %v5054_v4 = vsel %vm1903_vm4, %v1937_v46, %v1941_v63 }
  0x48   : > { %3987 = vmatmul.mubr.msk.bf16.gmra.mrb[24].mxu1 %vm374_vm2, %v365_v32  ;;  %4157 = vmatmul.mubr.msk.bf16.gmra.mrb[4].mxu0 %vm374_vm2, %v4952_v34  ;;  %v4985_v32 = vshll.u32 %v4808_v55, 16  ;;  %v996_v55 = vrot.slane %v612_v37, 1  ;;  %v1000_v37 = vrot.slane %v4811_v56, 2  ;;  %v1943_v56 = vrot.slane %v5020_v10, 2 }
  0x49   : > { %3990 = vmatprep.mubr.msk.bf16.mxu1 %vm374_vm2, %v367_v36  ;;  %4160 = vmatprep.mubr.msk.bf16.mxu0 %vm374_vm2, %v4966_v53  ;;  %v369_v36 = vsel %vm336_vm1, %v366_v13, %v368_v47  ;;  %v5001_v13 = vsel %vm1903_vm4, %v1929_v1, %v1933_v3  ;;  %v757_v1 = vrot.slane %v5876_v6, 1  ;;  %v5036_v6 = vcombine.low %v4823_v60, %v236_v38  ;;  %v238_v60 = vld [vmem:[%s4708_s28 + $0xa4] sm:$0xf] }
  0x4a   : > { %v5875_v2 = vrot.slane %v4985_v32, 1  ;;  %v1947_v38 = vrot.slane %v5030_v54, 2 }
  0x4c   : > { %v753_v47 = vor.u32 %v4994_v15, %v5875_v2  ;;  %v5023_v2 = vshll.u32 %v4868_v30, 16 }
  0x4e   : > { %v5033_v39 = vsel %vm610_vm5, %v753_v47, %v757_v1  ;;  %v5047_v47 = vsel %vm1903_vm4, %v1933_v3, %v1937_v46  ;;  %v1948_v40 = vrot.slane %v5023_v2, 3  ;;  %v629_v1 = vrot.slane %v4817_v58, 1 }
  0x4f   : > { %v625_v3 = vor.u32 %v4814_v57, %v621_v44  ;;  %v1945_v46 = vor.u32 %v1944_v20, %v1943_v56  ;;  %v5089_v20 = vshrl.u32 %v4901_v51, 16 }
  0x50   : > { %3991 = vmatmul.mubr.msk.bf16.gmra.mrb[28].mxu1 %vm374_vm2, %v369_v36  ;;  %4161 = vmatmul.mubr.msk.bf16.gmra.mrb[8].mxu0 %vm374_vm2, %v4998_v49  ;;  %v999_v36 = vrot.slane %v4814_v57, 1  ;;  %v1949_v57 = vor.u32 %v1948_v40, %v1947_v38  ;;  %v1128_v38 = vsel %vm429_vm0, %v4757_v29, 0 }
  0x51   : > { %3994 = vmatprep.mubr.msk.bf16.mxu1 %vm374_vm2, %v371_v41  ;;  %4164 = vmatprep.mubr.msk.bf16.mxu0 %vm374_vm2, %v5001_v13  ;;  %v998_v41 = vor.u32 %v997_v8, %v996_v55  ;;  %v622_v55 = vsel %vm610_vm5, %v617_v31, %v621_v44  ;;  %v5058_v8 = vshrl.u32 %v5036_v6, 16  ;;  %v637_v31 = vrot.slane %v4850_v17, 1 }
  0x52   : > { %v5038_v21 = vor.u32 %v1000_v37, %v999_v36  ;;  %v5061_v36 = vshll.u32 %v5036_v6, 16  ;;  %v5068_v37 = vld [vmem:[%s4708_s28 + $0xa0] sm:$0xf]  ;;  %v5086_v44 = vshll.u32 %v4901_v51, 16  ;;  %v5111_v29 = vsel %vm1903_vm4, %v1945_v46, %v1949_v57 }
  0x53   : > { %5954 = vst [vmem:[#allocation29_spill] sm:$0xff] %v5058_v8  ;;  %v5078_v9 = vcombine.low %v5068_v37, %v238_v60  ;;  %v1971_v56 = vrot.slane %v5058_v8, 2  ;;  %5957 = vst [vmem:[#allocation32_spill] sm:$0xff] %v5111_v29 }
  0x54   : > { %5952 = vst [vmem:[#allocation27_spill] sm:$0xff] %v5038_v21  ;;  %v5044_v30 = vsel %vm995_vm6, %v998_v41, %v5038_v21  ;;  %5955 = vst [vmem:[#allocation30_spill] sm:$0xff] %v5061_v36  ;;  %v633_v41 = vor.u32 %v4820_v59, %v629_v1  ;;  %v630_v21 = vsel %vm610_vm5, %v625_v3, %v629_v1  ;;  %v1952_v1 = vrot.slane %v5075_v14, 3 }
  0x55   : > { %5953 = vst [vmem:[#allocation28_spill] sm:$0xff] %v5044_v30  ;;  %5956 = vst [vmem:[#allocation31_spill] sm:$0xff] %v5078_v9  ;;  %v5897_v60 = vshrl.u32 %v5078_v9, 16  ;;  %v5898_v0 = vshll.u32 %v5078_v9, 16  ;;  %v1956_v3 = vrot.slane %v5086_v44, 3 }
  0x56   : > { %v638_v40 = vsel %vm610_vm5, %v633_v41, %v637_v31  ;;  %v1955_v41 = vrot.slane %v5089_v20, 2 }
  0x57   : > { %v2260_v51 = vrot.slane %v5897_v60, 2  ;;  %v2263_v8 = vrot.slane %v5898_v0, 3 }
  0x58   : > { %3995 = vmatmul.mubr.msk.bf16.gmra.mrb[32].mxu1 %vm374_vm2, %v4858_v19  ;;  %4165 = vmatmul.mubr.msk.bf16.gmra.mrb[12].mxu0 %vm374_vm2, %v5047_v47  ;;  %v5083_v19 = vshrl.u32 %v4877_v35, 16  ;;  %v645_v35 = vrot.slane %v4861_v25, 1 }
  0x59   : > { %4000 = vmatprep.mubr.msk.bf16.mxu1 %vm374_vm2, %v622_v55  ;;  %4168 = vmatprep.mubr.msk.bf16.mxu0 %vm374_vm2, %v5054_v4  ;;  %v1972_v55 = vrot.slane %v5061_v36, 3  ;;  %v5105_v36 = vsel %vm1903_vm4, %v1941_v63, %v1945_v46  ;;  %v5116_v60 = vor.u32 %v2263_v8, %v2260_v51  ;;  %v5122_v63 = vld [vmem:[%s5863_s1 + $0xc] sm:$0xf]  ;;  %v641_v46 = vor.u32 %v4853_v18, %v637_v31 }
  0x5a   : > { %v1951_v30 = vrot.slane %v5083_v19, 2  ;;  %5959 = vst [vmem:[#allocation34_spill] sm:$0xff] %v5122_v63  ;;  %v649_v0 = vor.u32 %v4864_v26, %v645_v35  ;;  %v653_v8 = vrot.slane %v4887_v42, 1  ;;  %v1957_v31 = vor.u32 %v1956_v3, %v1955_v41 }
  0x5b   : > { %v5114_v25 = vor.u32 %v1972_v55, %v1971_v56  ;;  %5958 = vst [vmem:[#allocation33_spill] sm:$0xff] %v5116_v60  ;;  %v5138_v56 = vshll.u32 %v4907_v61, 16  ;;  %v5141_v55 = vshrl.u32 %v4907_v61, 16 }
  0x5d   : > { %v5132_v51 = vsel %vm1903_vm4, %v5114_v25, %v5116_v60  ;;  %5961 = vst [vmem:[#allocation36_spill] sm:$0xff] %v5138_v56  ;;  %5962 = vst [vmem:[#allocation37_spill] sm:$0xff] %v5141_v55  ;;  %v5147_v60 = vshrl.u32 %v4949_v33, 16  ;;  %v1959_v61 = vrot.slane %v5141_v55, 2  ;;  %v1960_v3 = vrot.slane %v5138_v56, 3 }
  0x5e   : > { %5960 = vst [vmem:[#allocation35_spill] sm:$0xff] %v5132_v51 }
  0x5f   : > { %v1963_v51 = vrot.slane %v5147_v60, 2 }
  0x60   : > { %4001 = vmatmul.mubr.msk.bf16.vlgmr.msra.gmra.mrb[0].mxu1 %vm374_vm2, %v630_v21  ;;  %4169 = vmatmul.mubr.msk.bf16.gmra.mrb[16].mxu0 %vm374_vm2, %v5105_v36  ;;  %v1953_v21 = vor.u32 %v1952_v1, %v1951_v30  ;;  %v646_v30 = vsel %vm610_vm5, %v641_v46, %v645_v35  ;;  %v654_v1 = vsel %vm610_vm5, %v649_v0, %v653_v8  ;;  %v1067_v46 = vshrl.u32 %v4835_v5, 16 }
  0x61   : > { %4004 = vmatprep.mubr.msk.bf16.mxu1 %vm374_vm2, %v638_v40  ;;  %4172 = vmatprep.mubr.msk.bf16.mxu0 %vm374_vm2, %v5111_v29  ;;  %v5144_v40 = vshll.u32 %v4949_v33, 16  ;;  %v661_v33 = vrot.slane %v4895_v48, 1  ;;  %v657_v35 = vor.u32 %v4890_v43, %v653_v8 }
  0x62   : > { %4037 = vmatpush3.bf16.msra.mxu1 %v1128_v38  ;;  %v5153_v38 = vsel %vm1903_vm4, %v1949_v57, %v1953_v21  ;;  %v5159_v41 = vsel %vm1903_vm4, %v1953_v21, %v1957_v31  ;;  %v669_v57 = vrot.slane %v4932_v16, 1  ;;  %v5964_v21 = vshll.u32 %v4835_v5, 16 }
  0x63   : > { %4595 = vmatprep.subr.msk.bf16.mxu1 %vm429_vm0, %v5122_v63  ;;  %5963 = vst [vmem:[#allocation38_spill] sm:$0xff] %v5153_v38  ;;  %v1964_v29 = vrot.slane %v5144_v40, 3  ;;  %v665_v0 = vor.u32 %v4898_v50, %v661_v33  ;;  %v5178_v63 = vrot.slane %v1067_v46, 1  ;;  %v1967_v5 = vrot.slane %v4994_v15, 2 }
  0x64   : > { %v5174_v48 = vrot.slane %v5964_v21, 2  ;;  %v1968_v21 = vrot.slane %v4985_v32, 3 }
  0x65   : > { %v1965_v8 = vor.u32 %v1964_v29, %v1963_v51  ;;  %v673_v51 = vor.u32 %v4935_v23, %v669_v57 }
  0x68   : > { %4005 = vmatmul.mubr.msk.bf16.gmra.mrb[4].mxu1 %vm374_vm2, %v646_v30  ;;  %4173 = vmatmul.mubr.msk.bf16.gmra.mrb[20].mxu0 %vm374_vm2, %v5153_v38  ;;  %v1961_v30 = vor.u32 %v1960_v3, %v1959_v61  ;;  %v662_v38 = vsel %vm610_vm5, %v657_v35, %v661_v33  ;;  %v5191_v61 = vcombine.low %v5068_v37, %v5068_v37  ;;  %v677_v33 = vrot.slane %v4940_v24, 1 }
  0x69   : > { %4008 = vmatprep.mubr.msk.bf16.mxu1 %vm374_vm2, %v654_v1  ;;  %4176 = vmatprep.mubr.msk.bf16.mxu0 %vm374_vm2, %v5159_v41  ;;  %v670_v1 = vsel %vm610_vm5, %v665_v0, %v669_v57  ;;  %v1969_v37 = vor.u32 %v1968_v21, %v1967_v5  ;;  %v685_v3 = vrot.slane %v4960_v52, 1  ;;  %v693_v21 = vrot.slane %v4979_v11, 1 }
  0x6a   : > { %v5185_v50 = vsel %vm1903_vm4, %v1957_v31, %v1961_v30  ;;  %v5194_v29 = vsel %vm1903_vm4, %v1961_v30, %v1965_v8  ;;  %v681_v31 = vor.u32 %v4943_v27, %v677_v33  ;;  %v5914_v35 = vshrl.u32 %v5191_v61, 16 }
  0x6b   : > { %v5913_v0 = vshll.u32 %v5191_v61, 16  ;;  %v5210_v46 = vsel %vm1903_vm4, %v1965_v8, %v1969_v37  ;;  %v5219_v5 = vsel %vm1903_vm4, %v1969_v37, %v5114_v25  ;;  %v689_v8 = vor.u32 %v4963_v45, %v685_v3 }
  0x6c   : > { %v686_v30 = vsel %vm610_vm5, %v681_v31, %v685_v3  ;;  %v1975_v57 = vrot.slane %v5914_v35, 2  ;;  %v701_v31 = vrot.slane %v5012_v28, 1 }
  0x6d   : > { %v694_v37 = vsel %vm610_vm5, %v689_v8, %v693_v21  ;;  %v2592_v8 = vsel %vm429_vm0, %v4925_v12, 0  ;;  %v2533_v12 = vrot.slane %v5078_v9, 3 }
  0x6e   : > { %v705_v3 = vor.u32 %v5020_v10, %v701_v31 }
  0x70   : > { %4009 = vmatmul.mubr.msk.bf16.gmra.mrb[8].mxu1 %vm374_vm2, %v662_v38  ;;  %4177 = vmatmul.mubr.msk.bf16.gmra.mrb[24].mxu0 %vm374_vm2, %v5185_v50  ;;  %v678_v38 = vsel %vm610_vm5, %v673_v51, %v677_v33  ;;  %v697_v51 = vor.u32 %v4982_v22, %v693_v21 }
  0x71   : > { %4012 = vmatprep.mubr.msk.bf16.mxu1 %vm374_vm2, %v670_v1  ;;  %4180 = vmatprep.mubr.msk.bf16.mxu0 %vm374_vm2, %v5194_v29  ;;  %v1976_v1 = vrot.slane %v5913_v0, 3 }
  0x72   : > { %v702_v0 = vsel %vm610_vm5, %v697_v51, %v701_v31  ;;  %v5917_v51 = vrot.slane %v5036_v6, 3 }
  0x73   : > { %v1977_v33 = vor.u32 %v1976_v1, %v1975_v57  ;;  %v717_v1 = vrot.slane %v5075_v14, 1 }
  0x78   : > { %4013 = vmatmul.mubr.msk.bf16.gmra.mrb[12].mxu1 %vm374_vm2, %v678_v38  ;;  %4181 = vmatmul.mubr.msk.bf16.gmra.mrb[28].mxu0 %vm374_vm2, %v5210_v46  ;;  %v1978_v38 = vsel %vm1903_vm4, %v5114_v25, %v1977_v33  ;;  %v721_v33 = vor.u32 %v5083_v19, %v717_v1 }
  0x79   : > { %4016 = vmatprep.mubr.msk.bf16.mxu1 %vm374_vm2, %v686_v30  ;;  %4184 = vmatprep.mubr.msk.bf16.mxu0 %vm374_vm2, %v5219_v5  ;;  %v709_v30 = vrot.slane %v5023_v2, 1 }
  0x7b   : > { %v713_v57 = vor.u32 %v5030_v54, %v709_v30  ;;  %v710_v25 = vsel %vm610_vm5, %v705_v3, %v709_v30 }
  0x7d   : > { %v718_v21 = vsel %vm610_vm5, %v713_v57, %v717_v1  ;;  %v741_v57 = vrot.slane %v5144_v40, 1 }
  0x80   : > { %4017 = vmatmul.mubr.msk.bf16.gmra.mrb[16].mxu1 %vm374_vm2, %v694_v37  ;;  %4185 = vmatmul.mubr.msk.bf16.gmra.mrb[32].mxu0 %vm374_vm2, %v1978_v38  ;;  %v733_v37 = vrot.slane %v5138_v56, 1  ;;  %v5273_v38 = vld [vmem:[%s4708_s28 + $0xa8] ss:$0 sps:$4 sm:$0xff]  }
  0x81   : > { %4020 = vmatprep.mubr.msk.bf16.mxu1 %vm374_vm2, %v702_v0  ;;  %4190 = vmatprep.mubr.msk.bf16.mxu0 %vm374_vm2, %v4910_v62  ;;  %v725_v0 = vrot.slane %v5086_v44, 1  ;;  %v5253_v62 = vld [vmem:[%s5863_s1 + $0x20] sm:$0xf]  ;;  %5965 = vst [vmem:[#allocation39_spill] sm:$0xff] %v5273_v38 }
  0x83   : > { %v729_v31 = vor.u32 %v5089_v20, %v725_v0  ;;  %v726_v30 = vsel %vm610_vm5, %v721_v33, %v725_v0  ;;  %v5966_v0 = vrot.slane %v4985_v32, 1 }
  0x85   : > { %v734_v3 = vsel %vm610_vm5, %v729_v31, %v733_v37  ;;  %v1008_v31 = vrot.slane %v4850_v17, 2 }
  0x88   : > { %4021 = vmatmul.mubr.msk.bf16.gmra.mrb[20].mxu1 %vm374_vm2, %v710_v25  ;;  %4191 = vmatmul.mubr.msk.bf16.vlgmr.msra.gmra.mrb[0].mxu0 %vm374_vm2, %v4916_v7  ;;  %v5270_v7 = vsel %vm2499_vm7, %v5917_v51, %v2533_v12  ;;  %v737_v25 = vor.u32 %v5141_v55, %v733_v37 }
  0x89   : > { %4024 = vmatprep.mubr.msk.bf16.mxu1 %vm374_vm2, %v718_v21  ;;  %4227 = vmatpush3.bf16.msra.mxu0 %v2592_v8  ;;  %v745_v21 = vor.u32 %v5147_v60, %v741_v57 }
  0x8a   : > { %4194 = vmatprep.mubr.msk.bf16.mxu0 %vm374_vm2, %v4952_v34  ;;  %4601 = vmatprep.subr.msk.bf16.mxu0 %vm429_vm0, %v5253_v62  ;;  %v2535_v34 = vrot.slane %v5273_v38, 3  ;;  %v742_v8 = vsel %vm610_vm5, %v737_v25, %v741_v57  ;;  %v5969_v57 = vld [vmem:[#allocation15_spill] sm:$0xff] }
  0x8b   : > { %v750_v33 = vsel %vm610_vm5, %v745_v21, %v5966_v0  ;;  %v1012_v25 = vrot.slane %v5969_v57, 2  ;;  %v1016_v21 = vrot.slane %v4887_v42, 2 }
  0x8c   : > { %v5281_v1 = vsel %vm2499_vm7, %v2533_v12, %v2535_v34  ;;  %v1007_v12 = vrot.slane %v4853_v18, 1  ;;  %v1011_v34 = vrot.slane %v4864_v26, 1 }
  0x90   : > { %4025 = vmatmul.mubr.msk.bf16.gmra.mrb[24].mxu1 %vm374_vm2, %v726_v30  ;;  %4195 = vmatmul.mubr.msk.bf16.gmra.mrb[4].mxu0 %vm374_vm2, %v4966_v53  ;;  %v1004_v53 = vrot.slane %v4817_v58, 2  ;;  %v5968_v30 = vld [vmem:[#allocation27_spill] sm:$0xff] }
  0x91   : > { %4028 = vmatprep.mubr.msk.bf16.mxu1 %vm374_vm2, %v734_v3  ;;  %4198 = vmatprep.mubr.msk.bf16.mxu0 %vm374_vm2, %v4998_v49  ;;  %v1003_v49 = vrot.slane %v4820_v59, 1 }
  0x93   : > { %v1005_v37 = vor.u32 %v1004_v53, %v1003_v49  ;;  %v5972_v49 = vld [vmem:[#allocation38_spill] sm:$0xff] }
  0x95   : > { %v5314_v3 = vsel %vm995_vm6, %v5968_v30, %v1005_v37  ;;  %v5975_v30 = vld [vmem:[#allocation18_spill] sm:$0xff] }
  0x98   : > { %4029 = vmatmul.mubr.msk.bf16.gmra.mrb[28].mxu1 %vm374_vm2, %v742_v8  ;;  %4199 = vmatmul.mubr.msk.bf16.gmra.mrb[8].mxu0 %vm374_vm2, %v5001_v13  ;;  %v5967_v13 = vld [vmem:[#allocation28_spill] sm:$0xff]  ;;  %v5970_v8 = vld [vmem:[#allocation34_spill] sm:$0xff] }
  0x99   : > { %4032 = vmatprep.mubr.msk.bf16.mxu1 %vm374_vm2, %v750_v33  ;;  %4202 = vmatprep.mubr.msk.bf16.mxu0 %vm374_vm2, %v5047_v47  ;;  %v1009_v47 = vor.u32 %v1008_v31, %v1007_v12  ;;  %v1376_v0 = vsel %vm429_vm0, %v5970_v8, 0  ;;  %v1013_v33 = vor.u32 %v1012_v25, %v1011_v34  ;;  %v5973_v12 = vld [vmem:[#allocation2_spill] sm:$0xff]  ;;  %v1020_v8 = vrot.slane %v5975_v30, 2 }
  0x9a   : > { %v1023_v34 = vrot.slane %v4935_v23, 1  ;;  %v5976_v25 = vmov %v4932_v16  ;;  %v5979_v16 = vld [vmem:[#allocation5_spill] sm:$0xff] }
  0x9b   : > { %v5336_v31 = vsel %vm995_vm6, %v1009_v47, %v1013_v33  ;;  %v1024_v35 = vrot.slane %v5976_v25, 2 }
  0xa0   : > { %4033 = vmatmul.mubr.msk.bf16.gmra.mrb[32].mxu1 %vm374_vm2, %v5033_v39  ;;  %4203 = vmatmul.mubr.msk.bf16.gmra.mrb[12].mxu0 %vm374_vm2, %v5054_v4  ;;  %v5319_v39 = vsel %vm995_vm6, %v1005_v37, %v1009_v47  ;;  %v1015_v4 = vrot.slane %v4890_v43, 1 }
  0xa1   : > { %4038 = vmatprep.mubr.msk.bf16.mxu1 %vm374_vm2, %v5967_v13  ;;  %4206 = vmatprep.mubr.msk.bf16.mxu0 %vm374_vm2, %v5105_v36  ;;  %v5971_v36 = vld [vmem:[#allocation32_spill] sm:$0xff]  ;;  %v5974_v13 = vld [vmem:[#allocation19_spill] sm:$0xff] }
  0xa2   : > { %v1017_v53 = vor.u32 %v1016_v21, %v1015_v4  ;;  %v1019_v37 = vrot.slane %v5974_v13, 1  ;;  %v1025_v4 = vor.u32 %v1024_v35, %v1023_v34  ;;  %v1027_v21 = vrot.slane %v4943_v27, 1 }
  0xa4   : > { %v1021_v47 = vor.u32 %v1020_v8, %v1019_v37  ;;  %v5916_v37 = vshll.u32 %v5273_v38, 16 }
  0xa8   : > { %4039 = vmatmul.mubr.msk.bf16.vlgmr.msra.gmra.mrb[0].mxu1 %vm374_vm2, %v5314_v3  ;;  %4207 = vmatmul.mubr.msk.bf16.gmra.mrb[16].mxu0 %vm374_vm2, %v5971_v36  ;;  %v5341_v36 = vsel %vm995_vm6, %v1013_v33, %v1017_v53  ;;  %v1028_v33 = vrot.slane %v4940_v24, 2 }
  0xa9   : > { %4042 = vmatprep.mubr.msk.bf16.mxu1 %vm374_vm2, %v5319_v39  ;;  %4210 = vmatprep.mubr.msk.bf16.mxu0 %vm374_vm2, %v5972_v49  ;;  %v1031_v49 = vrot.slane %v4963_v45, 1 }
  0xaa   : > { %4075 = vmatpush3.bf16.msra.mxu1 %v1376_v0  ;;  %v5355_v0 = vsel %vm995_vm6, %v1017_v53, %v1021_v47  ;;  %v5915_v53 = vshrl.u32 %v5273_v38, 16  ;;  %v2501_v38 = vrot.slane %v5979_v16, 3 }
  0xab   : > { %4597 = vmatprep.subr.msk.bf16.mxu1 %vm429_vm0, %v5973_v12  ;;  %v1032_v12 = vrot.slane %v4960_v52, 2 }
  0xad   : > { %v1033_v35 = vor.u32 %v1032_v12, %v1031_v49  ;;  %v1040_v49 = vrot.slane %v5012_v28, 2  ;;  %v5977_v12 = vld [vmem:[#allocation35_spill] sm:$0xff]  ;;  %v1043_v28 = vrot.slane %v5030_v54, 1 }
  0xb0   : > { %4043 = vmatmul.mubr.msk.bf16.gmra.mrb[4].mxu1 %vm374_vm2, %v5336_v31  ;;  %4211 = vmatmul.mubr.msk.bf16.gmra.mrb[20].mxu0 %vm374_vm2, %v5159_v41  ;;  %v5361_v41 = vsel %vm995_vm6, %v1021_v47, %v1025_v4  ;;  %v1036_v47 = vrot.slane %v4979_v11, 2 }
  0xb1   : > { %4046 = vmatprep.mubr.msk.bf16.mxu1 %vm374_vm2, %v5341_v36  ;;  %4214 = vmatprep.mubr.msk.bf16.mxu0 %vm374_vm2, %v5185_v50  ;;  %v1029_v50 = vor.u32 %v1028_v33, %v1027_v21  ;;  %v2269_v21 = vrot.slane %v5915_v53, 2  ;;  %v1039_v33 = vrot.slane %v5020_v10, 1  ;;  %v5980_v10 = vld [vmem:[#allocation33_spill] sm:$0xff] }
  0xb3   : > { %v5374_v8 = vsel %vm995_vm6, %v1025_v4, %v1029_v50  ;;  %v5377_v34 = vsel %vm995_vm6, %v1029_v50, %v1033_v35  ;;  %v1041_v53 = vor.u32 %v1040_v49, %v1039_v33  ;;  %v5982_v33 = vld [vmem:[#allocation7_spill] sm:$0xff] }
  0xb4   : > { %v2505_v49 = vrot.slane %v5982_v33, 3 }
  0xb8   : > { %4047 = vmatmul.mubr.msk.bf16.gmra.mrb[8].mxu1 %vm374_vm2, %v5355_v0  ;;  %4215 = vmatmul.mubr.msk.bf16.gmra.mrb[24].mxu0 %vm374_vm2, %v5194_v29  ;;  %v1035_v29 = vrot.slane %v4982_v22, 1 }
  0xb9   : > { %4050 = vmatprep.mubr.msk.bf16.mxu1 %vm374_vm2, %v5361_v41  ;;  %4218 = vmatprep.mubr.msk.bf16.mxu0 %vm374_vm2, %v5210_v46  ;;  %v2272_v46 = vrot.slane %v5916_v37, 3  ;;  %v5978_v37 = vld [vmem:[#allocation4_spill] sm:$0xff] }
  0xba   : > { %v1037_v4 = vor.u32 %v1036_v47, %v1035_v29  ;;  %v2500_v51 = vrot.slane %v5978_v37, 3  ;;  %v1047_v47 = vrot.slane %v5083_v19, 1 }
  0xbb   : > { %v2273_v50 = vor.u32 %v2272_v46, %v2269_v21  ;;  %v1048_v21 = vrot.slane %v5075_v14, 2 }
  0xbc   : > { %v5398_v9 = vsel %vm995_vm6, %v1033_v35, %v1037_v4  ;;  %v5405_v29 = vsel %vm995_vm6, %v1037_v4, %v1041_v53  ;;  %v2502_v37 = vsel %vm2499_vm7, %v2500_v51, %v2501_v38  ;;  %v1051_v51 = vrot.slane %v5089_v20, 1 }
  0xbd   : > { %v2274_v11 = vsel %vm1903_vm4, %v5980_v10, %v2273_v50  ;;  %v5981_v10 = vld [vmem:[#allocation6_spill] sm:$0xff]  ;;  %v1049_v46 = vor.u32 %v1048_v21, %v1047_v47  ;;  %v2940_v47 = vsel %vm429_vm0, %v5253_v62, 0 }
  0xbe   : > { %v2503_v35 = vrot.slane %v5981_v10, 3  ;;  %v5984_v10 = vld [vmem:[#allocation9_spill] sm:$0xff] }
  0xbf   : > { %v2509_v33 = vrot.slane %v5984_v10, 3 }
  0xc0   : > { %4051 = vmatmul.mubr.msk.bf16.gmra.mrb[12].mxu1 %vm374_vm2, %v5374_v8  ;;  %4219 = vmatmul.mubr.msk.bf16.gmra.mrb[28].mxu0 %vm374_vm2, %v5219_v5  ;;  %v1044_v5 = vrot.slane %v5023_v2, 2  ;;  %v2506_v21 = vsel %vm2499_vm7, %v2503_v35, %v2505_v49 }
  0xc1   : > { %4054 = vmatprep.mubr.msk.bf16.mxu1 %vm374_vm2, %v5377_v34  ;;  %4222 = vmatprep.mubr.msk.bf16.mxu0 %vm374_vm2, %v5977_v12  ;;  %v1052_v12 = vrot.slane %v5086_v44, 2 }
  0xc2   : > { %v1045_v16 = vor.u32 %v1044_v5, %v1043_v28  ;;  %v1055_v28 = vrot.slane %v5141_v55, 1  ;;  %v1056_v5 = vrot.slane %v5138_v56, 2  ;;  %v1060_v56 = vrot.slane %v5144_v40, 2 }
  0xc4   : > { %v5419_v4 = vsel %vm995_vm6, %v1041_v53, %v1045_v16  ;;  %v5425_v50 = vsel %vm995_vm6, %v1045_v16, %v1049_v46  ;;  %v5983_v53 = vld [vmem:[#allocation8_spill] sm:$0xff]  ;;  %v1057_v16 = vor.u32 %v1056_v5, %v1055_v28 }
  0xc8   : > { %4055 = vmatmul.mubr.msk.bf16.gmra.mrb[16].mxu1 %vm374_vm2, %v5398_v9  ;;  %4223 = vmatmul.mubr.msk.bf16.gmra.mrb[32].mxu0 %vm374_vm2, %v2274_v11  ;;  %v2504_v11 = vsel %vm2499_vm7, %v2501_v38, %v2503_v35  ;;  %v1053_v38 = vor.u32 %v1052_v12, %v1051_v51  ;;  %v1059_v35 = vrot.slane %v5147_v60, 1  ;;  %v1063_v51 = vrot.slane %v4994_v15, 1 }
  0xc9   : > { %4058 = vmatprep.mubr.msk.bf16.mxu1 %vm374_vm2, %v5405_v29  ;;  %4228 = vmatprep.mubr.msk.bf16.mxu0 %vm374_vm2, %v2502_v37  ;;  %v2507_v37 = vrot.slane %v5983_v53, 3  ;;  %v1064_v12 = vrot.slane %v4985_v32, 2 }
  0xca   : > { %v5441_v62 = vsel %vm995_vm6, %v1049_v46, %v1053_v38  ;;  %v5447_v55 = vsel %vm995_vm6, %v1053_v38, %v1057_v16  ;;  %v1061_v46 = vor.u32 %v1060_v56, %v1059_v35  ;;  %v5987_v56 = vld [vmem:[#allocation12_spill] sm:$0xff]  ;;  %v5988_v35 = vld [vmem:[#allocation14_spill] sm:$0xff] }
  0xcb   : > { %v2510_v28 = vsel %vm2499_vm7, %v2507_v37, %v2509_v33 }
  0xcc   : > { %v5463_v53 = vsel %vm995_vm6, %v1057_v16, %v1061_v46  ;;  %v2515_v16 = vrot.slane %v5987_v56, 3  ;;  %v5994_v56 = vld [vmem:[#allocation21_spill] sm:$0xff] }
  0xd0   : > { %4059 = vmatmul.mubr.msk.bf16.gmra.mrb[20].mxu1 %vm374_vm2, %v5419_v4  ;;  %4229 = vmatmul.mubr.msk.bf16.vlgmr.msra.gmra.mrb[0].mxu0 %vm374_vm2, %v2504_v11  ;;  %v2508_v11 = vsel %vm2499_vm7, %v2505_v49, %v2507_v37  ;;  %v5985_v49 = vld [vmem:[#allocation10_spill] sm:$0xff] }
  0xd1   : > { %4062 = vmatprep.mubr.msk.bf16.mxu1 %vm374_vm2, %v5425_v50  ;;  %4265 = vmatpush3.bf16.msra.mxu0 %v2940_v47  ;;  %v2511_v5 = vrot.slane %v5985_v49, 3  ;;  %v5459_v47 = vor.u32 %v1064_v12, %v1063_v51  ;;  %v5989_v51 = vor.u32 %v5174_v48, %v5178_v63  ;;  %v5990_v49 = vld [vmem:[#allocation16_spill] sm:$0xff] }
  0xd2   : > { %4232 = vmatprep.mubr.msk.bf16.mxu0 %vm374_vm2, %v2506_v21  ;;  %v5986_v21 = vld [vmem:[#allocation11_spill] sm:$0xff] }
  0xd3   : > { %v2513_v38 = vrot.slane %v5986_v21, 3  ;;  %v2512_v37 = vsel %vm2499_vm7, %v2509_v33, %v2511_v5  ;;  %v5468_v10 = vsel %vm995_vm6, %v1061_v46, %v5459_v47  ;;  %v2517_v33 = vrot.slane %v5988_v35, 3  ;;  %v5991_v21 = vld [vmem:[#allocation17_spill] sm:$0xff] }
  0xd4   : > { %v1072_v12 = vsel %vm995_vm6, %v5459_v47, %v5989_v51  ;;  %v2521_v48 = vrot.slane %v5991_v21, 3 }
  0xd5   : > { %v2518_v46 = vsel %vm2499_vm7, %v2515_v16, %v2517_v33 }
  0xd8   : > { %4063 = vmatmul.mubr.msk.bf16.gmra.mrb[24].mxu1 %vm374_vm2, %v5441_v62  ;;  %4233 = vmatmul.mubr.msk.bf16.gmra.mrb[4].mxu0 %vm374_vm2, %v2508_v11  ;;  %v2514_v11 = vsel %vm2499_vm7, %v2511_v5, %v2513_v38  ;;  %v2519_v5 = vrot.slane %v5990_v49, 3 }
  0xd9   : > { %4066 = vmatprep.mubr.msk.bf16.mxu1 %vm374_vm2, %v5447_v55  ;;  %4236 = vmatprep.mubr.msk.bf16.mxu0 %vm374_vm2, %v2510_v28  ;;  %v2516_v28 = vsel %vm2499_vm7, %v2513_v38, %v2515_v16  ;;  %v5993_v38 = vld [vmem:[#allocation20_spill] sm:$0xff]  ;;  %v2525_v16 = vrot.slane %v5994_v56, 3 }
  0xda   : > { %v2520_v63 = vsel %vm2499_vm7, %v2517_v33, %v2519_v5 }
  0xe0   : > { %4067 = vmatmul.mubr.msk.bf16.gmra.mrb[28].mxu1 %vm374_vm2, %v5463_v53  ;;  %4237 = vmatmul.mubr.msk.bf16.gmra.mrb[8].mxu0 %vm374_vm2, %v2512_v37  ;;  %v2522_v37 = vsel %vm2499_vm7, %v2519_v5, %v2521_v48 }
  0xe1   : > { %4070 = vmatprep.mubr.msk.bf16.mxu1 %vm374_vm2, %v5468_v10  ;;  %4240 = vmatprep.mubr.msk.bf16.mxu0 %vm374_vm2, %v2514_v11  ;;  %v2523_v11 = vrot.slane %v5993_v38, 3 }
  0xe3   : > { %v2524_v33 = vsel %vm2499_vm7, %v2521_v48, %v2523_v11  ;;  %v2526_v51 = vsel %vm2499_vm7, %v2523_v11, %v2525_v16  ;;  %v2810_v48 = vrot.slane %v4820_v59, 3  ;;  %v2818_v59 = vrot.slane %v5969_v57, 4 }
  0xe4   : > { %v2826_v57 = vrot.slane %v5975_v30, 4  ;;  %v2830_v11 = vrot.slane %v5976_v25, 4 }
  0xe8   : > { %4071 = vmatmul.mubr.msk.bf16.gmra.mrb[32].mxu1 %vm374_vm2, %v1072_v12  ;;  %4241 = vmatmul.mubr.msk.bf16.gmra.mrb[12].mxu0 %vm374_vm2, %v2516_v28  ;;  %v5996_v12 = vld [vmem:[#allocation13_spill] sm:$0xff] }
  0xe9   : > { %4076 = vmatprep.mubr.msk.bf16.mxu1 %vm374_vm2, %v5314_v3  ;;  %4244 = vmatprep.mubr.msk.bf16.mxu0 %vm374_vm2, %v2518_v46  ;;  %v5992_v3 = vld [vmem:[#allocation3_spill] sm:$0xff]  ;;  %v2529_v28 = vrot.slane %v5996_v12, 3 }
  0xf0   : > { %4077 = vmatmul.mubr.msk.bf16.vlgmr.msra.gmra.mrb[0].mxu1 %vm374_vm2, %v5319_v39  ;;  %4245 = vmatmul.mubr.msk.bf16.gmra.mrb[16].mxu0 %vm374_vm2, %v2520_v63  ;;  %v5995_v39 = vld [vmem:[#allocation23_spill] sm:$0xff]  ;;  %v2811_v63 = vrot.slane %v4817_v58, 4  ;;  %v2817_v58 = vrot.slane %v4864_v26, 3 }
  0xf1   : > { %4080 = vmatprep.mubr.msk.bf16.mxu1 %vm374_vm2, %v5336_v31  ;;  %4248 = vmatprep.mubr.msk.bf16.mxu0 %vm374_vm2, %v2522_v37  ;;  %v2527_v31 = vrot.slane %v5995_v39, 3  ;;  %v2813_v37 = vrot.slane %v4853_v18, 3  ;;  %v2821_v18 = vrot.slane %v4890_v43, 3 }
  0xf2   : > { %4303 = vmatpush3.bf16.msra.mxu1 %v5992_v3  ;;  %v2814_v3 = vrot.slane %v4850_v17, 4 }
  0xf3   : > { %v2528_v46 = vsel %vm2499_vm7, %v2525_v16, %v2527_v31  ;;  %v2530_v5 = vsel %vm2499_vm7, %v2527_v31, %v2529_v28  ;;  %v5998_v16 = vld [vmem:[#allocation29_spill] sm:$0xff]  ;;  %v2837_v31 = vrot.slane %v4963_v45, 3  ;;  %v6001_v45 = vshll.u32 %v5191_v61, 16 }
  0xf4   : > { %v1354_v25 = vrot.slane %v5998_v16, 1 }
  0xf8   : > { %4081 = vmatmul.mubr.msk.bf16.gmra.mrb[4].mxu1 %vm374_vm2, %v5341_v36  ;;  %4249 = vmatmul.mubr.msk.bf16.gmra.mrb[20].mxu0 %vm374_vm2, %v2524_v33  ;;  %v5997_v36 = vrot.slane %v5036_v6, 3  ;;  %v5999_v33 = vld [vmem:[#allocation30_spill] sm:$0xff] }
  0xf9   : > { %4084 = vmatprep.mubr.msk.bf16.mxu1 %vm374_vm2, %v5355_v0  ;;  %4252 = vmatprep.mubr.msk.bf16.mxu0 %vm374_vm2, %v2526_v51  ;;  %v1357_v51 = vrot.slane %v5999_v33, 2 }
  0xfa   : > { %v2532_v0 = vsel %vm2499_vm7, %v2529_v28, %v5997_v36  ;;  %v6000_v28 = vshrl.u32 %v5191_v61, 16  ;;  %v2841_v36 = vrot.slane %v4982_v22, 3  ;;  %v1615_v22 = vrot.slane %v5990_v49, 2 }
 0x100   : > { %4085 = vmatmul.mubr.msk.bf16.gmra.mrb[8].mxu1 %vm374_vm2, %v5361_v41  ;;  %4253 = vmatmul.mubr.msk.bf16.gmra.mrb[24].mxu0 %vm374_vm2, %v2528_v46  ;;  %v2812_v41 = vor.u32 %v2811_v63, %v2810_v48  ;;  %v1363_v46 = vrot.slane %v6000_v28, 1  ;;  %v6003_v63 = vld [vmem:[#allocation26_spill] sm:$0xff] }
 0x101   : > { %4088 = vmatprep.mubr.msk.bf16.mxu1 %vm374_vm2, %v5374_v8  ;;  %4256 = vmatprep.mubr.msk.bf16.mxu0 %vm374_vm2, %v2530_v5  ;;  %v2815_v8 = vor.u32 %v2814_v3, %v2813_v37  ;;  %v1366_v5 = vrot.slane %v6001_v45, 2  ;;  %v2845_v37 = vrot.slane %v6003_v63, 3  ;;  %v6004_v3 = vld [vmem:[#allocation25_spill] sm:$0xff]  ;;  %v2874_v45 = vrot.slane %v5999_v33, 4 }
 0x103   : > { %v2816_v17 = vsel %vm2809_vm8, %v2812_v41, %v2815_v8  ;;  %v2846_v41 = vrot.slane %v6004_v3, 4 }
 0x108   : > { %4089 = vmatmul.mubr.msk.bf16.gmra.mrb[12].mxu1 %vm374_vm2, %v5377_v34  ;;  %4257 = vmatmul.mubr.msk.bf16.gmra.mrb[28].mxu0 %vm374_vm2, %v2532_v0  ;;  %v2822_v34 = vrot.slane %v4887_v42, 4  ;;  %v6002_v0 = vld [vmem:[#allocation24_spill] sm:$0xff] }
 0x109   : > { %4092 = vmatprep.mubr.msk.bf16.mxu1 %vm374_vm2, %v5398_v9  ;;  %4260 = vmatprep.mubr.msk.bf16.mxu0 %vm374_vm2, %v5270_v7  ;;  %v2819_v9 = vor.u32 %v2818_v59, %v2817_v58  ;;  %v2825_v7 = vrot.slane %v5974_v13, 3  ;;  %v2847_v58 = vor.u32 %v2846_v41, %v2845_v37  ;;  %v6011_v37 = vld [vmem:[#allocation39_spill] sm:$0xff] }
 0x10a   : > { %v2823_v26 = vor.u32 %v2822_v34, %v2821_v18  ;;  %v6005_v18 = vrot.slane %v5988_v35, 2  ;;  %v1617_v35 = vrot.slane %v5991_v21, 2  ;;  %v6012_v3 = vshrl.u32 %v6011_v37, 16 }
 0x10b   : > { %v2820_v43 = vsel %vm2809_vm8, %v2815_v8, %v2819_v9  ;;  %v1367_v8 = vor.u32 %v1366_v5, %v1363_v46  ;;  %v2873_v46 = vrot.slane %v5998_v16, 3 }
 0x10c   : > { %v2824_v42 = vsel %vm2809_vm8, %v2819_v9, %v2823_v26  ;;  %v1616_v34 = vsel %vm1593_vm3, %v6005_v18, %v1615_v22  ;;  %v2850_v9 = vrot.slane %v5023_v2, 4  ;;  %v2881_v41 = vrot.slane %v6012_v3, 3 }
 0x10d   : > { %v2875_v16 = vor.u32 %v2874_v45, %v2873_v46 }
 0x110   : > { %4093 = vmatmul.mubr.msk.bf16.gmra.mrb[16].mxu1 %vm374_vm2, %v5405_v29  ;;  %4261 = vmatmul.mubr.msk.bf16.gmra.mrb[32].mxu0 %vm374_vm2, %v5281_v1  ;;  %v2829_v29 = vrot.slane %v4935_v23, 3  ;;  %v2827_v1 = vor.u32 %v2826_v57, %v2825_v7  ;;  %v2834_v23 = vrot.slane %v4940_v24, 4  ;;  %v2853_v7 = vrot.slane %v5083_v19, 3 }
 0x111   : > { %4096 = vmatprep.mubr.msk.bf16.mxu1 %vm374_vm2, %v5419_v4  ;;  %4266 = vmatprep.mubr.msk.bf16.mxu0 %vm374_vm2, %v2816_v17  ;;  %v2833_v4 = vrot.slane %v4943_v27, 3  ;;  %v1358_v27 = vor.u32 %v1357_v51, %v1354_v25  ;;  %v2854_v57 = vrot.slane %v5075_v14, 4 }
 0x112   : > { %v2831_v13 = vor.u32 %v2830_v11, %v2829_v29  ;;  %v2828_v30 = vsel %vm2809_vm8, %v2823_v26, %v2827_v1  ;;  %v2858_v29 = vrot.slane %v5086_v44, 4  ;;  %v1623_v44 = vrot.slane %v5995_v39, 2  ;;  %v4635_v39 = vld [vmem:[%s4708_s28 + $0x90] sm:$0xff]  }
 0x113   : > { %v2835_v24 = vor.u32 %v2834_v23, %v2833_v4  ;;  %v1368_v59 = vsel %vm995_vm6, %v1358_v27, %v1367_v8  ;;  %v2855_v2 = vor.u32 %v2854_v57, %v2853_v7  ;;  %v6013_v8 = vshll.u32 %v6011_v37, 16 }
 0x118   : > { %4097 = vmatmul.mubr.msk.bf16.gmra.mrb[20].mxu1 %vm374_vm2, %v5425_v50  ;;  %4267 = vmatmul.mubr.msk.bf16.vlgmr.msra.gmra.mrb[0].mxu0 %vm374_vm2, %v2820_v43  ;;  %v2832_v50 = vsel %vm2809_vm8, %v2827_v1, %v2831_v13  ;;  %v1618_v43 = vsel %vm1593_vm3, %v1615_v22, %v1617_v35  ;;  %v6006_v1 = vld [vmem:[#allocation37_spill] sm:$0xff] }
 0x119   : > { %4100 = vmatprep.mubr.msk.bf16.mxu1 %vm374_vm2, %v5441_v62  ;;  %4270 = vmatprep.mubr.msk.bf16.mxu0 %vm374_vm2, %v2824_v42  ;;  %v2838_v62 = vrot.slane %v4960_v52, 4  ;;  %v2836_v52 = vsel %vm2809_vm8, %v2831_v13, %v2835_v24  ;;  %v2857_v42 = vrot.slane %v5089_v20, 3  ;;  %v2861_v21 = vrot.slane %v6006_v1, 3  ;;  %v6007_v13 = vld [vmem:[#allocation36_spill] sm:$0xff] }
 0x11b   : > { %v2839_v12 = vor.u32 %v2838_v62, %v2837_v31  ;;  %v2859_v20 = vor.u32 %v2858_v29, %v2857_v42  ;;  %v2866_v31 = vrot.slane %v5144_v40, 4 }
 0x11d   : > { %v2840_v48 = vsel %vm2809_vm8, %v2835_v24, %v2839_v12  ;;  %v2860_v25 = vsel %vm2809_vm8, %v2855_v2, %v2859_v20  ;;  %v2870_v24 = vrot.slane %v4985_v32, 4 }
 0x120   : > { %4101 = vmatmul.mubr.msk.bf16.gmra.mrb[24].mxu1 %vm374_vm2, %v5447_v55  ;;  %4271 = vmatmul.mubr.msk.bf16.gmra.mrb[4].mxu0 %vm374_vm2, %v2828_v30  ;;  %v1359_v55 = vsel %vm995_vm6, %v5459_v47, %v1358_v27  ;;  %v2862_v30 = vrot.slane %v6007_v13, 4  ;;  %v1625_v27 = vrot.slane %v4635_v39, 2  ;;  %v5690_v13 = vld [vmem:[%s5864_s2] ss:$0 sm:$0xff] }
 0x121   : > { %4104 = vmatprep.mubr.msk.bf16.mxu1 %vm374_vm2, %v5463_v53  ;;  %4274 = vmatprep.mubr.msk.bf16.mxu0 %vm374_vm2, %v2832_v50  ;;  %v2842_v53 = vrot.slane %v6002_v0, 4  ;;  %v2865_v50 = vrot.slane %v5147_v60, 3  ;;  %v1627_v60 = vrot.slane %v5036_v6, 2  ;;  %v1629_v6 = vrot.slane %v5191_v61, 2 }
 0x122   : > { %v2863_v4 = vor.u32 %v2862_v30, %v2861_v21  ;;  %v1626_v28 = vsel %vm1593_vm3, %v1623_v44, %v1625_v27 }
 0x123   : > { %v2843_v47 = vor.u32 %v2842_v53, %v2841_v36  ;;  %v1628_v32 = vsel %vm1593_vm3, %v1625_v27, %v1627_v60 }
 0x124   : > { %v2864_v62 = vsel %vm2809_vm8, %v2859_v20, %v2863_v4  ;;  %v5695_v20 = vld [vmem:[%s5865_s3] ss:$0 sm:$0xff] }
 0x125   : > { %v2844_v17 = vsel %vm2809_vm8, %v2839_v12, %v2843_v47  ;;  %v2848_v26 = vsel %vm2809_vm8, %v2843_v47, %v2847_v58  ;;  %v2867_v12 = vor.u32 %v2866_v31, %v2865_v50  ;;  %v2882_v47 = vrot.slane %v6013_v8, 4 }
 0x127   : > { %v2883_v61 = vor.u32 %v2882_v47, %v2881_v41 }
 0x128   : > { %4105 = vmatmul.mubr.msk.bf16.gmra.mrb[28].mxu1 %vm374_vm2, %v5468_v10  ;;  %4275 = vmatmul.mubr.msk.bf16.gmra.mrb[8].mxu0 %vm374_vm2, %v2836_v52  ;;  %v2849_v10 = vrot.slane %v5030_v54, 3  ;;  %v1619_v54 = vrot.slane %v5993_v38, 2  ;;  %v1621_v38 = vrot.slane %v5994_v56, 2  ;;  %v2869_v56 = vrot.slane %v4994_v15, 3  ;;  %v6008_v52 = vld [vmem:[#allocation31_spill] sm:$0xff] }
 0x129   : > { %4108 = vmatprep.mubr.msk.bf16.mxu1 %vm374_vm2, %v1359_v55  ;;  %4278 = vmatprep.mubr.msk.bf16.mxu0 %vm374_vm2, %v2840_v48  ;;  %v2868_v15 = vsel %vm2809_vm8, %v2863_v4, %v2867_v12  ;;  %v6009_v55 = vshrl.u32 %v6008_v52, 16  ;;  %v6010_v0 = vshll.u32 %v6008_v52, 16  ;;  %v1630_v48 = vsel %vm1593_vm3, %v1627_v60, %v1629_v6 }
 0x12a   : > { %v2851_v49 = vor.u32 %v2850_v9, %v2849_v10  ;;  %v1620_v14 = vsel %vm1593_vm3, %v1617_v35, %v1619_v54  ;;  %v1622_v23 = vsel %vm1593_vm3, %v1619_v54, %v1621_v38  ;;  %v1624_v51 = vsel %vm1593_vm3, %v1621_v38, %v1623_v44 }
 0x12b   : > { %v2871_v40 = vor.u32 %v2870_v24, %v2869_v56  ;;  %v2877_v36 = vrot.slane %v6009_v55, 3  ;;  %v2878_v53 = vrot.slane %v6010_v0, 4 }
 0x12c   : > { %v2852_v19 = vsel %vm2809_vm8, %v2847_v58, %v2851_v49  ;;  %v2856_v11 = vsel %vm2809_vm8, %v2851_v49, %v2855_v2 }
 0x12d   : > { %v2872_v5 = vsel %vm2809_vm8, %v2867_v12, %v2871_v40  ;;  %v2879_v33 = vor.u32 %v2878_v53, %v2877_v36  ;;  %v2876_v63 = vsel %vm2809_vm8, %v2871_v40, %v2875_v16 }
 0x12f   : > { %v2880_v22 = vsel %vm2809_vm8, %v2875_v16, %v2879_v33  ;;  %v2884_v58 = vsel %vm2809_vm8, %v2879_v33, %v2883_v61 }
 0x130   : > { %4109 = vmatmul.mubr.msk.bf16.gmra.mrb[32].mxu1 %vm374_vm2, %v1368_v59  ;;  %4279 = vmatmul.mubr.msk.bf16.gmra.mrb[12].mxu0 %vm374_vm2, %v2844_v17 }
 0x131   : > { %4134 = vmatprep.mubr.msk.bf16.mxu1 %vm374_vm2, %v1616_v34  ;;  %4282 = vmatprep.mubr.msk.bf16.mxu0 %vm374_vm2, %v2848_v26 }
 0x138   : > { %4135 = vmatmul.mubr.msk.bf16.vlgmr.msra.gmra.mrb[20].mxu1 %vm374_vm2, %v1618_v43  ;;  %4283 = vmatmul.mubr.msk.bf16.gmra.mrb[16].mxu0 %vm374_vm2, %v2852_v19 }
 0x139   : > { %4138 = vmatprep.mubr.msk.bf16.mxu1 %vm374_vm2, %v1620_v14  ;;  %4286 = vmatprep.mubr.msk.bf16.mxu0 %vm374_vm2, %v2856_v11 }
 0x140   : > { %4139 = vmatmul.mubr.msk.bf16.gmra.mrb[24].mxu1 %vm374_vm2, %v1622_v23  ;;  %4287 = vmatmul.mubr.msk.bf16.gmra.mrb[20].mxu0 %vm374_vm2, %v2860_v25 }
 0x141   : > { %4142 = vmatprep.mubr.msk.bf16.mxu1 %vm374_vm2, %v1624_v51  ;;  %4290 = vmatprep.mubr.msk.bf16.mxu0 %vm374_vm2, %v2864_v62 }
 0x148   : > { %4143 = vmatmul.mubr.msk.bf16.gmra.mrb[28].mxu1 %vm374_vm2, %v1626_v28  ;;  %4291 = vmatmul.mubr.msk.bf16.gmra.mrb[24].mxu0 %vm374_vm2, %v2868_v15 }
 0x149   : > { %4146 = vmatprep.mubr.msk.bf16.mxu1 %vm374_vm2, %v1628_v32  ;;  %4294 = vmatprep.mubr.msk.bf16.mxu0 %vm374_vm2, %v2872_v5 }
 0x150   : > { %4147 = vmatmul.mubr.msk.bf16.gmra.mrb[32].mxu1 %vm374_vm2, %v1630_v48  ;;  %4295 = vmatmul.mubr.msk.bf16.gmra.mrb[28].mxu0 %vm374_vm2, %v2876_v63 }
 0x151   : > { %4298 = vmatprep.mubr.msk.bf16.mxu0 %vm374_vm2, %v2880_v22 }
 0x158   : > { %4299 = vmatmul.mubr.msk.bf16.gmra.mrb[32].mxu0 %vm374_vm2, %v2884_v58 }
 0x1c3   : > { %v4078_v59 = vpop.f32.mrb[0].mxu1 }
 0x1c4   : > { %v1412_v17 = vpop.f32.mrb[1].mxu1 }
 0x1c5   : > { %v4079_v18 = vpop.f32.mrb[2].mxu1 }
 0x1c6   : > { %v1415_v34 = vpop.f32.mrb[3].mxu1 }
 0x1cb   : > { %v4082_v10 = vpop.f32.mrb[4].mxu1 }
 0x1cc   : > { %v1428_v9 = vpop.f32.mrb[5].mxu1 }
 0x1cd   : > { %v4083_v26 = vpop.f32.mrb[6].mxu1 }
 0x1ce   : > { %v1431_v7 = vpop.f32.mrb[7].mxu1 }
 0x1d3   : > { %v5663_v57 = vpop.f32.mrb[8].mxu1 }
 0x1d4   : > { %v5665_v35 = vpop.f32.mrb[9].mxu1 }
 0x1d5   : > { %v5667_v49 = vpop.f32.mrb[10].mxu1 }
 0x1d6   : > { %v5669_v54 = vpop.f32.mrb[11].mxu1 }
 0x1db   : > { %v5671_v2 = vpop.f32.mrb[12].mxu1 }
 0x1dc   : > { %v5673_v43 = vpop.f32.mrb[13].mxu1 }
 0x1dd   : > { %v5675_v19 = vpop.f32.mrb[14].mxu1 }
 0x1de   : > { %v5677_v14 = vpop.f32.mrb[15].mxu1 }
 0x1e3   : > { %v5679_v42 = vpop.f32.mrb[16].mxu1 }
 0x1e4   : > { %v5681_v29 = vpop.f32.mrb[17].mxu1 }
 0x1e5   : > { %v5683_v11 = vpop.f32.mrb[18].mxu1 }
 0x1e6   : > { %v5685_v1 = vpop.f32.mrb[19].mxu1 }
 0x1eb   : > { %v4268_v21 = vpop.f32.mrb[0].mxu0 }
 0x1ec   : > { %v4304_v30 = vadd.f32 %v4268_v21, %v4078_v59  ;;  %v2976_v38 = vpop.f32.mrb[1].mxu0 }
 0x1ed   : > { %v4305_v44 = vadd.f32 %v2976_v38, %v1412_v17  ;;  %v4269_v4 = vpop.f32.mrb[2].mxu0 }
 0x1ee   : > { %v3164_v23 = vmul.f32 %v4304_v30, %v5690_v13  ;;  %v4306_v25 = vadd.f32 %v4269_v4, %v4079_v18  ;;  %v2979_v51 = vpop.f32.mrb[3].mxu0 }
 0x1ef   : > { %v3162_v50 = vmul.f32 %v4305_v44, %v5690_v13  ;;  %v4307_v31 = vadd.f32 %v2979_v51, %v1415_v34 }
 0x1f0   : > { %v3207_v62 = vadd.f32 %v5695_v20, %v3164_v23  ;;  %v3165_v56 = vmul.f32 %v4306_v25, %v5690_v13 }
 0x1f1   : > { %v3205_v24 = vadd.f32 %v5695_v20, %v3162_v50  ;;  %v3163_v39 = vmul.f32 %v4307_v31, %v5690_v13 }
 0x1f2   : > { %v3243_v27 = vmax.f32 %v3207_v62, 0.0  ;;  %v3208_v12 = vadd.f32 %v5695_v20, %v3165_v56 }
 0x1f3   : > { %v3241_v60 = vmax.f32 %v3205_v24, 0.0  ;;  %v3206_v40 = vadd.f32 %v5695_v20, %v3163_v39  ;;  %v4272_v28 = vpop.f32.mrb[4].mxu0 }
 0x1f4   : > { %v3755_v15 = vpack.c.bf16 %v3243_v27, %v3243_v27  ;;  %v3244_v32 = vmax.f32 %v3208_v12, 0.0  ;;  %v4308_v46 = vadd.f32 %v4272_v28, %v4082_v10  ;;  %v2992_v45 = vpop.f32.mrb[5].mxu0 }
 0x1f5   : > { %v3753_v5 = vpack.c.bf16 %v3241_v60, %v3241_v60  ;;  %v3242_v52 = vmax.f32 %v3206_v40, 0.0  ;;  %v4309_v55 = vadd.f32 %v2992_v45, %v1428_v9  ;;  %v4273_v36 = vpop.f32.mrb[6].mxu0 }
 0x1f6   : > { %3424 = vst.msk [vmem:[%s5708_s22 + $0x8] sm:$0xf] %vm3421_vm9, %v3755_v15  ;;  %v3756_v0 = vpack.c.bf16 %v3244_v32, %v3244_v32  ;;  %v3168_v53 = vmul.f32 %v4308_v46, %v5690_v13  ;;  %v4310_v6 = vadd.f32 %v4273_v36, %v4083_v26  ;;  %v2995_v16 = vpop.f32.mrb[7].mxu0 }
 0x1f7   : > { %3422 = vst.msk [vmem:[%s5708_s22] sm:$0xf] %vm3421_vm9, %v3753_v5  ;;  %v3754_v33 = vpack.c.bf16 %v3242_v52, %v3242_v52  ;;  %v3166_v48 = vmul.f32 %v4309_v55, %v5690_v13  ;;  %v4311_v63 = vadd.f32 %v2995_v16, %v1431_v7 }
 0x1f8   : > { %3425 = vst.msk [vmem:[%s5708_s22 + $0xc] sm:$0xf] %vm3421_vm9, %v3756_v0  ;;  %v3211_v37 = vadd.f32 %v5695_v20, %v3168_v53  ;;  %v3169_v3 = vmul.f32 %v4310_v6, %v5690_v13 }
 0x1f9   : > { %3423 = vst.msk [vmem:[%s5708_s22 + $0x4] sm:$0xf] %vm3421_vm9, %v3754_v33  ;;  %v3209_v41 = vadd.f32 %v5695_v20, %v3166_v48  ;;  %v3167_v8 = vmul.f32 %v4311_v63, %v5690_v13 }
 0x1fa   : > { %v3247_v47 = vmax.f32 %v3211_v37, 0.0  ;;  %v3212_v22 = vadd.f32 %v5695_v20, %v3169_v3 }
 0x1fb   : > { %v3245_v61 = vmax.f32 %v3209_v41, 0.0  ;;  %v3210_v58 = vadd.f32 %v5695_v20, %v3167_v8  ;;  %v4276_v59 = vpop.f32.mrb[8].mxu0 }
 0x1fc   : > { %v3759_v17 = vpack.c.bf16 %v3247_v47, %v3247_v47  ;;  %v3248_v18 = vmax.f32 %v3212_v22, 0.0  ;;  %v4312_v34 = vadd.f32 %v4276_v59, %v5663_v57  ;;  %v3008_v10 = vpop.f32.mrb[9].mxu0 }
 0x1fd   : > { %v3757_v9 = vpack.c.bf16 %v3245_v61, %v3245_v61  ;;  %v3246_v26 = vmax.f32 %v3210_v58, 0.0  ;;  %v4313_v7 = vadd.f32 %v3008_v10, %v5665_v35  ;;  %v4277_v21 = vpop.f32.mrb[10].mxu0 }
 0x1fe   : > { %3428 = vst.msk [vmem:[%s5708_s22 + $0x18] sm:$0xf] %vm3421_vm9, %v3759_v17  ;;  %v3760_v30 = vpack.c.bf16 %v3248_v18, %v3248_v18  ;;  %v3172_v38 = vmul.f32 %v4312_v34, %v5690_v13  ;;  %v4314_v44 = vadd.f32 %v4277_v21, %v5667_v49  ;;  %v3011_v4 = vpop.f32.mrb[11].mxu0 }
 0x1ff   : > { %3426 = vst.msk [vmem:[%s5708_s22 + $0x10] sm:$0xf] %vm3421_vm9, %v3757_v9  ;;  %v3758_v23 = vpack.c.bf16 %v3246_v26, %v3246_v26  ;;  %v3170_v57 = vmul.f32 %v4313_v7, %v5690_v13  ;;  %v4315_v25 = vadd.f32 %v3011_v4, %v5669_v54 }
 0x200   : > { %3429 = vst.msk [vmem:[%s5708_s22 + $0x1c] sm:$0xf] %vm3421_vm9, %v3760_v30  ;;  %v3215_v35 = vadd.f32 %v5695_v20, %v3172_v38  ;;  %v3173_v51 = vmul.f32 %v4314_v44, %v5690_v13 }
 0x201   : > { %3427 = vst.msk [vmem:[%s5708_s22 + $0x14] sm:$0xf] %vm3421_vm9, %v3758_v23  ;;  %v3213_v50 = vadd.f32 %v5695_v20, %v3170_v57  ;;  %v3171_v49 = vmul.f32 %v4315_v25, %v5690_v13 }
 0x202   : > { %v3251_v31 = vmax.f32 %v3215_v35, 0.0  ;;  %v3216_v62 = vadd.f32 %v5695_v20, %v3173_v51 }
 0x203   : > { %v3249_v56 = vmax.f32 %v3213_v50, 0.0  ;;  %v3214_v54 = vadd.f32 %v5695_v20, %v3171_v49  ;;  %v4280_v24 = vpop.f32.mrb[12].mxu0 }
 0x204   : > { %v3763_v39 = vpack.c.bf16 %v3251_v31, %v3251_v31  ;;  %v3252_v27 = vmax.f32 %v3216_v62, 0.0  ;;  %v4316_v12 = vadd.f32 %v4280_v24, %v5671_v2  ;;  %v3024_v60 = vpop.f32.mrb[13].mxu0 }
 0x205   : > { %v3761_v40 = vpack.c.bf16 %v3249_v56, %v3249_v56  ;;  %v3250_v28 = vmax.f32 %v3214_v54, 0.0  ;;  %v4317_v15 = vadd.f32 %v3024_v60, %v5673_v43  ;;  %v4281_v32 = vpop.f32.mrb[14].mxu0 }
 0x206   : > { %3432 = vst.msk [vmem:[%s5708_s22 + $0x28] sm:$0xf] %vm3421_vm9, %v3763_v39  ;;  %v3764_v46 = vpack.c.bf16 %v3252_v27, %v3252_v27  ;;  %v3176_v45 = vmul.f32 %v4316_v12, %v5690_v13  ;;  %v4318_v5 = vadd.f32 %v4281_v32, %v5675_v19  ;;  %v3027_v52 = vpop.f32.mrb[15].mxu0 }
 0x207   : > { %3430 = vst.msk [vmem:[%s5708_s22 + $0x20] sm:$0xf] %vm3421_vm9, %v3761_v40  ;;  %v3762_v55 = vpack.c.bf16 %v3250_v28, %v3250_v28  ;;  %v3174_v2 = vmul.f32 %v4317_v15, %v5690_v13  ;;  %v4319_v36 = vadd.f32 %v3027_v52, %v5677_v14 }
 0x208   : > { %3433 = vst.msk [vmem:[%s5708_s22 + $0x2c] sm:$0xf] %vm3421_vm9, %v3764_v46  ;;  %v3219_v43 = vadd.f32 %v5695_v20, %v3176_v45  ;;  %v3177_v0 = vmul.f32 %v4318_v5, %v5690_v13 }
 0x209   : > { %3431 = vst.msk [vmem:[%s5708_s22 + $0x24] sm:$0xf] %vm3421_vm9, %v3762_v55  ;;  %v3217_v53 = vadd.f32 %v5695_v20, %v3174_v2  ;;  %v3175_v19 = vmul.f32 %v4319_v36, %v5690_v13 }
 0x20a   : > { %v3255_v6 = vmax.f32 %v3219_v43, 0.0  ;;  %v3220_v16 = vadd.f32 %v5695_v20, %v3177_v0 }
 0x20b   : > { %v4136_v33 = vpop.f32.mrb[20].mxu1  ;;  %v3253_v48 = vmax.f32 %v3217_v53, 0.0  ;;  %v3218_v14 = vadd.f32 %v5695_v20, %v3175_v19  ;;  %v4284_v63 = vpop.f32.mrb[16].mxu0 }
 0x20c   : > { %v1802_v37 = vpop.f32.mrb[21].mxu1  ;;  %v3767_v3 = vpack.c.bf16 %v3255_v6, %v3255_v6  ;;  %v3256_v41 = vmax.f32 %v3220_v16, 0.0  ;;  %v4320_v8 = vadd.f32 %v4284_v63, %v5679_v42  ;;  %v3040_v47 = vpop.f32.mrb[17].mxu0 }
 0x20d   : > { %v4137_v22 = vpop.f32.mrb[22].mxu1  ;;  %v3765_v61 = vpack.c.bf16 %v3253_v48, %v3253_v48  ;;  %v3254_v58 = vmax.f32 %v3218_v14, 0.0  ;;  %v4321_v59 = vadd.f32 %v3040_v47, %v5681_v29  ;;  %v4285_v17 = vpop.f32.mrb[18].mxu0 }
 0x20e   : > { %v1805_v18 = vpop.f32.mrb[23].mxu1  ;;  %3436 = vst.msk [vmem:[%s5708_s22 + $0x38] sm:$0xf] %vm3421_vm9, %v3767_v3  ;;  %v3768_v34 = vpack.c.bf16 %v3256_v41, %v3256_v41  ;;  %v3180_v10 = vmul.f32 %v4320_v8, %v5690_v13  ;;  %v4322_v9 = vadd.f32 %v4285_v17, %v5683_v11  ;;  %v3043_v26 = vpop.f32.mrb[19].mxu0 }
 0x20f   : > { %3434 = vst.msk [vmem:[%s5708_s22 + $0x30] sm:$0xf] %vm3421_vm9, %v3765_v61  ;;  %v3766_v42 = vpack.c.bf16 %v3254_v58, %v3254_v58  ;;  %v3178_v7 = vmul.f32 %v4321_v59, %v5690_v13  ;;  %v4323_v21 = vadd.f32 %v3043_v26, %v5685_v1 }
 0x210   : > { %3437 = vst.msk [vmem:[%s5708_s22 + $0x3c] sm:$0xf] %vm3421_vm9, %v3768_v34  ;;  %v3223_v29 = vadd.f32 %v5695_v20, %v3180_v10  ;;  %v3181_v30 = vmul.f32 %v4322_v9, %v5690_v13 }
 0x211   : > { %3435 = vst.msk [vmem:[%s5708_s22 + $0x34] sm:$0xf] %vm3421_vm9, %v3766_v42  ;;  %v3221_v38 = vadd.f32 %v5695_v20, %v3178_v7  ;;  %v3179_v11 = vmul.f32 %v4323_v21, %v5690_v13 }
 0x212   : > { %v3259_v44 = vmax.f32 %v3223_v29, 0.0  ;;  %v3224_v4 = vadd.f32 %v5695_v20, %v3181_v30 }
 0x213   : > { %v4140_v23 = vpop.f32.mrb[24].mxu1  ;;  %v3257_v57 = vmax.f32 %v3221_v38, 0.0  ;;  %v3222_v1 = vadd.f32 %v5695_v20, %v3179_v11  ;;  %v4288_v25 = vpop.f32.mrb[20].mxu0 }
 0x214   : > { %v1818_v35 = vpop.f32.mrb[25].mxu1  ;;  %v3771_v51 = vpack.c.bf16 %v3259_v44, %v3259_v44  ;;  %v3260_v50 = vmax.f32 %v3224_v4, 0.0  ;;  %v4324_v49 = vadd.f32 %v4288_v25, %v4136_v33  ;;  %v3056_v31 = vpop.f32.mrb[21].mxu0 }
 0x215   : > { %v4141_v62 = vpop.f32.mrb[26].mxu1  ;;  %v3769_v56 = vpack.c.bf16 %v3257_v57, %v3257_v57  ;;  %v3258_v54 = vmax.f32 %v3222_v1, 0.0  ;;  %v4325_v24 = vadd.f32 %v3056_v31, %v1802_v37  ;;  %v4289_v39 = vpop.f32.mrb[22].mxu0 }
 0x216   : > { %v1821_v27 = vpop.f32.mrb[27].mxu1  ;;  %3440 = vst.msk [vmem:[%s5708_s22 + $0x48] sm:$0xf] %vm3421_vm9, %v3771_v51  ;;  %v3772_v12 = vpack.c.bf16 %v3260_v50, %v3260_v50  ;;  %v3184_v60 = vmul.f32 %v4324_v49, %v5690_v13  ;;  %v4326_v40 = vadd.f32 %v4289_v39, %v4137_v22  ;;  %v3059_v28 = vpop.f32.mrb[23].mxu0 }
 0x217   : > { %3438 = vst.msk [vmem:[%s5708_s22 + $0x40] sm:$0xf] %vm3421_vm9, %v3769_v56  ;;  %v3770_v15 = vpack.c.bf16 %v3258_v54, %v3258_v54  ;;  %v3182_v32 = vmul.f32 %v4325_v24, %v5690_v13  ;;  %v4327_v46 = vadd.f32 %v3059_v28, %v1805_v18 }
 0x218   : > { %3441 = vst.msk [vmem:[%s5708_s22 + $0x4c] sm:$0xf] %vm3421_vm9, %v3772_v12  ;;  %v3227_v45 = vadd.f32 %v5695_v20, %v3184_v60  ;;  %v3185_v5 = vmul.f32 %v4326_v40, %v5690_v13 }
 0x219   : > { %3439 = vst.msk [vmem:[%s5708_s22 + $0x44] sm:$0xf] %vm3421_vm9, %v3770_v15  ;;  %v3225_v52 = vadd.f32 %v5695_v20, %v3182_v32  ;;  %v3183_v55 = vmul.f32 %v4327_v46, %v5690_v13 }
 0x21a   : > { %v3263_v2 = vmax.f32 %v3227_v45, 0.0  ;;  %v3228_v36 = vadd.f32 %v5695_v20, %v3185_v5 }
 0x21b   : > { %v4144_v43 = vpop.f32.mrb[28].mxu1  ;;  %v3261_v0 = vmax.f32 %v3225_v52, 0.0  ;;  %v3226_v53 = vadd.f32 %v5695_v20, %v3183_v55  ;;  %v4292_v19 = vpop.f32.mrb[24].mxu0 }
 0x21c   : > { %v1834_v6 = vpop.f32.mrb[29].mxu1  ;;  %v3775_v16 = vpack.c.bf16 %v3263_v2, %v3263_v2  ;;  %v3264_v33 = vmax.f32 %v3228_v36, 0.0  ;;  %v4328_v48 = vadd.f32 %v4292_v19, %v4140_v23  ;;  %v3072_v14 = vpop.f32.mrb[25].mxu0 }
 0x21d   : > { %v4145_v63 = vpop.f32.mrb[30].mxu1  ;;  %v3773_v37 = vpack.c.bf16 %v3261_v0, %v3261_v0  ;;  %v3262_v3 = vmax.f32 %v3226_v53, 0.0  ;;  %v4329_v41 = vadd.f32 %v3072_v14, %v1818_v35  ;;  %v4293_v8 = vpop.f32.mrb[26].mxu0 }
 0x21e   : > { %v1837_v47 = vpop.f32.mrb[31].mxu1  ;;  %3444 = vst.msk [vmem:[%s5708_s22 + $0x58] sm:$0xf] %vm3421_vm9, %v3775_v16  ;;  %v3776_v22 = vpack.c.bf16 %v3264_v33, %v3264_v33  ;;  %v3188_v61 = vmul.f32 %v4328_v48, %v5690_v13  ;;  %v4330_v58 = vadd.f32 %v4293_v8, %v4141_v62  ;;  %v3075_v59 = vpop.f32.mrb[27].mxu0 }
 0x21f   : > { %3442 = vst.msk [vmem:[%s5708_s22 + $0x50] sm:$0xf] %vm3421_vm9, %v3773_v37  ;;  %v3774_v17 = vpack.c.bf16 %v3262_v3, %v3262_v3  ;;  %v3186_v18 = vmul.f32 %v4329_v41, %v5690_v13  ;;  %v4331_v34 = vadd.f32 %v3075_v59, %v1821_v27 }
 0x220   : > { %3445 = vst.msk [vmem:[%s5708_s22 + $0x5c] sm:$0xf] %vm3421_vm9, %v3776_v22  ;;  %v3231_v10 = vadd.f32 %v5695_v20, %v3188_v61  ;;  %v3189_v9 = vmul.f32 %v4330_v58, %v5690_v13 }
 0x221   : > { %3443 = vst.msk [vmem:[%s5708_s22 + $0x54] sm:$0xf] %vm3421_vm9, %v3774_v17  ;;  %v3229_v26 = vadd.f32 %v5695_v20, %v3186_v18  ;;  %v3187_v42 = vmul.f32 %v4331_v34, %v5690_v13 }
 0x222   : > { %v3267_v7 = vmax.f32 %v3231_v10, 0.0  ;;  %v3232_v21 = vadd.f32 %v5695_v20, %v3189_v9 }
 0x223   : > { %v4148_v29 = vpop.f32.mrb[32].mxu1  ;;  %v3265_v30 = vmax.f32 %v3229_v26, 0.0  ;;  %v3230_v38 = vadd.f32 %v5695_v20, %v3187_v42  ;;  %v4296_v11 = vpop.f32.mrb[28].mxu0 }
 0x224   : > { %v1850_v44 = vpop.f32.mrb[33].mxu1  ;;  %v3779_v4 = vpack.c.bf16 %v3267_v7, %v3267_v7  ;;  %v3268_v23 = vmax.f32 %v3232_v21, 0.0  ;;  %v4332_v57 = vadd.f32 %v4296_v11, %v4144_v43  ;;  %v3088_v1 = vpop.f32.mrb[29].mxu0 }
 0x225   : > { %v4149_v25 = vpop.f32.mrb[34].mxu1  ;;  %v3777_v35 = vpack.c.bf16 %v3265_v30, %v3265_v30  ;;  %v3266_v51 = vmax.f32 %v3230_v38, 0.0  ;;  %v4333_v50 = vadd.f32 %v3088_v1, %v1834_v6  ;;  %v4297_v49 = vpop.f32.mrb[30].mxu0 }
 0x226   : > { %v1853_v31 = vpop.f32.mrb[35].mxu1  ;;  %3448 = vst.msk [vmem:[%s5708_s22 + $0x68] sm:$0xf] %vm3421_vm9, %v3779_v4  ;;  %v3780_v62 = vpack.c.bf16 %v3268_v23, %v3268_v23  ;;  %v3192_v56 = vmul.f32 %v4332_v57, %v5690_v13  ;;  %v4334_v54 = vadd.f32 %v4297_v49, %v4145_v63  ;;  %v3091_v24 = vpop.f32.mrb[31].mxu0 }
 0x227   : > { %3446 = vst.msk [vmem:[%s5708_s22 + $0x60] sm:$0xf] %vm3421_vm9, %v3777_v35  ;;  %v3778_v39 = vpack.c.bf16 %v3266_v51, %v3266_v51  ;;  %v3190_v27 = vmul.f32 %v4333_v50, %v5690_v13  ;;  %v4335_v12 = vadd.f32 %v3091_v24, %v1837_v47 }
 0x228   : > { %3449 = vst.msk [vmem:[%s5708_s22 + $0x6c] sm:$0xf] %vm3421_vm9, %v3780_v62  ;;  %v3235_v60 = vadd.f32 %v5695_v20, %v3192_v56  ;;  %v3193_v40 = vmul.f32 %v4334_v54, %v5690_v13 }
 0x229   : > { %3447 = vst.msk [vmem:[%s5708_s22 + $0x64] sm:$0xf] %vm3421_vm9, %v3778_v39  ;;  %v3233_v28 = vadd.f32 %v5695_v20, %v3190_v27  ;;  %v3191_v15 = vmul.f32 %v4335_v12, %v5690_v13 }
 0x22a   : > { %v3271_v32 = vmax.f32 %v3235_v60, 0.0  ;;  %v3236_v46 = vadd.f32 %v5695_v20, %v3193_v40 }
 0x22b   : > { %v3269_v45 = vmax.f32 %v3233_v28, 0.0  ;;  %v3234_v5 = vadd.f32 %v5695_v20, %v3191_v15  ;;  %v4300_v52 = vpop.f32.mrb[32].mxu0 }
 0x22c   : > { %v3783_v55 = vpack.c.bf16 %v3271_v32, %v3271_v32  ;;  %v3272_v2 = vmax.f32 %v3236_v46, 0.0  ;;  %v4336_v36 = vadd.f32 %v4300_v52, %v4148_v29  ;;  %v3104_v43 = vpop.f32.mrb[33].mxu0 }
 0x22d   : > { %v3781_v0 = vpack.c.bf16 %v3269_v45, %v3269_v45  ;;  %v3270_v53 = vmax.f32 %v3234_v5, 0.0  ;;  %v4337_v19 = vadd.f32 %v3104_v43, %v1850_v44  ;;  %v4301_v6 = vpop.f32.mrb[34].mxu0 }
 0x22e   : > { %3452 = vst.msk [vmem:[%s5708_s22 + $0x78] sm:$0xf] %vm3421_vm9, %v3783_v55  ;;  %v3784_v16 = vpack.c.bf16 %v3272_v2, %v3272_v2  ;;  %v3196_v33 = vmul.f32 %v4336_v36, %v5690_v13  ;;  %v4338_v48 = vadd.f32 %v4301_v6, %v4149_v25  ;;  %v3107_v14 = vpop.f32.mrb[35].mxu0 }
 0x22f   : > { %3450 = vst.msk [vmem:[%s5708_s22 + $0x70] sm:$0xf] %vm3421_vm9, %v3781_v0  ;;  %v3782_v63 = vpack.c.bf16 %v3270_v53, %v3270_v53  ;;  %v3194_v37 = vmul.f32 %v4337_v19, %v5690_v13  ;;  %v4339_v3 = vadd.f32 %v3107_v14, %v1853_v31 }
 0x230   : > { %3453 = vst.msk [vmem:[%s5708_s22 + $0x7c] sm:$0xf] %vm3421_vm9, %v3784_v16  ;;  %v3239_v41 = vadd.f32 %v5695_v20, %v3196_v33  ;;  %v3197_v8 = vmul.f32 %v4338_v48, %v5690_v13 }
 0x231   : > { %3451 = vst.msk [vmem:[%s5708_s22 + $0x74] sm:$0xf] %vm3421_vm9, %v3782_v63  ;;  %v3237_v47 = vadd.f32 %v5695_v20, %v3194_v37  ;;  %v3195_v22 = vmul.f32 %v4339_v3, %v5690_v13 }
 0x232   : > { %v3275_v61 = vmax.f32 %v3239_v41, 0.0  ;;  %v3240_v58 = vadd.f32 %v5695_v20, %v3197_v8 }
 0x233   : > { %v3273_v59 = vmax.f32 %v3237_v47, 0.0  ;;  %v3238_v17 = vadd.f32 %v5695_v20, %v3195_v22 }
 0x234   : > { %v3787_v18 = vpack.c.bf16 %v3275_v61, %v3275_v61  ;;  %v3276_v34 = vmax.f32 %v3240_v58, 0.0 }
 0x235   : > { %v3785_v10 = vpack.c.bf16 %v3273_v59, %v3273_v59  ;;  %v3274_v9 = vmax.f32 %v3238_v17, 0.0 }
 0x236   : > { %3456 = vst.msk [vmem:[%s5708_s22 + $0x88] sm:$0xf] %vm3421_vm9, %v3787_v18  ;;  %v3788_v26 = vpack.c.bf16 %v3276_v34, %v3276_v34 }
 0x237   : > { %3454 = vst.msk [vmem:[%s5708_s22 + $0x80] sm:$0xf] %vm3421_vm9, %v3785_v10  ;;  %v3786_v42 = vpack.c.bf16 %v3274_v9, %v3274_v9 }
 0x238   : > { %3457 = vst.msk [vmem:[%s5708_s22 + $0x8c] sm:$0xf] %vm3421_vm9, %v3788_v26 }
 0x239   : > { %3455 = vst.msk [vmem:[%s5708_s22 + $0x84] sm:$0xf] %vm3421_vm9, %v3786_v42 }
 0x23a PF: > { %s14_s15 = sadd.s32 1, %s4642_s15  }
 0x23b   : > { %p11_p4 = scmp.ge.s32.totalorder %s14_s15, 4  }
 0x23d   :  { %13 = sbr.rel (!%p11_p4) target bundleno = 1 (0x1), region = 74 }

</bundles_post_ra>
